<compile_context>
chip_gen: v7x
topology: tpu7x:2x2x1
jax: 0.10.0
libtpu: 0.0.40
codegen_flags: <defaults>
</compile_context>

<pallas_src>
import numpy as np

import jax
import jax.numpy as jnp
from jax.experimental import pallas as pl
from jax.experimental.pallas import tpu as pltpu


_CP = 128      # lane-dense channel slab width
_K = 3         # conv kernel size
_STRIDE = 2
_PAD = 1


# ----------------------------------------------------------------------------
# Fused encoder kernel: 3 x (gather matmul + 9 tap matmuls + bias + LeakyReLU)
# ----------------------------------------------------------------------------
def _encoder_kernel(x_ref,
                    s0_ref, w0_ref, b0_ref,
                    s1_ref, w1_ref, b1_ref,
                    s2_ref, w2_ref, b2_ref,
                    o_ref):

    def conv_layer(x_bf, s_ref, w_ref, b_ref, leaky):
        # x_bf : (R, 128)   bf16 activations (flat n*h*w rows, lane-dense C)
        # s_ref: (9*M, R)   bf16 constant 0/1 gather matrix (im2col+stride+pad)
        # w_ref: (9,128,128) bf16 per-tap weights;  b_ref: (1, 128) f32 bias
        m = s_ref.shape[0] // 9
        # One MXU matmul gathers all 9 taps for every output pixel (rows of S
        # are one-hot or zero, so this is an exact copy / zero-pad in bf16).
        g = jnp.dot(s_ref[...], x_bf, preferred_element_type=jnp.float32)
        g = g.astype(jnp.bfloat16)
        acc = jnp.zeros((m, _CP), jnp.float32)
        for t in range(9):   # unrolled: 9 aligned (M,128) @ (128,128) matmuls
            acc = acc + jnp.dot(g[t * m:(t + 1) * m, :], w_ref[t],
                                preferred_element_type=jnp.float32)
        acc = acc + b_ref[...]                      # bias in f32
        if leaky:                                   # nn.LeakyReLU() slope 0.01
            acc = jnp.where(acc >= 0.0, acc, 0.01 * acc)
        return acc

    a1 = conv_layer(x_ref[...], s0_ref, w0_ref, b0_ref, leaky=True)
    a2 = conv_layer(a1.astype(jnp.bfloat16), s1_ref, w1_ref, b1_ref, leaky=True)
    a3 = conv_layer(a2.astype(jnp.bfloat16), s2_ref, w2_ref, b2_ref, leaky=False)
    o_ref[...] = a3                                 # (M_out, 128) lane-dense f32


# ----------------------------------------------------------------------------
# Trace-time constants: gather matrices and padded weight/bias layouts
# ----------------------------------------------------------------------------
def _gather_matrix(n, h, w):
    """0/1 matrix folding im2col + stride-2 + zero padding for one conv layer.

    Returns S of shape (9*M, R), M = n*Ho*Wo, R = n*h*w, such that
    (S @ Xflat)[t*M + o] is the input pixel read by output pixel o for tap t
    (all-zero row where the 3x3 window falls in the zero-padding).
    """
    ho = (h + 2 * _PAD - _K) // _STRIDE + 1
    wo = (w + 2 * _PAD - _K) // _STRIDE + 1
    m, r = n * ho * wo, n * h * w
    s = np.zeros((_K * _K, m, r), np.float32)
    for b in range(n):
        for oh in range(ho):
            for ow in range(wo):
                o = (b * ho + oh) * wo + ow
                for dh in range(_K):
                    for dw in range(_K):
                        ih = oh * _STRIDE - _PAD + dh
                        iw = ow * _STRIDE - _PAD + dw
                        if 0 <= ih < h and 0 <= iw < w:
                            s[dh * _K + dw, o, (b * h + ih) * w + iw] = 1.0
    return jnp.asarray(s.reshape(_K * _K * m, r), jnp.bfloat16), (ho, wo)


def _prep_weight(weight):
    """PyTorch (Cout, Cin, 3, 3) -> (9, 128, 128) bf16, W[t][ci, co]."""
    cout, cin, kh, kw = weight.shape
    wt = jnp.transpose(weight, (2, 3, 1, 0)).reshape(kh * kw, cin, cout)
    wt = jnp.pad(wt, ((0, 0), (0, _CP - cin), (0, _CP - cout)))
    return wt.astype(jnp.bfloat16)


def _prep_bias(bias):
    cout = bias.shape[0]
    return jnp.pad(bias, (0, _CP - cout)).reshape(1, _CP).astype(jnp.float32)


# ----------------------------------------------------------------------------
# Public forward (NCHW in / NCHW out, matching the PyTorch module)
# ----------------------------------------------------------------------------
def encoder_forward(params, x_nchw):
    n, cin, h, w = x_nchw.shape

    s0, (ho1, wo1) = _gather_matrix(n, h, w)
    s1, (ho2, wo2) = _gather_matrix(n, ho1, wo1)
    s2, (ho3, wo3) = _gather_matrix(n, ho2, wo2)

    # NCHW -> lane-dense flat NHWC: (N*H*W, 128) bf16
    xf = jnp.transpose(x_nchw, (0, 2, 3, 1)).reshape(n * h * w, cin)
    xf = jnp.pad(xf, ((0, 0), (0, _CP - cin))).astype(jnp.bfloat16)

    (w0, b0), (w1, b1), (w2, b2) = params["enc0"], params["enc1"], params["enc2"]
    cout = w2.shape[0]

    args = (xf,
            s0, _prep_weight(w0), _prep_bias(b0),
            s1, _prep_weight(w1), _prep_bias(b1),
            s2, _prep_weight(w2), _prep_bias(b2))

    out_flat = pl.pallas_call(
        _encoder_kernel,
        out_shape=jax.ShapeDtypeStruct((n * ho3 * wo3, _CP), jnp.float32),
        in_specs=[pl.BlockSpec(memory_space=pltpu.MemorySpace.VMEM)] * len(args),
        out_specs=pl.BlockSpec(memory_space=pltpu.MemorySpace.VMEM),
    )(*args)

    out = out_flat.reshape(n, ho3, wo3, _CP)[..., :cout]
    return jnp.transpose(out, (0, 3, 1, 2))         # NHWC -> NCHW


# ----------------------------------------------------------------------------
# Deterministic parameter init (PyTorch-style uniform bounds)
# ----------------------------------------------------------------------------
def init_conv_params(key, cin, cout, k=3):
    wkey, bkey = jax.random.split(key)
    bound = 1.0 / np.sqrt(cin * k * k)
    w = jax.random.uniform(wkey, (cout, cin, k, k), jnp.float32, -bound, bound)
    b = jax.random.uniform(bkey, (cout,), jnp.float32, -bound, bound)
    return w, b


def init_encoder_params(key, in_channels=3, out_channels=64):
    k0, k1, k2 = jax.random.split(key, 3)
    return {
        "enc0": init_conv_params(k0, in_channels, 16),
        "enc1": init_conv_params(k1, 16, 32),
        "enc2": init_conv_params(k2, 32, out_channels),
    }


# ----------------------------------------------------------------------------
# Pure-JAX reference (for a correctness check)
# ----------------------------------------------------------------------------
def _encoder_reference(params, x):
    def conv(x, w, b, leaky):
        y = jax.lax.conv_general_dilated(
            x, w, window_strides=(_STRIDE, _STRIDE),
            padding=((_PAD, _PAD), (_PAD, _PAD)),
            dimension_numbers=("NCHW", "OIHW", "NCHW"),
            precision=jax.lax.Precision.HIGHEST)
        y = y + b[None, :, None, None]
        return jnp.where(y >= 0.0, y, 0.01 * y) if leaky else y

    y = conv(x, *params["enc0"], True)
    y = conv(y, *params["enc1"], True)
    y = conv(y, *params["enc2"], False)
    return y


if __name__ == "__main__":
    key = jax.random.PRNGKey(0)
    pkey, xkey = jax.random.split(key)

    params = init_encoder_params(pkey, in_channels=3, out_channels=64)
    x = jax.random.normal(xkey, (2, 3, 16, 16), jnp.float32)

    fwd = jax.jit(encoder_forward)
    out = jax.block_until_ready(fwd(params, x))

    assert out.shape == (2, 64, 2, 2), out.shape

    ref = _encoder_reference(params, x)
    err = float(jnp.max(jnp.abs(out - ref)))
    assert err < 5e-2, f"max abs error vs reference: {err}"

    print("KERNEL_OK")
</pallas_src>

<mosaic_0001>
module attributes {stable_mosaic.version = 11 : i64} {
  func.func @_encoder_kernel(%arg0: memref<512x128xbf16, #tpu.memory_space<vmem>>, %arg1: memref<1152x512xbf16, #tpu.memory_space<vmem>>, %arg2: memref<9x128x128xbf16, #tpu.memory_space<vmem>>, %arg3: memref<1x128xf32, #tpu.memory_space<vmem>>, %arg4: memref<288x128xbf16, #tpu.memory_space<vmem>>, %arg5: memref<9x128x128xbf16, #tpu.memory_space<vmem>>, %arg6: memref<1x128xf32, #tpu.memory_space<vmem>>, %arg7: memref<72x32xbf16, #tpu.memory_space<vmem>>, %arg8: memref<9x128x128xbf16, #tpu.memory_space<vmem>>, %arg9: memref<1x128xf32, #tpu.memory_space<vmem>>, %arg10: memref<8x128xf32, #tpu.memory_space<vmem>>) attributes {dimension_semantics = [], scalar_prefetch = 0 : i64, scratch_operands = 0 : i64, tpu.core_type = #tpu.core_type<tc>} {
    %c0 = arith.constant 0 : index
    %c0_0 = arith.constant 0 : index
    %0 = vector.load %arg0[%c0, %c0_0] : memref<512x128xbf16, #tpu.memory_space<vmem>>, vector<512x128xbf16>
    %c0_1 = arith.constant 0 : index
    %c0_2 = arith.constant 0 : index
    %1 = vector.load %arg1[%c0_1, %c0_2] : memref<1152x512xbf16, #tpu.memory_space<vmem>>, vector<1152x512xbf16>
    %cst = arith.constant dense<0.000000e+00> : vector<1152x128xf32>
    %2 = tpu.matmul %1, %0, %cst {dimension_numbers = #tpu.dot_dimension_numbers<[1], [0], [0], [1], [0, 0, 1, 1], [], []>} : vector<1152x512xbf16>, vector<512x128xbf16>, vector<1152x128xf32> -> vector<1152x128xf32>
    %3 = arith.truncf %2 : vector<1152x128xf32> to vector<1152x128xbf16>
    %cst_3 = arith.constant 0.000000e+00 : f32
    %4 = vector.broadcast %cst_3 : f32 to vector<128x128xf32>
    %5 = vector.extract_strided_slice %3 {offsets = [0, 0], sizes = [128, 128], strides = [1, 1]} : vector<1152x128xbf16> to vector<128x128xbf16>
    %c0_4 = arith.constant 0 : index
    %c0_5 = arith.constant 0 : index
    %c0_6 = arith.constant 0 : index
    %6 = vector.load %arg2[%c0_4, %c0_5, %c0_6] : memref<9x128x128xbf16, #tpu.memory_space<vmem>>, vector<1x128x128xbf16>
    %7 = vector.shape_cast %6 : vector<1x128x128xbf16> to vector<128x128xbf16>
    %cst_7 = arith.constant dense<0.000000e+00> : vector<128x128xf32>
    %8 = tpu.matmul %5, %7, %cst_7 {dimension_numbers = #tpu.dot_dimension_numbers<[1], [0], [0], [1], [0, 0, 1, 1], [], []>} : vector<128x128xbf16>, vector<128x128xbf16>, vector<128x128xf32> -> vector<128x128xf32>
    %9 = arith.addf %4, %8 : vector<128x128xf32>
    %10 = vector.extract_strided_slice %3 {offsets = [128, 0], sizes = [128, 128], strides = [1, 1]} : vector<1152x128xbf16> to vector<128x128xbf16>
    %c1 = arith.constant 1 : index
    %c0_8 = arith.constant 0 : index
    %c0_9 = arith.constant 0 : index
    %11 = vector.load %arg2[%c1, %c0_8, %c0_9] : memref<9x128x128xbf16, #tpu.memory_space<vmem>>, vector<1x128x128xbf16>
    %12 = vector.shape_cast %11 : vector<1x128x128xbf16> to vector<128x128xbf16>
    %cst_10 = arith.constant dense<0.000000e+00> : vector<128x128xf32>
    %13 = tpu.matmul %10, %12, %cst_10 {dimension_numbers = #tpu.dot_dimension_numbers<[1], [0], [0], [1], [0, 0, 1, 1], [], []>} : vector<128x128xbf16>, vector<128x128xbf16>, vector<128x128xf32> -> vector<128x128xf32>
    %14 = arith.addf %9, %13 : vector<128x128xf32>
    %15 = vector.extract_strided_slice %3 {offsets = [256, 0], sizes = [128, 128], strides = [1, 1]} : vector<1152x128xbf16> to vector<128x128xbf16>
    %c2 = arith.constant 2 : index
    %c0_11 = arith.constant 0 : index
    %c0_12 = arith.constant 0 : index
    %16 = vector.load %arg2[%c2, %c0_11, %c0_12] : memref<9x128x128xbf16, #tpu.memory_space<vmem>>, vector<1x128x128xbf16>
    %17 = vector.shape_cast %16 : vector<1x128x128xbf16> to vector<128x128xbf16>
    %cst_13 = arith.constant dense<0.000000e+00> : vector<128x128xf32>
    %18 = tpu.matmul %15, %17, %cst_13 {dimension_numbers = #tpu.dot_dimension_numbers<[1], [0], [0], [1], [0, 0, 1, 1], [], []>} : vector<128x128xbf16>, vector<128x128xbf16>, vector<128x128xf32> -> vector<128x128xf32>
    %19 = arith.addf %14, %18 : vector<128x128xf32>
    %20 = vector.extract_strided_slice %3 {offsets = [384, 0], sizes = [128, 128], strides = [1, 1]} : vector<1152x128xbf16> to vector<128x128xbf16>
    %c3 = arith.constant 3 : index
    %c0_14 = arith.constant 0 : index
    %c0_15 = arith.constant 0 : index
    %21 = vector.load %arg2[%c3, %c0_14, %c0_15] : memref<9x128x128xbf16, #tpu.memory_space<vmem>>, vector<1x128x128xbf16>
    %22 = vector.shape_cast %21 : vector<1x128x128xbf16> to vector<128x128xbf16>
    %cst_16 = arith.constant dense<0.000000e+00> : vector<128x128xf32>
    %23 = tpu.matmul %20, %22, %cst_16 {dimension_numbers = #tpu.dot_dimension_numbers<[1], [0], [0], [1], [0, 0, 1, 1], [], []>} : vector<128x128xbf16>, vector<128x128xbf16>, vector<128x128xf32> -> vector<128x128xf32>
    %24 = arith.addf %19, %23 : vector<128x128xf32>
    %25 = vector.extract_strided_slice %3 {offsets = [512, 0], sizes = [128, 128], strides = [1, 1]} : vector<1152x128xbf16> to vector<128x128xbf16>
    %c4 = arith.constant 4 : index
    %c0_17 = arith.constant 0 : index
    %c0_18 = arith.constant 0 : index
    %26 = vector.load %arg2[%c4, %c0_17, %c0_18] : memref<9x128x128xbf16, #tpu.memory_space<vmem>>, vector<1x128x128xbf16>
    %27 = vector.shape_cast %26 : vector<1x128x128xbf16> to vector<128x128xbf16>
    %cst_19 = arith.constant dense<0.000000e+00> : vector<128x128xf32>
    %28 = tpu.matmul %25, %27, %cst_19 {dimension_numbers = #tpu.dot_dimension_numbers<[1], [0], [0], [1], [0, 0, 1, 1], [], []>} : vector<128x128xbf16>, vector<128x128xbf16>, vector<128x128xf32> -> vector<128x128xf32>
    %29 = arith.addf %24, %28 : vector<128x128xf32>
    %30 = vector.extract_strided_slice %3 {offsets = [640, 0], sizes = [128, 128], strides = [1, 1]} : vector<1152x128xbf16> to vector<128x128xbf16>
    %c5 = arith.constant 5 : index
    %c0_20 = arith.constant 0 : index
    %c0_21 = arith.constant 0 : index
    %31 = vector.load %arg2[%c5, %c0_20, %c0_21] : memref<9x128x128xbf16, #tpu.memory_space<vmem>>, vector<1x128x128xbf16>
    %32 = vector.shape_cast %31 : vector<1x128x128xbf16> to vector<128x128xbf16>
    %cst_22 = arith.constant dense<0.000000e+00> : vector<128x128xf32>
    %33 = tpu.matmul %30, %32, %cst_22 {dimension_numbers = #tpu.dot_dimension_numbers<[1], [0], [0], [1], [0, 0, 1, 1], [], []>} : vector<128x128xbf16>, vector<128x128xbf16>, vector<128x128xf32> -> vector<128x128xf32>
    %34 = arith.addf %29, %33 : vector<128x128xf32>
    %35 = vector.extract_strided_slice %3 {offsets = [768, 0], sizes = [128, 128], strides = [1, 1]} : vector<1152x128xbf16> to vector<128x128xbf16>
    %c6 = arith.constant 6 : index
    %c0_23 = arith.constant 0 : index
    %c0_24 = arith.constant 0 : index
    %36 = vector.load %arg2[%c6, %c0_23, %c0_24] : memref<9x128x128xbf16, #tpu.memory_space<vmem>>, vector<1x128x128xbf16>
    %37 = vector.shape_cast %36 : vector<1x128x128xbf16> to vector<128x128xbf16>
    %cst_25 = arith.constant dense<0.000000e+00> : vector<128x128xf32>
    %38 = tpu.matmul %35, %37, %cst_25 {dimension_numbers = #tpu.dot_dimension_numbers<[1], [0], [0], [1], [0, 0, 1, 1], [], []>} : vector<128x128xbf16>, vector<128x128xbf16>, vector<128x128xf32> -> vector<128x128xf32>
    %39 = arith.addf %34, %38 : vector<128x128xf32>
    %40 = vector.extract_strided_slice %3 {offsets = [896, 0], sizes = [128, 128], strides = [1, 1]} : vector<1152x128xbf16> to vector<128x128xbf16>
    %c7 = arith.constant 7 : index
    %c0_26 = arith.constant 0 : index
    %c0_27 = arith.constant 0 : index
    %41 = vector.load %arg2[%c7, %c0_26, %c0_27] : memref<9x128x128xbf16, #tpu.memory_space<vmem>>, vector<1x128x128xbf16>
    %42 = vector.shape_cast %41 : vector<1x128x128xbf16> to vector<128x128xbf16>
    %cst_28 = arith.constant dense<0.000000e+00> : vector<128x128xf32>
    %43 = tpu.matmul %40, %42, %cst_28 {dimension_numbers = #tpu.dot_dimension_numbers<[1], [0], [0], [1], [0, 0, 1, 1], [], []>} : vector<128x128xbf16>, vector<128x128xbf16>, vector<128x128xf32> -> vector<128x128xf32>
    %44 = arith.addf %39, %43 : vector<128x128xf32>
    %45 = vector.extract_strided_slice %3 {offsets = [1024, 0], sizes = [128, 128], strides = [1, 1]} : vector<1152x128xbf16> to vector<128x128xbf16>
    %c8 = arith.constant 8 : index
    %c0_29 = arith.constant 0 : index
    %c0_30 = arith.constant 0 : index
    %46 = vector.load %arg2[%c8, %c0_29, %c0_30] : memref<9x128x128xbf16, #tpu.memory_space<vmem>>, vector<1x128x128xbf16>
    %47 = vector.shape_cast %46 : vector<1x128x128xbf16> to vector<128x128xbf16>
    %cst_31 = arith.constant dense<0.000000e+00> : vector<128x128xf32>
    %48 = tpu.matmul %45, %47, %cst_31 {dimension_numbers = #tpu.dot_dimension_numbers<[1], [0], [0], [1], [0, 0, 1, 1], [], []>} : vector<128x128xbf16>, vector<128x128xbf16>, vector<128x128xf32> -> vector<128x128xf32>
    %49 = arith.addf %44, %48 : vector<128x128xf32>
    %c0_32 = arith.constant 0 : index
    %c0_33 = arith.constant 0 : index
    %50 = vector.load %arg3[%c0_32, %c0_33] : memref<1x128xf32, #tpu.memory_space<vmem>>, vector<1x128xf32>
    %51 = vector.broadcast %50 : vector<1x128xf32> to vector<128x128xf32>
    %52 = arith.addf %49, %51 : vector<128x128xf32>
    %cst_34 = arith.constant 0.000000e+00 : f32
    %53 = vector.broadcast %cst_34 : f32 to vector<128x128xf32>
    %54 = arith.cmpf oge, %52, %53 : vector<128x128xf32>
    %cst_35 = arith.constant 0.00999999977 : f32
    %55 = vector.broadcast %cst_35 : f32 to vector<128x128xf32>
    %56 = arith.mulf %55, %52 : vector<128x128xf32>
    %57 = arith.select %54, %52, %56 : vector<128x128xi1>, vector<128x128xf32>
    %58 = arith.truncf %57 : vector<128x128xf32> to vector<128x128xbf16>
    %c0_36 = arith.constant 0 : index
    %c0_37 = arith.constant 0 : index
    %59 = vector.load %arg4[%c0_36, %c0_37] : memref<288x128xbf16, #tpu.memory_space<vmem>>, vector<288x128xbf16>
    %cst_38 = arith.constant dense<0.000000e+00> : vector<288x128xf32>
    %60 = tpu.matmul %59, %58, %cst_38 {dimension_numbers = #tpu.dot_dimension_numbers<[1], [0], [0], [1], [0, 0, 1, 1], [], []>} : vector<288x128xbf16>, vector<128x128xbf16>, vector<288x128xf32> -> vector<288x128xf32>
    %61 = arith.truncf %60 : vector<288x128xf32> to vector<288x128xbf16>
    %cst_39 = arith.constant 0.000000e+00 : f32
    %62 = vector.broadcast %cst_39 : f32 to vector<32x128xf32>
    %63 = vector.extract_strided_slice %61 {offsets = [0, 0], sizes = [32, 128], strides = [1, 1]} : vector<288x128xbf16> to vector<32x128xbf16>
    %c0_40 = arith.constant 0 : index
    %c0_41 = arith.constant 0 : index
    %c0_42 = arith.constant 0 : index
    %64 = vector.load %arg5[%c0_40, %c0_41, %c0_42] : memref<9x128x128xbf16, #tpu.memory_space<vmem>>, vector<1x128x128xbf16>
    %65 = vector.shape_cast %64 : vector<1x128x128xbf16> to vector<128x128xbf16>
    %cst_43 = arith.constant dense<0.000000e+00> : vector<32x128xf32>
    %66 = tpu.matmul %63, %65, %cst_43 {dimension_numbers = #tpu.dot_dimension_numbers<[1], [0], [0], [1], [0, 0, 1, 1], [], []>} : vector<32x128xbf16>, vector<128x128xbf16>, vector<32x128xf32> -> vector<32x128xf32>
    %67 = arith.addf %62, %66 : vector<32x128xf32>
    %68 = vector.extract_strided_slice %61 {offsets = [32, 0], sizes = [32, 128], strides = [1, 1]} : vector<288x128xbf16> to vector<32x128xbf16>
    %c1_44 = arith.constant 1 : index
    %c0_45 = arith.constant 0 : index
    %c0_46 = arith.constant 0 : index
    %69 = vector.load %arg5[%c1_44, %c0_45, %c0_46] : memref<9x128x128xbf16, #tpu.memory_space<vmem>>, vector<1x128x128xbf16>
    %70 = vector.shape_cast %69 : vector<1x128x128xbf16> to vector<128x128xbf16>
    %cst_47 = arith.constant dense<0.000000e+00> : vector<32x128xf32>
    %71 = tpu.matmul %68, %70, %cst_47 {dimension_numbers = #tpu.dot_dimension_numbers<[1], [0], [0], [1], [0, 0, 1, 1], [], []>} : vector<32x128xbf16>, vector<128x128xbf16>, vector<32x128xf32> -> vector<32x128xf32>
    %72 = arith.addf %67, %71 : vector<32x128xf32>
    %73 = vector.extract_strided_slice %61 {offsets = [64, 0], sizes = [32, 128], strides = [1, 1]} : vector<288x128xbf16> to vector<32x128xbf16>
    %c2_48 = arith.constant 2 : index
    %c0_49 = arith.constant 0 : index
    %c0_50 = arith.constant 0 : index
    %74 = vector.load %arg5[%c2_48, %c0_49, %c0_50] : memref<9x128x128xbf16, #tpu.memory_space<vmem>>, vector<1x128x128xbf16>
    %75 = vector.shape_cast %74 : vector<1x128x128xbf16> to vector<128x128xbf16>
    %cst_51 = arith.constant dense<0.000000e+00> : vector<32x128xf32>
    %76 = tpu.matmul %73, %75, %cst_51 {dimension_numbers = #tpu.dot_dimension_numbers<[1], [0], [0], [1], [0, 0, 1, 1], [], []>} : vector<32x128xbf16>, vector<128x128xbf16>, vector<32x128xf32> -> vector<32x128xf32>
    %77 = arith.addf %72, %76 : vector<32x128xf32>
    %78 = vector.extract_strided_slice %61 {offsets = [96, 0], sizes = [32, 128], strides = [1, 1]} : vector<288x128xbf16> to vector<32x128xbf16>
    %c3_52 = arith.constant 3 : index
    %c0_53 = arith.constant 0 : index
    %c0_54 = arith.constant 0 : index
    %79 = vector.load %arg5[%c3_52, %c0_53, %c0_54] : memref<9x128x128xbf16, #tpu.memory_space<vmem>>, vector<1x128x128xbf16>
    %80 = vector.shape_cast %79 : vector<1x128x128xbf16> to vector<128x128xbf16>
    %cst_55 = arith.constant dense<0.000000e+00> : vector<32x128xf32>
    %81 = tpu.matmul %78, %80, %cst_55 {dimension_numbers = #tpu.dot_dimension_numbers<[1], [0], [0], [1], [0, 0, 1, 1], [], []>} : vector<32x128xbf16>, vector<128x128xbf16>, vector<32x128xf32> -> vector<32x128xf32>
    %82 = arith.addf %77, %81 : vector<32x128xf32>
    %83 = vector.extract_strided_slice %61 {offsets = [128, 0], sizes = [32, 128], strides = [1, 1]} : vector<288x128xbf16> to vector<32x128xbf16>
    %c4_56 = arith.constant 4 : index
    %c0_57 = arith.constant 0 : index
    %c0_58 = arith.constant 0 : index
    %84 = vector.load %arg5[%c4_56, %c0_57, %c0_58] : memref<9x128x128xbf16, #tpu.memory_space<vmem>>, vector<1x128x128xbf16>
    %85 = vector.shape_cast %84 : vector<1x128x128xbf16> to vector<128x128xbf16>
    %cst_59 = arith.constant dense<0.000000e+00> : vector<32x128xf32>
    %86 = tpu.matmul %83, %85, %cst_59 {dimension_numbers = #tpu.dot_dimension_numbers<[1], [0], [0], [1], [0, 0, 1, 1], [], []>} : vector<32x128xbf16>, vector<128x128xbf16>, vector<32x128xf32> -> vector<32x128xf32>
    %87 = arith.addf %82, %86 : vector<32x128xf32>
    %88 = vector.extract_strided_slice %61 {offsets = [160, 0], sizes = [32, 128], strides = [1, 1]} : vector<288x128xbf16> to vector<32x128xbf16>
    %c5_60 = arith.constant 5 : index
    %c0_61 = arith.constant 0 : index
    %c0_62 = arith.constant 0 : index
    %89 = vector.load %arg5[%c5_60, %c0_61, %c0_62] : memref<9x128x128xbf16, #tpu.memory_space<vmem>>, vector<1x128x128xbf16>
    %90 = vector.shape_cast %89 : vector<1x128x128xbf16> to vector<128x128xbf16>
    %cst_63 = arith.constant dense<0.000000e+00> : vector<32x128xf32>
    %91 = tpu.matmul %88, %90, %cst_63 {dimension_numbers = #tpu.dot_dimension_numbers<[1], [0], [0], [1], [0, 0, 1, 1], [], []>} : vector<32x128xbf16>, vector<128x128xbf16>, vector<32x128xf32> -> vector<32x128xf32>
    %92 = arith.addf %87, %91 : vector<32x128xf32>
    %93 = vector.extract_strided_slice %61 {offsets = [192, 0], sizes = [32, 128], strides = [1, 1]} : vector<288x128xbf16> to vector<32x128xbf16>
    %c6_64 = arith.constant 6 : index
    %c0_65 = arith.constant 0 : index
    %c0_66 = arith.constant 0 : index
    %94 = vector.load %arg5[%c6_64, %c0_65, %c0_66] : memref<9x128x128xbf16, #tpu.memory_space<vmem>>, vector<1x128x128xbf16>
    %95 = vector.shape_cast %94 : vector<1x128x128xbf16> to vector<128x128xbf16>
    %cst_67 = arith.constant dense<0.000000e+00> : vector<32x128xf32>
    %96 = tpu.matmul %93, %95, %cst_67 {dimension_numbers = #tpu.dot_dimension_numbers<[1], [0], [0], [1], [0, 0, 1, 1], [], []>} : vector<32x128xbf16>, vector<128x128xbf16>, vector<32x128xf32> -> vector<32x128xf32>
    %97 = arith.addf %92, %96 : vector<32x128xf32>
    %98 = vector.extract_strided_slice %61 {offsets = [224, 0], sizes = [32, 128], strides = [1, 1]} : vector<288x128xbf16> to vector<32x128xbf16>
    %c7_68 = arith.constant 7 : index
    %c0_69 = arith.constant 0 : index
    %c0_70 = arith.constant 0 : index
    %99 = vector.load %arg5[%c7_68, %c0_69, %c0_70] : memref<9x128x128xbf16, #tpu.memory_space<vmem>>, vector<1x128x128xbf16>
    %100 = vector.shape_cast %99 : vector<1x128x128xbf16> to vector<128x128xbf16>
    %cst_71 = arith.constant dense<0.000000e+00> : vector<32x128xf32>
    %101 = tpu.matmul %98, %100, %cst_71 {dimension_numbers = #tpu.dot_dimension_numbers<[1], [0], [0], [1], [0, 0, 1, 1], [], []>} : vector<32x128xbf16>, vector<128x128xbf16>, vector<32x128xf32> -> vector<32x128xf32>
    %102 = arith.addf %97, %101 : vector<32x128xf32>
    %103 = vector.extract_strided_slice %61 {offsets = [256, 0], sizes = [32, 128], strides = [1, 1]} : vector<288x128xbf16> to vector<32x128xbf16>
    %c8_72 = arith.constant 8 : index
    %c0_73 = arith.constant 0 : index
    %c0_74 = arith.constant 0 : index
    %104 = vector.load %arg5[%c8_72, %c0_73, %c0_74] : memref<9x128x128xbf16, #tpu.memory_space<vmem>>, vector<1x128x128xbf16>
    %105 = vector.shape_cast %104 : vector<1x128x128xbf16> to vector<128x128xbf16>
    %cst_75 = arith.constant dense<0.000000e+00> : vector<32x128xf32>
    %106 = tpu.matmul %103, %105, %cst_75 {dimension_numbers = #tpu.dot_dimension_numbers<[1], [0], [0], [1], [0, 0, 1, 1], [], []>} : vector<32x128xbf16>, vector<128x128xbf16>, vector<32x128xf32> -> vector<32x128xf32>
    %107 = arith.addf %102, %106 : vector<32x128xf32>
    %c0_76 = arith.constant 0 : index
    %c0_77 = arith.constant 0 : index
    %108 = vector.load %arg6[%c0_76, %c0_77] : memref<1x128xf32, #tpu.memory_space<vmem>>, vector<1x128xf32>
    %109 = vector.broadcast %108 : vector<1x128xf32> to vector<32x128xf32>
    %110 = arith.addf %107, %109 : vector<32x128xf32>
    %cst_78 = arith.constant 0.000000e+00 : f32
    %111 = vector.broadcast %cst_78 : f32 to vector<32x128xf32>
    %112 = arith.cmpf oge, %110, %111 : vector<32x128xf32>
    %cst_79 = arith.constant 0.00999999977 : f32
    %113 = vector.broadcast %cst_79 : f32 to vector<32x128xf32>
    %114 = arith.mulf %113, %110 : vector<32x128xf32>
    %115 = arith.select %112, %110, %114 : vector<32x128xi1>, vector<32x128xf32>
    %116 = arith.truncf %115 : vector<32x128xf32> to vector<32x128xbf16>
    %c0_80 = arith.constant 0 : index
    %c0_81 = arith.constant 0 : index
    %117 = vector.load %arg7[%c0_80, %c0_81] : memref<72x32xbf16, #tpu.memory_space<vmem>>, vector<72x32xbf16>
    %cst_82 = arith.constant dense<0.000000e+00> : vector<72x128xf32>
    %118 = tpu.matmul %117, %116, %cst_82 {dimension_numbers = #tpu.dot_dimension_numbers<[1], [0], [0], [1], [0, 0, 1, 1], [], []>} : vector<72x32xbf16>, vector<32x128xbf16>, vector<72x128xf32> -> vector<72x128xf32>
    %119 = arith.truncf %118 : vector<72x128xf32> to vector<72x128xbf16>
    %cst_83 = arith.constant 0.000000e+00 : f32
    %120 = vector.broadcast %cst_83 : f32 to vector<8x128xf32>
    %121 = vector.extract_strided_slice %119 {offsets = [0, 0], sizes = [8, 128], strides = [1, 1]} : vector<72x128xbf16> to vector<8x128xbf16>
    %c0_84 = arith.constant 0 : index
    %c0_85 = arith.constant 0 : index
    %c0_86 = arith.constant 0 : index
    %122 = vector.load %arg8[%c0_84, %c0_85, %c0_86] : memref<9x128x128xbf16, #tpu.memory_space<vmem>>, vector<1x128x128xbf16>
    %123 = vector.shape_cast %122 : vector<1x128x128xbf16> to vector<128x128xbf16>
    %cst_87 = arith.constant dense<0.000000e+00> : vector<8x128xf32>
    %124 = tpu.matmul %121, %123, %cst_87 {dimension_numbers = #tpu.dot_dimension_numbers<[1], [0], [0], [1], [0, 0, 1, 1], [], []>} : vector<8x128xbf16>, vector<128x128xbf16>, vector<8x128xf32> -> vector<8x128xf32>
    %125 = arith.addf %120, %124 : vector<8x128xf32>
    %126 = vector.extract_strided_slice %119 {offsets = [8, 0], sizes = [8, 128], strides = [1, 1]} : vector<72x128xbf16> to vector<8x128xbf16>
    %c1_88 = arith.constant 1 : index
    %c0_89 = arith.constant 0 : index
    %c0_90 = arith.constant 0 : index
    %127 = vector.load %arg8[%c1_88, %c0_89, %c0_90] : memref<9x128x128xbf16, #tpu.memory_space<vmem>>, vector<1x128x128xbf16>
    %128 = vector.shape_cast %127 : vector<1x128x128xbf16> to vector<128x128xbf16>
    %cst_91 = arith.constant dense<0.000000e+00> : vector<8x128xf32>
    %129 = tpu.matmul %126, %128, %cst_91 {dimension_numbers = #tpu.dot_dimension_numbers<[1], [0], [0], [1], [0, 0, 1, 1], [], []>} : vector<8x128xbf16>, vector<128x128xbf16>, vector<8x128xf32> -> vector<8x128xf32>
    %130 = arith.addf %125, %129 : vector<8x128xf32>
    %131 = vector.extract_strided_slice %119 {offsets = [16, 0], sizes = [8, 128], strides = [1, 1]} : vector<72x128xbf16> to vector<8x128xbf16>
    %c2_92 = arith.constant 2 : index
    %c0_93 = arith.constant 0 : index
    %c0_94 = arith.constant 0 : index
    %132 = vector.load %arg8[%c2_92, %c0_93, %c0_94] : memref<9x128x128xbf16, #tpu.memory_space<vmem>>, vector<1x128x128xbf16>
    %133 = vector.shape_cast %132 : vector<1x128x128xbf16> to vector<128x128xbf16>
    %cst_95 = arith.constant dense<0.000000e+00> : vector<8x128xf32>
    %134 = tpu.matmul %131, %133, %cst_95 {dimension_numbers = #tpu.dot_dimension_numbers<[1], [0], [0], [1], [0, 0, 1, 1], [], []>} : vector<8x128xbf16>, vector<128x128xbf16>, vector<8x128xf32> -> vector<8x128xf32>
    %135 = arith.addf %130, %134 : vector<8x128xf32>
    %136 = vector.extract_strided_slice %119 {offsets = [24, 0], sizes = [8, 128], strides = [1, 1]} : vector<72x128xbf16> to vector<8x128xbf16>
    %c3_96 = arith.constant 3 : index
    %c0_97 = arith.constant 0 : index
    %c0_98 = arith.constant 0 : index
    %137 = vector.load %arg8[%c3_96, %c0_97, %c0_98] : memref<9x128x128xbf16, #tpu.memory_space<vmem>>, vector<1x128x128xbf16>
    %138 = vector.shape_cast %137 : vector<1x128x128xbf16> to vector<128x128xbf16>
    %cst_99 = arith.constant dense<0.000000e+00> : vector<8x128xf32>
    %139 = tpu.matmul %136, %138, %cst_99 {dimension_numbers = #tpu.dot_dimension_numbers<[1], [0], [0], [1], [0, 0, 1, 1], [], []>} : vector<8x128xbf16>, vector<128x128xbf16>, vector<8x128xf32> -> vector<8x128xf32>
    %140 = arith.addf %135, %139 : vector<8x128xf32>
    %141 = vector.extract_strided_slice %119 {offsets = [32, 0], sizes = [8, 128], strides = [1, 1]} : vector<72x128xbf16> to vector<8x128xbf16>
    %c4_100 = arith.constant 4 : index
    %c0_101 = arith.constant 0 : index
    %c0_102 = arith.constant 0 : index
    %142 = vector.load %arg8[%c4_100, %c0_101, %c0_102] : memref<9x128x128xbf16, #tpu.memory_space<vmem>>, vector<1x128x128xbf16>
    %143 = vector.shape_cast %142 : vector<1x128x128xbf16> to vector<128x128xbf16>
    %cst_103 = arith.constant dense<0.000000e+00> : vector<8x128xf32>
    %144 = tpu.matmul %141, %143, %cst_103 {dimension_numbers = #tpu.dot_dimension_numbers<[1], [0], [0], [1], [0, 0, 1, 1], [], []>} : vector<8x128xbf16>, vector<128x128xbf16>, vector<8x128xf32> -> vector<8x128xf32>
    %145 = arith.addf %140, %144 : vector<8x128xf32>
    %146 = vector.extract_strided_slice %119 {offsets = [40, 0], sizes = [8, 128], strides = [1, 1]} : vector<72x128xbf16> to vector<8x128xbf16>
    %c5_104 = arith.constant 5 : index
    %c0_105 = arith.constant 0 : index
    %c0_106 = arith.constant 0 : index
    %147 = vector.load %arg8[%c5_104, %c0_105, %c0_106] : memref<9x128x128xbf16, #tpu.memory_space<vmem>>, vector<1x128x128xbf16>
    %148 = vector.shape_cast %147 : vector<1x128x128xbf16> to vector<128x128xbf16>
    %cst_107 = arith.constant dense<0.000000e+00> : vector<8x128xf32>
    %149 = tpu.matmul %146, %148, %cst_107 {dimension_numbers = #tpu.dot_dimension_numbers<[1], [0], [0], [1], [0, 0, 1, 1], [], []>} : vector<8x128xbf16>, vector<128x128xbf16>, vector<8x128xf32> -> vector<8x128xf32>
    %150 = arith.addf %145, %149 : vector<8x128xf32>
    %151 = vector.extract_strided_slice %119 {offsets = [48, 0], sizes = [8, 128], strides = [1, 1]} : vector<72x128xbf16> to vector<8x128xbf16>
    %c6_108 = arith.constant 6 : index
    %c0_109 = arith.constant 0 : index
    %c0_110 = arith.constant 0 : index
    %152 = vector.load %arg8[%c6_108, %c0_109, %c0_110] : memref<9x128x128xbf16, #tpu.memory_space<vmem>>, vector<1x128x128xbf16>
    %153 = vector.shape_cast %152 : vector<1x128x128xbf16> to vector<128x128xbf16>
    %cst_111 = arith.constant dense<0.000000e+00> : vector<8x128xf32>
    %154 = tpu.matmul %151, %153, %cst_111 {dimension_numbers = #tpu.dot_dimension_numbers<[1], [0], [0], [1], [0, 0, 1, 1], [], []>} : vector<8x128xbf16>, vector<128x128xbf16>, vector<8x128xf32> -> vector<8x128xf32>
    %155 = arith.addf %150, %154 : vector<8x128xf32>
    %156 = vector.extract_strided_slice %119 {offsets = [56, 0], sizes = [8, 128], strides = [1, 1]} : vector<72x128xbf16> to vector<8x128xbf16>
    %c7_112 = arith.constant 7 : index
    %c0_113 = arith.constant 0 : index
    %c0_114 = arith.constant 0 : index
    %157 = vector.load %arg8[%c7_112, %c0_113, %c0_114] : memref<9x128x128xbf16, #tpu.memory_space<vmem>>, vector<1x128x128xbf16>
    %158 = vector.shape_cast %157 : vector<1x128x128xbf16> to vector<128x128xbf16>
    %cst_115 = arith.constant dense<0.000000e+00> : vector<8x128xf32>
    %159 = tpu.matmul %156, %158, %cst_115 {dimension_numbers = #tpu.dot_dimension_numbers<[1], [0], [0], [1], [0, 0, 1, 1], [], []>} : vector<8x128xbf16>, vector<128x128xbf16>, vector<8x128xf32> -> vector<8x128xf32>
    %160 = arith.addf %155, %159 : vector<8x128xf32>
    %161 = vector.extract_strided_slice %119 {offsets = [64, 0], sizes = [8, 128], strides = [1, 1]} : vector<72x128xbf16> to vector<8x128xbf16>
    %c8_116 = arith.constant 8 : index
    %c0_117 = arith.constant 0 : index
    %c0_118 = arith.constant 0 : index
    %162 = vector.load %arg8[%c8_116, %c0_117, %c0_118] : memref<9x128x128xbf16, #tpu.memory_space<vmem>>, vector<1x128x128xbf16>
    %163 = vector.shape_cast %162 : vector<1x128x128xbf16> to vector<128x128xbf16>
    %cst_119 = arith.constant dense<0.000000e+00> : vector<8x128xf32>
    %164 = tpu.matmul %161, %163, %cst_119 {dimension_numbers = #tpu.dot_dimension_numbers<[1], [0], [0], [1], [0, 0, 1, 1], [], []>} : vector<8x128xbf16>, vector<128x128xbf16>, vector<8x128xf32> -> vector<8x128xf32>
    %165 = arith.addf %160, %164 : vector<8x128xf32>
    %c0_120 = arith.constant 0 : index
    %c0_121 = arith.constant 0 : index
    %166 = vector.load %arg9[%c0_120, %c0_121] : memref<1x128xf32, #tpu.memory_space<vmem>>, vector<1x128xf32>
    %167 = vector.broadcast %166 : vector<1x128xf32> to vector<8x128xf32>
    %168 = arith.addf %165, %167 : vector<8x128xf32>
    %c0_122 = arith.constant 0 : index
    %c0_123 = arith.constant 0 : index
    %169 = vector.load %arg10[%c0_122, %c0_123] : memref<8x128xf32, #tpu.memory_space<vmem>>, vector<8x128xf32>
    tpu.vector_store %arg10[%c0_122, %c0_123], %168 {strides = array<i32>} : memref<8x128xf32, #tpu.memory_space<vmem>>, vector<8x128xf32>,
    return
  }
}

</mosaic_0001>

<bundles_post_ra>
// kernel: encoder_forward.1
= control target key start
LH: loop header
LB: loop body
LE: loop exit
PB: predicated region body
PF: predicated region fallthrough
CT: control target
= control target key end

     0   :  { %v10657_v0 = vmov 0   ;;  %s12874_s0 = inlined_call_operand.vmem [shape: bf16[512,128], index: 0, kind: input, shape index: {}]   ;;  %s12875_s1 = inlined_call_operand.vmem [shape: bf16[1152,512], index: 1, kind: input, shape index: {}]   ;;  %s12876_s2 = inlined_call_operand.vmem [shape: bf16[9,128,128], index: 2, kind: input, shape index: {}]   ;;  %s12877_s4 = inlined_call_operand.vmem [shape: bf16[288,128], index: 4, kind: input, shape index: {}]   ;;  %s12878_s5 = inlined_call_operand.vmem [shape: bf16[9,128,128], index: 5, kind: input, shape index: {}]   ;;  %s12879_s3 = inlined_call_operand.vmem [shape: f32[1,128], index: 3, kind: input, shape index: {}]   ;;  %s12880_s7 = inlined_call_operand.vmem [shape: bf16[72,32], index: 7, kind: input, shape index: {}]   ;;  %s12881_s8 = inlined_call_operand.vmem [shape: bf16[9,128,128], index: 8, kind: input, shape index: {}]   ;;  %s12882_s6 = inlined_call_operand.vmem [shape: f32[1,128], index: 6, kind: input, shape index: {}]   ;;  %s12883_s9 = inlined_call_operand.vmem [shape: f32[1,128], index: 9, kind: input, shape index: {}]   ;;  %s12884_s10 = inlined_call_operand.vmem [shape: f32[8,128], index: 10, kind: output, shape index: {}]  }
   0x1   :  { %2020 = vmatprep.subr.bf16.mxu0 %v10657_v0  ;;  %v9954_v1 = vld [vmem:[%s12874_s0] sm:$0xff]   ;;  %9499 = vmatprep.subr.bf16.mxu1 %v10657_v0  ;;  %v9955_v2 = vld [vmem:[%s12874_s0 + $0x8] sm:$0xff]   ;;  %v9956_v3 = vld [vmem:[%s12874_s0 + $0x10] sm:$0xff]  }
   0x2   :  { %2021 = vmatpush1.bf16.msra.mxu0 %v9954_v1  ;;  %9515 = vmatpush1.bf16.msra.mxu1 %v9954_v1  ;;  %v9957_v4 = vld [vmem:[%s12874_s0 + $0x18] sm:$0xff]   ;;  %v9958_v5 = vld [vmem:[%s12874_s0 + $0x20] sm:$0xff]   ;;  %v9959_v7 = vld [vmem:[%s12874_s0 + $0x28] sm:$0xff]  }
   0x3   :  { %2022 = vmatprep.subr.bf16.mxu0 %v10657_v0  ;;  %9500 = vmatprep.subr.bf16.mxu1 %v10657_v0  ;;  %v9972_v6 = vld [vmem:[%s12875_s1 + $0x4] ss:$16 sps:$4 sm:$0xff]   ;;  %v9961_v9 = vld [vmem:[%s12874_s0 + $0x38] sm:$0xff]   ;;  %v9963_v11 = vld [vmem:[%s12874_s0 + $0x48] sm:$0xff]  }
   0x4   :  { %2052 = vmatprep.mubr.bf16.mxu0 %v9972_v6  ;;  %v9960_v8 = vld [vmem:[%s12874_s0 + $0x30] sm:$0xff]   ;;  %v9962_v10 = vld [vmem:[%s12874_s0 + $0x40] sm:$0xff]   ;;  %v9965_v13 = vld [vmem:[%s12874_s0 + $0x58] sm:$0xff]  }
   0x5   :  { %v9964_v12 = vld [vmem:[%s12874_s0 + $0x50] sm:$0xff]   ;;  %v9966_v14 = vld [vmem:[%s12874_s0 + $0x60] sm:$0xff]   ;;  %v9967_v15 = vld [vmem:[%s12874_s0 + $0x68] sm:$0xff]  }
   0x6   :  { %2023 = vmatpush1.bf16.msra.mxu0 %v9955_v2  ;;  %9516 = vmatpush1.bf16.msra.mxu1 %v9955_v2  ;;  %v9968_v16 = vld [vmem:[%s12874_s0 + $0x70] sm:$0xff]   ;;  %v9969_v17 = vld [vmem:[%s12874_s0 + $0x78] sm:$0xff]   ;;  %v9973_v19 = vld [vmem:[%s12874_s0 + $0x80] sm:$0xff]  }
   0x7   :  { %2024 = vmatprep.subr.bf16.mxu0 %v10657_v0  ;;  %9501 = vmatprep.subr.bf16.mxu1 %v10657_v0  ;;  %v9970_v18 = vld [vmem:[%s12875_s1] ss:$16 sps:$4 sm:$0xff]   ;;  %v9974_v20 = vld [vmem:[%s12875_s1 + $0x24] ss:$16 sps:$4 sm:$0xff]   ;;  %v9983_v21 = vld [vmem:[%s12874_s0 + $0x88] sm:$0xff]  }
   0x8   :  { %v9976_v22 = vld [vmem:[%s12875_s1 + $0x20] ss:$16 sps:$4 sm:$0xff]   ;;  %v9977_v23 = vld [vmem:[%s12875_s1 + $0x44] ss:$16 sps:$4 sm:$0xff]   ;;  %v10009_v25 = vld [vmem:[%s12874_s0 + $0x98] sm:$0xff]  }
   0x9   :  { %v9996_v24 = vld [vmem:[%s12874_s0 + $0x90] sm:$0xff]   ;;  %v10019_v28 = vld [vmem:[%s12874_s0 + $0xa0] sm:$0xff]   ;;  %v10032_v29 = vld [vmem:[%s12874_s0 + $0xa8] sm:$0xff]  }
   0xa   :  { %2025 = vmatpush1.bf16.msra.mxu0 %v9956_v3  ;;  %9517 = vmatpush1.bf16.msra.mxu1 %v9956_v3  ;;  %v9979_v26 = vld [vmem:[%s12875_s1 + $0x40] ss:$16 sps:$4 sm:$0xff]   ;;  %v9980_v27 = vld [vmem:[%s12875_s1 + $0x64] ss:$16 sps:$4 sm:$0xff]   ;;  %v10055_v45 = vld [vmem:[%s12874_s0 + $0xb8] sm:$0xff]  }
   0xb   :  { %2026 = vmatprep.subr.bf16.mxu0 %v10657_v0  ;;  %9502 = vmatprep.subr.bf16.mxu1 %v10657_v0  ;;  %v9982_v30 = vld [vmem:[%s12875_s1 + $0x60] ss:$16 sps:$4 sm:$0xff]   ;;  %v9984_v31 = vld [vmem:[%s12875_s1 + $0x84] ss:$16 sps:$4 sm:$0xff]   ;;  %v10078_v61 = vld [vmem:[%s12874_s0 + $0xc8] sm:$0xff]  }
   0xc   :  { %v9986_v32 = vld [vmem:[%s12875_s1 + $0x80] ss:$16 sps:$4 sm:$0xff]   ;;  %v9987_v33 = vld [vmem:[%s12875_s1 + $0xa4] ss:$16 sps:$4 sm:$0xff]  }
   0xd   :  { %v9989_v34 = vld [vmem:[%s12875_s1 + $0xa0] ss:$16 sps:$4 sm:$0xff]   ;;  %v9990_v35 = vld [vmem:[%s12875_s1 + $0xc4] ss:$16 sps:$4 sm:$0xff]  }
   0xe   :  { %2027 = vmatpush1.bf16.msra.mxu0 %v9957_v4  ;;  %9518 = vmatpush1.bf16.msra.mxu1 %v9957_v4  ;;  %v10044_v36 = vld [vmem:[%s12874_s0 + $0xb0] sm:$0xff]   ;;  %v10068_v54 = vld [vmem:[%s12874_s0 + $0xc0] sm:$0xff]  }
   0xf   :  { %2028 = vmatprep.subr.bf16.mxu0 %v10657_v0  ;;  %9503 = vmatprep.subr.bf16.mxu1 %v10657_v0  ;;  %v9992_v37 = vld [vmem:[%s12875_s1 + $0xc0] ss:$16 sps:$4 sm:$0xff]   ;;  %v9993_v38 = vld [vmem:[%s12875_s1 + $0xe4] ss:$16 sps:$4 sm:$0xff]  }
  0x10   :  { %v9995_v39 = vld [vmem:[%s12875_s1 + $0xe0] ss:$16 sps:$4 sm:$0xff]   ;;  %v9997_v40 = vld [vmem:[%s12875_s1 + $0x104] ss:$16 sps:$4 sm:$0xff]  }
  0x11   :  { %v9999_v41 = vld [vmem:[%s12875_s1 + $0x100] ss:$16 sps:$4 sm:$0xff]   ;;  %v10000_v42 = vld [vmem:[%s12875_s1 + $0x124] ss:$16 sps:$4 sm:$0xff]  }
  0x12   :  { %2029 = vmatpush1.bf16.msra.mxu0 %v9958_v5  ;;  %9519 = vmatpush1.bf16.msra.mxu1 %v9958_v5  ;;  %v10002_v43 = vld [vmem:[%s12875_s1 + $0x120] ss:$16 sps:$4 sm:$0xff]   ;;  %v10003_v44 = vld [vmem:[%s12875_s1 + $0x144] ss:$16 sps:$4 sm:$0xff]  }
  0x13   :  { %2030 = vmatprep.subr.bf16.mxu0 %v10657_v0  ;;  %9504 = vmatprep.subr.bf16.mxu1 %v10657_v0  ;;  %v10005_v46 = vld [vmem:[%s12875_s1 + $0x140] ss:$16 sps:$4 sm:$0xff]   ;;  %v10006_v47 = vld [vmem:[%s12875_s1 + $0x164] ss:$16 sps:$4 sm:$0xff]  }
  0x14   :  { %v10008_v48 = vld [vmem:[%s12875_s1 + $0x160] ss:$16 sps:$4 sm:$0xff]   ;;  %v10010_v49 = vld [vmem:[%s12875_s1 + $0x184] ss:$16 sps:$4 sm:$0xff]  }
  0x15   :  { %v10012_v50 = vld [vmem:[%s12875_s1 + $0x180] ss:$16 sps:$4 sm:$0xff]   ;;  %v10013_v51 = vld [vmem:[%s12875_s1 + $0x1a4] ss:$16 sps:$4 sm:$0xff]  }
  0x16   :  { %2031 = vmatpush1.bf16.msra.mxu0 %v9959_v7  ;;  %9520 = vmatpush1.bf16.msra.mxu1 %v9959_v7  ;;  %v10015_v52 = vld [vmem:[%s12875_s1 + $0x1a0] ss:$16 sps:$4 sm:$0xff]   ;;  %v10016_v53 = vld [vmem:[%s12875_s1 + $0x1c4] ss:$16 sps:$4 sm:$0xff]  }
  0x17   :  { %2032 = vmatprep.subr.bf16.mxu0 %v10657_v0  ;;  %9505 = vmatprep.subr.bf16.mxu1 %v10657_v0  ;;  %v10018_v55 = vld [vmem:[%s12875_s1 + $0x1c0] ss:$16 sps:$4 sm:$0xff]   ;;  %v10020_v56 = vld [vmem:[%s12875_s1 + $0x1e4] ss:$16 sps:$4 sm:$0xff]  }
  0x18   :  { %v10022_v57 = vld [vmem:[%s12875_s1 + $0x1e0] ss:$16 sps:$4 sm:$0xff]   ;;  %v10023_v58 = vld [vmem:[%s12875_s1 + $0x204] ss:$16 sps:$4 sm:$0xff]  }
  0x19   :  { %v10025_v59 = vld [vmem:[%s12875_s1 + $0x200] ss:$16 sps:$4 sm:$0xff]   ;;  %v10026_v60 = vld [vmem:[%s12875_s1 + $0x224] ss:$16 sps:$4 sm:$0xff]  }
  0x1a   :  { %2033 = vmatpush1.bf16.msra.mxu0 %v9960_v8  ;;  %9521 = vmatpush1.bf16.msra.mxu1 %v9960_v8  ;;  %v10028_v62 = vld [vmem:[%s12875_s1 + $0x220] ss:$16 sps:$4 sm:$0xff]   ;;  %v10029_v63 = vld [vmem:[%s12875_s1 + $0x244] ss:$16 sps:$4 sm:$0xff]  }
  0x1b   :  { %2034 = vmatprep.subr.bf16.mxu0 %v10657_v0  ;;  %9506 = vmatprep.subr.bf16.mxu1 %v10657_v0  ;;  %v10031_v1 = vld [vmem:[%s12875_s1 + $0x240] ss:$16 sps:$4 sm:$0xff]   ;;  %v10033_v2 = vld [vmem:[%s12875_s1 + $0x264] ss:$16 sps:$4 sm:$0xff]  }
  0x1c   :  { %v10035_v3 = vld [vmem:[%s12875_s1 + $0x260] ss:$16 sps:$4 sm:$0xff]   ;;  %v10036_v4 = vld [vmem:[%s12875_s1 + $0x284] ss:$16 sps:$4 sm:$0xff]  }
  0x1d   :  { %v10038_v5 = vld [vmem:[%s12875_s1 + $0x280] ss:$16 sps:$4 sm:$0xff]   ;;  %v10039_v6 = vld [vmem:[%s12875_s1 + $0x2a4] ss:$16 sps:$4 sm:$0xff]  }
  0x1e   :  { %2035 = vmatpush1.bf16.msra.mxu0 %v9961_v9  ;;  %9522 = vmatpush1.bf16.msra.mxu1 %v9961_v9  ;;  %v10091_v7 = vld [vmem:[%s12874_s0 + $0xd0] sm:$0xff]  }
  0x1f   :  { %2036 = vmatprep.subr.bf16.mxu0 %v10657_v0  ;;  %9507 = vmatprep.subr.bf16.mxu1 %v10657_v0  ;;  %v10041_v8 = vld [vmem:[%s12875_s1 + $0x2a0] ss:$16 sps:$4 sm:$0xff]   ;;  %v10042_v9 = vld [vmem:[%s12875_s1 + $0x2c4] ss:$16 sps:$4 sm:$0xff]  }
  0x22   :  { %2037 = vmatpush1.bf16.msra.mxu0 %v9962_v10  ;;  %9523 = vmatpush1.bf16.msra.mxu1 %v9962_v10  ;;  %v10045_v10 = vld [vmem:[%s12875_s1 + $0x2c0] ss:$16 sps:$4 sm:$0xff]  }
  0x23   :  { %2038 = vmatprep.subr.bf16.mxu0 %v10657_v0  ;;  %9508 = vmatprep.subr.bf16.mxu1 %v10657_v0 }
  0x26   :  { %2039 = vmatpush1.bf16.msra.mxu0 %v9963_v11  ;;  %9524 = vmatpush1.bf16.msra.mxu1 %v9963_v11  ;;  %v10046_v11 = vld [vmem:[%s12875_s1 + $0x2e4] ss:$16 sps:$4 sm:$0xff]  }
  0x27   :  { %2040 = vmatprep.subr.bf16.mxu0 %v10657_v0  ;;  %9509 = vmatprep.subr.bf16.mxu1 %v10657_v0 }
  0x2a   :  { %2041 = vmatpush1.bf16.msra.mxu0 %v9964_v12  ;;  %9525 = vmatpush1.bf16.msra.mxu1 %v9964_v12  ;;  %v10048_v12 = vld [vmem:[%s12875_s1 + $0x2e0] ss:$16 sps:$4 sm:$0xff]  }
  0x2b   :  { %2042 = vmatprep.subr.bf16.mxu0 %v10657_v0  ;;  %9510 = vmatprep.subr.bf16.mxu1 %v10657_v0 }
  0x2e   :  { %2043 = vmatpush1.bf16.msra.mxu0 %v9965_v13  ;;  %9526 = vmatpush1.bf16.msra.mxu1 %v9965_v13  ;;  %v10049_v13 = vld [vmem:[%s12875_s1 + $0x304] ss:$16 sps:$4 sm:$0xff]  }
  0x2f   :  { %2044 = vmatprep.subr.bf16.mxu0 %v10657_v0  ;;  %9511 = vmatprep.subr.bf16.mxu1 %v10657_v0 }
  0x32   :  { %2045 = vmatpush1.bf16.msra.mxu0 %v9966_v14  ;;  %9527 = vmatpush1.bf16.msra.mxu1 %v9966_v14  ;;  %v10051_v14 = vld [vmem:[%s12875_s1 + $0x300] ss:$16 sps:$4 sm:$0xff]  }
  0x33   :  { %2046 = vmatprep.subr.bf16.mxu0 %v10657_v0  ;;  %9512 = vmatprep.subr.bf16.mxu1 %v10657_v0 }
  0x36   :  { %2047 = vmatpush1.bf16.msra.mxu0 %v9967_v15  ;;  %9528 = vmatpush1.bf16.msra.mxu1 %v9967_v15  ;;  %v10052_v15 = vld [vmem:[%s12875_s1 + $0x324] ss:$16 sps:$4 sm:$0xff]  }
  0x37   :  { %2048 = vmatprep.subr.bf16.mxu0 %v10657_v0  ;;  %9513 = vmatprep.subr.bf16.mxu1 %v10657_v0 }
  0x3a   :  { %2049 = vmatpush1.bf16.msra.mxu0 %v9968_v16  ;;  %9529 = vmatpush1.bf16.msra.mxu1 %v9968_v16  ;;  %v10104_v16 = vld [vmem:[%s12874_s0 + $0xd8] sm:$0xff]  }
  0x3b   :  { %2050 = vmatprep.subr.bf16.mxu0 %v10657_v0  ;;  %9514 = vmatprep.subr.bf16.mxu1 %v10657_v0 }
  0x3e   :  { %2051 = vmatpush1.bf16.msra.mxu0 %v9969_v17  ;;  %9530 = vmatpush1.bf16.msra.mxu1 %v9969_v17  ;;  %v10054_v17 = vld [vmem:[%s12875_s1 + $0x320] ss:$16 sps:$4 sm:$0xff]  }
  0x3f   :  { %2629 = vmatprep.subr.bf16.mxu0 %v10657_v0 }
  0x41   :  { %2053 = vmatmul.mubr.bf16.vlgmr.msra.gmra.mrb[0].mxu0 %v9970_v18  ;;  %v10056_v18 = vld [vmem:[%s12875_s1 + $0x344] ss:$16 sps:$4 sm:$0xff]  }
  0x42   :  { %2630 = vmatpush1.bf16.msra.mxu0 %v9973_v19  ;;  %2060 = vmatprep.mubr.bf16.mxu0 %v9974_v20  ;;  %v10058_v19 = vld [vmem:[%s12875_s1 + $0x340] ss:$16 sps:$4 sm:$0xff]   ;;  %v10059_v20 = vld [vmem:[%s12875_s1 + $0x364] ss:$16 sps:$4 sm:$0xff]  }
  0x43   :  { %2631 = vmatprep.subr.bf16.mxu0 %v10657_v0 }
  0x46   :  { %2632 = vmatpush1.bf16.msra.mxu0 %v9983_v21  ;;  %v10061_v21 = vld [vmem:[%s12875_s1 + $0x360] ss:$16 sps:$4 sm:$0xff]  }
  0x47   :  { %2633 = vmatprep.subr.bf16.mxu0 %v10657_v0 }
  0x49   :  { %2061 = vmatmul.mubr.bf16.gmra.mrb[4].mxu0 %v9976_v22  ;;  %v10062_v22 = vld [vmem:[%s12875_s1 + $0x384] ss:$16 sps:$4 sm:$0xff]  }
  0x4a   :  { %2068 = vmatprep.mubr.bf16.mxu0 %v9977_v23  ;;  %2634 = vmatpush1.bf16.msra.mxu0 %v9996_v24  ;;  %v10114_v23 = vld [vmem:[%s12874_s0 + $0xe0] sm:$0xff]  }
  0x4b   :  { %2635 = vmatprep.subr.bf16.mxu0 %v10657_v0  ;;  %v10064_v24 = vld [vmem:[%s12875_s1 + $0x380] ss:$16 sps:$4 sm:$0xff]  }
  0x4e   :  { %2636 = vmatpush1.bf16.msra.mxu0 %v10009_v25  ;;  %v10065_v25 = vld [vmem:[%s12875_s1 + $0x3a4] ss:$16 sps:$4 sm:$0xff]  }
  0x4f   :  { %2637 = vmatprep.subr.bf16.mxu0 %v10657_v0 }
  0x51   :  { %2069 = vmatmul.mubr.bf16.gmra.mrb[8].mxu0 %v9979_v26  ;;  %v10067_v26 = vld [vmem:[%s12875_s1 + $0x3a0] ss:$16 sps:$4 sm:$0xff]  }
  0x52   :  { %2076 = vmatprep.mubr.bf16.mxu0 %v9980_v27  ;;  %2638 = vmatpush1.bf16.msra.mxu0 %v10019_v28  ;;  %v10069_v27 = vld [vmem:[%s12875_s1 + $0x3c4] ss:$16 sps:$4 sm:$0xff]   ;;  %v10071_v28 = vld [vmem:[%s12875_s1 + $0x3c0] ss:$16 sps:$4 sm:$0xff]  }
  0x53   :  { %2639 = vmatprep.subr.bf16.mxu0 %v10657_v0 }
  0x56   :  { %2640 = vmatpush1.bf16.msra.mxu0 %v10032_v29  ;;  %v10072_v29 = vld [vmem:[%s12875_s1 + $0x3e4] ss:$16 sps:$4 sm:$0xff]  }
  0x57   :  { %2641 = vmatprep.subr.bf16.mxu0 %v10657_v0 }
  0x59   :  { %2077 = vmatmul.mubr.bf16.gmra.mrb[12].mxu0 %v9982_v30  ;;  %v10074_v30 = vld [vmem:[%s12875_s1 + $0x3e0] ss:$16 sps:$4 sm:$0xff]  }
  0x5a   :  { %2084 = vmatprep.mubr.bf16.mxu0 %v9984_v31  ;;  %2642 = vmatpush1.bf16.msra.mxu0 %v10044_v36  ;;  %v10075_v31 = vld [vmem:[%s12875_s1 + $0x404] ss:$16 sps:$4 sm:$0xff]  }
  0x5b   :  { %2643 = vmatprep.subr.bf16.mxu0 %v10657_v0  ;;  %v10082_v36 = vld [vmem:[%s12875_s1 + $0x444] ss:$16 sps:$4 sm:$0xff]  }
  0x5e   :  { %2644 = vmatpush1.bf16.msra.mxu0 %v10055_v45  ;;  %v10097_v45 = vld [vmem:[%s12875_s1 + $0x4c0] ss:$16 sps:$4 sm:$0xff]  }
  0x5f   :  { %2645 = vmatprep.subr.bf16.mxu0 %v10657_v0 }
  0x61   :  { %2085 = vmatmul.mubr.bf16.gmra.mrb[16].mxu0 %v9986_v32  ;;  %v10127_v32 = vld [vmem:[%s12874_s0 + $0xe8] sm:$0xff]  }
  0x62   :  { %2092 = vmatprep.mubr.bf16.mxu0 %v9987_v33  ;;  %2646 = vmatpush1.bf16.msra.mxu0 %v10068_v54  ;;  %v10077_v33 = vld [vmem:[%s12875_s1 + $0x400] ss:$16 sps:$4 sm:$0xff]  }
  0x63   :  { %2647 = vmatprep.subr.bf16.mxu0 %v10657_v0  ;;  %v10110_v54 = vld [vmem:[%s12875_s1 + $0x540] ss:$16 sps:$4 sm:$0xff]  }
  0x66   :  { %2648 = vmatpush1.bf16.msra.mxu0 %v10078_v61  ;;  %v10121_v61 = vld [vmem:[%s12875_s1 + $0x5c4] ss:$16 sps:$4 sm:$0xff]  }
  0x67   :  { %2649 = vmatprep.subr.bf16.mxu0 %v10657_v0 }
  0x69   :  { %2093 = vmatmul.mubr.bf16.gmra.mrb[20].mxu0 %v9989_v34  ;;  %v10079_v34 = vld [vmem:[%s12875_s1 + $0x424] ss:$16 sps:$4 sm:$0xff]  }
  0x6a   :  { %2100 = vmatprep.mubr.bf16.mxu0 %v9990_v35  ;;  %2650 = vmatpush1.bf16.msra.mxu0 %v10091_v7  ;;  %v10081_v35 = vld [vmem:[%s12875_s1 + $0x420] ss:$16 sps:$4 sm:$0xff]  }
  0x6b   :  { %2651 = vmatprep.subr.bf16.mxu0 %v10657_v0  ;;  %v10136_v7 = vld [vmem:[%s12875_s1 + $0x640] ss:$16 sps:$4 sm:$0xff]  }
  0x6e   :  { %2652 = vmatpush1.bf16.msra.mxu0 %v10104_v16  ;;  %v10151_v16 = vld [vmem:[%s12875_s1 + $0x6e4] ss:$16 sps:$4 sm:$0xff]  }
  0x6f   :  { %2653 = vmatprep.subr.bf16.mxu0 %v10657_v0 }
  0x71   :  { %2101 = vmatmul.mubr.bf16.gmra.mrb[24].mxu0 %v9992_v37  ;;  %v10084_v37 = vld [vmem:[%s12875_s1 + $0x440] ss:$16 sps:$4 sm:$0xff]  }
  0x72   :  { %2108 = vmatprep.mubr.bf16.mxu0 %v9993_v38  ;;  %2654 = vmatpush1.bf16.msra.mxu0 %v10114_v23  ;;  %v10085_v38 = vld [vmem:[%s12875_s1 + $0x464] ss:$16 sps:$4 sm:$0xff]   ;;  %v10160_v23 = vld [vmem:[%s12875_s1 + $0x8] ss:$16 sps:$4 sm:$0xff]  }
  0x73   :  { %2655 = vmatprep.subr.bf16.mxu0 %v10657_v0 }
  0x76   :  { %2656 = vmatpush1.bf16.msra.mxu0 %v10127_v32  ;;  %v10175_v32 = vld [vmem:[%s12875_s1 + $0xac] ss:$16 sps:$4 sm:$0xff]  }
  0x77   :  { %2657 = vmatprep.subr.bf16.mxu0 %v10657_v0 }
  0x79   :  { %2109 = vmatmul.mubr.bf16.gmra.mrb[28].mxu0 %v9995_v39  ;;  %v10139_v39 = vld [vmem:[%s12874_s0 + $0xf0] sm:$0xff]  }
  0x7a   :  { %2116 = vmatprep.mubr.bf16.mxu0 %v9997_v40  ;;  %2658 = vmatpush1.bf16.msra.mxu0 %v10139_v39  ;;  %v10087_v40 = vld [vmem:[%s12875_s1 + $0x460] ss:$16 sps:$4 sm:$0xff]   ;;  %v10232_v39 = vld [vmem:[%s12875_s1 + $0x764] ss:$16 sps:$4 sm:$0xff]  }
  0x7b   :  { %2659 = vmatprep.subr.bf16.mxu0 %v10657_v0  ;;  %v10094_v0 = vld [vmem:[%s12875_s1 + $0x4a0] ss:$16 sps:$4 sm:$0xff]  }
  0x81   :  { %2117 = vmatmul.mubr.bf16.gmra.mrb[32].mxu0 %v9999_v41  ;;  %v10088_v41 = vld [vmem:[%s12875_s1 + $0x484] ss:$16 sps:$4 sm:$0xff]  }
  0x82   :  { %2124 = vmatprep.mubr.bf16.mxu0 %v10000_v42  ;;  %v10090_v42 = vld [vmem:[%s12875_s1 + $0x480] ss:$16 sps:$4 sm:$0xff]  }
  0x89   :  { %2125 = vmatmul.mubr.bf16.gmra.mrb[36].mxu0 %v10002_v43  ;;  %v10092_v43 = vld [vmem:[%s12875_s1 + $0x4a4] ss:$16 sps:$4 sm:$0xff]  }
  0x8a   :  { %2132 = vmatprep.mubr.bf16.mxu0 %v10003_v44  ;;  %v10095_v44 = vld [vmem:[%s12875_s1 + $0x4c4] ss:$16 sps:$4 sm:$0xff]  }
  0x91   :  { %2133 = vmatmul.mubr.bf16.gmra.mrb[40].mxu0 %v10005_v46  ;;  %v10098_v46 = vld [vmem:[%s12875_s1 + $0x4e4] ss:$16 sps:$4 sm:$0xff]  }
  0x92   :  { %2140 = vmatprep.mubr.bf16.mxu0 %v10006_v47  ;;  %v10150_v47 = vld [vmem:[%s12874_s0 + $0xf8] sm:$0xff]  }
  0x93   :  { %2660 = vmatpush1.bf16.msra.mxu0 %v10150_v47  ;;  %v10246_v47 = vld [vmem:[%s12875_s1 + $0x7a0] ss:$16 sps:$4 sm:$0xff]  }
  0x99   :  { %2141 = vmatmul.mubr.bf16.gmra.mrb[44].mxu0 %v10008_v48  ;;  %v10100_v48 = vld [vmem:[%s12875_s1 + $0x4e0] ss:$16 sps:$4 sm:$0xff]  }
  0x9a   :  { %2148 = vmatprep.mubr.bf16.mxu0 %v10010_v49  ;;  %v10101_v49 = vld [vmem:[%s12875_s1 + $0x504] ss:$16 sps:$4 sm:$0xff]  }
  0xa1   :  { %2149 = vmatmul.mubr.bf16.gmra.mrb[48].mxu0 %v10012_v50  ;;  %v10103_v50 = vld [vmem:[%s12875_s1 + $0x500] ss:$16 sps:$4 sm:$0xff]  }
  0xa2   :  { %2156 = vmatprep.mubr.bf16.mxu0 %v10013_v51  ;;  %v10105_v51 = vld [vmem:[%s12875_s1 + $0x524] ss:$16 sps:$4 sm:$0xff]  }
  0xa9   :  { %2157 = vmatmul.mubr.bf16.gmra.mrb[52].mxu0 %v10015_v52  ;;  %v10107_v52 = vld [vmem:[%s12875_s1 + $0x520] ss:$16 sps:$4 sm:$0xff]  }
  0xaa   :  { %2164 = vmatprep.mubr.bf16.mxu0 %v10016_v53  ;;  %v10108_v53 = vld [vmem:[%s12875_s1 + $0x544] ss:$16 sps:$4 sm:$0xff]  }
  0xb1   :  { %2165 = vmatmul.mubr.bf16.gmra.mrb[56].mxu0 %v10018_v55  ;;  %v10111_v55 = vld [vmem:[%s12875_s1 + $0x564] ss:$16 sps:$4 sm:$0xff]  }
  0xb2   :  { %2172 = vmatprep.mubr.bf16.mxu0 %v10020_v56  ;;  %v10113_v56 = vld [vmem:[%s12875_s1 + $0x560] ss:$16 sps:$4 sm:$0xff]  }
  0xb9   :  { %2173 = vmatmul.mubr.bf16.gmra.mrb[60].mxu0 %v10022_v57  ;;  %v10115_v57 = vld [vmem:[%s12875_s1 + $0x584] ss:$16 sps:$4 sm:$0xff]  }
  0xba   :  { %2180 = vmatprep.mubr.bf16.mxu0 %v10023_v58  ;;  %v10117_v58 = vld [vmem:[%s12875_s1 + $0x580] ss:$16 sps:$4 sm:$0xff]  }
  0xc1   :  { %2181 = vmatmul.mubr.bf16.gmra.mrb[64].mxu0 %v10025_v59  ;;  %v10118_v59 = vld [vmem:[%s12875_s1 + $0x5a4] ss:$16 sps:$4 sm:$0xff]  }
  0xc2   :  { %2188 = vmatprep.mubr.bf16.mxu0 %v10026_v60  ;;  %v10120_v60 = vld [vmem:[%s12875_s1 + $0x5a0] ss:$16 sps:$4 sm:$0xff]  }
  0xc9   :  { %2189 = vmatmul.mubr.bf16.gmra.mrb[68].mxu0 %v10028_v62  ;;  %v10123_v62 = vld [vmem:[%s12875_s1 + $0x5c0] ss:$16 sps:$4 sm:$0xff]  }
  0xca   :  { %2196 = vmatprep.mubr.bf16.mxu0 %v10029_v63  ;;  %v10124_v63 = vld [vmem:[%s12875_s1 + $0x5e4] ss:$16 sps:$4 sm:$0xff]  }
  0xd1   :  { %2197 = vmatmul.mubr.bf16.gmra.mrb[72].mxu0 %v10031_v1  ;;  %v10126_v1 = vld [vmem:[%s12875_s1 + $0x5e0] ss:$16 sps:$4 sm:$0xff]  }
  0xd2   :  { %2204 = vmatprep.mubr.bf16.mxu0 %v10033_v2  ;;  %v10128_v2 = vld [vmem:[%s12875_s1 + $0x604] ss:$16 sps:$4 sm:$0xff]  }
  0xd9   :  { %2205 = vmatmul.mubr.bf16.gmra.mrb[76].mxu0 %v10035_v3  ;;  %v10130_v3 = vld [vmem:[%s12875_s1 + $0x600] ss:$16 sps:$4 sm:$0xff]  }
  0xda   :  { %2212 = vmatprep.mubr.bf16.mxu0 %v10036_v4  ;;  %v10131_v4 = vld [vmem:[%s12875_s1 + $0x624] ss:$16 sps:$4 sm:$0xff]  }
  0xe1   :  { %2213 = vmatmul.mubr.bf16.gmra.mrb[80].mxu0 %v10038_v5  ;;  %v10133_v5 = vld [vmem:[%s12875_s1 + $0x620] ss:$16 sps:$4 sm:$0xff]  }
  0xe2   :  { %2220 = vmatprep.mubr.bf16.mxu0 %v10039_v6  ;;  %v10134_v6 = vld [vmem:[%s12875_s1 + $0x644] ss:$16 sps:$4 sm:$0xff]  }
  0xe9   :  { %2221 = vmatmul.mubr.bf16.gmra.mrb[84].mxu0 %v10041_v8  ;;  %v10137_v8 = vld [vmem:[%s12875_s1 + $0x664] ss:$16 sps:$4 sm:$0xff]  }
  0xea   :  { %2228 = vmatprep.mubr.bf16.mxu0 %v10042_v9  ;;  %v10140_v9 = vld [vmem:[%s12875_s1 + $0x660] ss:$16 sps:$4 sm:$0xff]  }
  0xf1   :  { %2229 = vmatmul.mubr.bf16.gmra.mrb[88].mxu0 %v10045_v10  ;;  %v10141_v10 = vld [vmem:[%s12875_s1 + $0x684] ss:$16 sps:$4 sm:$0xff]  }
  0xf2   :  { %2236 = vmatprep.mubr.bf16.mxu0 %v10046_v11  ;;  %v10143_v11 = vld [vmem:[%s12875_s1 + $0x680] ss:$16 sps:$4 sm:$0xff]  }
  0xf9   :  { %2237 = vmatmul.mubr.bf16.gmra.mrb[92].mxu0 %v10048_v12  ;;  %v10144_v12 = vld [vmem:[%s12875_s1 + $0x6a4] ss:$16 sps:$4 sm:$0xff]  }
  0xfa   :  { %2244 = vmatprep.mubr.bf16.mxu0 %v10049_v13  ;;  %v10146_v13 = vld [vmem:[%s12875_s1 + $0x6a0] ss:$16 sps:$4 sm:$0xff]  }
 0x101   :  { %2245 = vmatmul.mubr.bf16.gmra.mrb[96].mxu0 %v10051_v14  ;;  %v10147_v14 = vld [vmem:[%s12875_s1 + $0x6c4] ss:$16 sps:$4 sm:$0xff]  }
 0x102   :  { %2252 = vmatprep.mubr.bf16.mxu0 %v10052_v15  ;;  %v10149_v15 = vld [vmem:[%s12875_s1 + $0x6c0] ss:$16 sps:$4 sm:$0xff]  }
 0x109   :  { %2253 = vmatmul.mubr.bf16.gmra.mrb[100].mxu0 %v10054_v17  ;;  %v10153_v17 = vld [vmem:[%s12875_s1 + $0x6e0] ss:$16 sps:$4 sm:$0xff]  }
 0x10a   :  { %2260 = vmatprep.mubr.bf16.mxu0 %v10056_v18  ;;  %v10154_v18 = vld [vmem:[%s12875_s1 + $0x704] ss:$16 sps:$4 sm:$0xff]  }
 0x111   :  { %2261 = vmatmul.mubr.bf16.gmra.mrb[104].mxu0 %v10058_v19  ;;  %v10156_v19 = vld [vmem:[%s12875_s1 + $0x700] ss:$16 sps:$4 sm:$0xff]  }
 0x112   :  { %2268 = vmatprep.mubr.bf16.mxu0 %v10059_v20  ;;  %v10157_v20 = vld [vmem:[%s12875_s1 + $0x724] ss:$16 sps:$4 sm:$0xff]  }
 0x119   :  { %2269 = vmatmul.mubr.bf16.gmra.mrb[108].mxu0 %v10061_v21  ;;  %v10159_v21 = vld [vmem:[%s12875_s1 + $0x720] ss:$16 sps:$4 sm:$0xff]  }
 0x11a   :  { %2276 = vmatprep.mubr.bf16.mxu0 %v10062_v22  ;;  %v10162_v22 = vld [vmem:[%s12875_s1 + $0xc] ss:$16 sps:$4 sm:$0xff]  }
 0x121   :  { %2277 = vmatmul.mubr.bf16.gmra.mrb[112].mxu0 %v10064_v24  ;;  %v10163_v24 = vld [vmem:[%s12875_s1 + $0x2c] ss:$16 sps:$4 sm:$0xff]  }
 0x122   :  { %2284 = vmatprep.mubr.bf16.mxu0 %v10065_v25  ;;  %v10165_v25 = vld [vmem:[%s12875_s1 + $0x28] ss:$16 sps:$4 sm:$0xff]  }
 0x129   :  { %2285 = vmatmul.mubr.bf16.gmra.mrb[116].mxu0 %v10067_v26  ;;  %v10166_v26 = vld [vmem:[%s12875_s1 + $0x4c] ss:$16 sps:$4 sm:$0xff]  }
 0x12a   :  { %2292 = vmatprep.mubr.bf16.mxu0 %v10069_v27  ;;  %v10168_v27 = vld [vmem:[%s12875_s1 + $0x48] ss:$16 sps:$4 sm:$0xff]  }
 0x131   :  { %2293 = vmatmul.mubr.bf16.gmra.mrb[120].mxu0 %v10071_v28  ;;  %v10169_v28 = vld [vmem:[%s12875_s1 + $0x6c] ss:$16 sps:$4 sm:$0xff]  }
 0x132   :  { %2300 = vmatprep.mubr.bf16.mxu0 %v10072_v29  ;;  %v10171_v29 = vld [vmem:[%s12875_s1 + $0x68] ss:$16 sps:$4 sm:$0xff]  }
 0x139   :  { %2301 = vmatmul.mubr.bf16.gmra.mrb[124].mxu0 %v10074_v30  ;;  %v10172_v30 = vld [vmem:[%s12875_s1 + $0x8c] ss:$16 sps:$4 sm:$0xff]  }
 0x13a   :  { %2308 = vmatprep.mubr.bf16.mxu0 %v10075_v31  ;;  %v10174_v31 = vld [vmem:[%s12875_s1 + $0x88] ss:$16 sps:$4 sm:$0xff]  }
 0x141   :  { %2309 = vmatmul.mubr.bf16.gmra.mrb[128].mxu0 %v10077_v33  ;;  %v10177_v33 = vld [vmem:[%s12875_s1 + $0xa8] ss:$16 sps:$4 sm:$0xff]  }
 0x142   :  { %2316 = vmatprep.mubr.bf16.mxu0 %v10079_v34  ;;  %v10178_v34 = vld [vmem:[%s12875_s1 + $0xcc] ss:$16 sps:$4 sm:$0xff]  }
 0x149   :  { %2317 = vmatmul.mubr.bf16.gmra.mrb[132].mxu0 %v10081_v35  ;;  %v10226_v35 = vld [vmem:[%s12875_s1 + $0x740] ss:$16 sps:$4 sm:$0xff]  }
 0x14a   :  { %2324 = vmatprep.mubr.bf16.mxu0 %v10082_v36  ;;  %v10228_v36 = vld [vmem:[%s12875_s1 + $0x744] ss:$16 sps:$4 sm:$0xff]  }
 0x14b   :  { %2516 = vmatprep.mubr.bf16.mxu1 %v10228_v36  ;;  %v10223_v36 = vld [vmem:[%s12875_s1 + $0x2ac] ss:$16 sps:$4 sm:$0xff]  }
 0x14c   :  { %2517 = vmatmul.mubr.bf16.vlgmr.msra.gmra.mrb[0].mxu1 %v10226_v35  ;;  %v10317_v35 = vld [vmem:[%s12876_s2 + $0x78] sm:$0xff]  }
 0x14d   :  { %2524 = vmatprep.mubr.bf16.mxu1 %v10232_v39  ;;  %v10231_v39 = vld [vmem:[%s12875_s1 + $0x2c8] ss:$16 sps:$4 sm:$0xff]  }
 0x151   :  { %2325 = vmatmul.mubr.bf16.gmra.mrb[136].mxu0 %v10084_v37  ;;  %v10180_v37 = vld [vmem:[%s12875_s1 + $0xc8] ss:$16 sps:$4 sm:$0xff]  }
 0x152   :  { %2332 = vmatprep.mubr.bf16.mxu0 %v10085_v38  ;;  %v10181_v38 = vld [vmem:[%s12875_s1 + $0xec] ss:$16 sps:$4 sm:$0xff]  }
 0x159   :  { %2333 = vmatmul.mubr.bf16.gmra.mrb[140].mxu0 %v10087_v40  ;;  %v10234_v40 = vld [vmem:[%s12875_s1 + $0x760] ss:$16 sps:$4 sm:$0xff]  }
 0x15a   :  { %2340 = vmatprep.mubr.bf16.mxu0 %v10088_v41  ;;  %2525 = vmatmul.mubr.bf16.gmra.mrb[4].mxu1 %v10234_v40  ;;  %v10183_v41 = vld [vmem:[%s12875_s1 + $0xe8] ss:$16 sps:$4 sm:$0xff]   ;;  %v10235_v40 = vld [vmem:[%s12875_s1 + $0x2ec] ss:$16 sps:$4 sm:$0xff]  }
 0x161   :  { %2341 = vmatmul.mubr.bf16.gmra.mrb[144].mxu0 %v10090_v42  ;;  %v10184_v42 = vld [vmem:[%s12875_s1 + $0x10c] ss:$16 sps:$4 sm:$0xff]  }
 0x162   :  { %2348 = vmatprep.mubr.bf16.mxu0 %v10092_v43  ;;  %v10238_v43 = vld [vmem:[%s12875_s1 + $0x784] ss:$16 sps:$4 sm:$0xff]  }
 0x163   :  { %2532 = vmatprep.mubr.bf16.mxu1 %v10238_v43  ;;  %v11465_v43 = vld [vmem:[%s12876_s2] sm:$0xff]  }
 0x169   :  { %2349 = vmatmul.mubr.bf16.gmra.mrb[148].mxu0 %v10094_v0  ;;  %v10240_v0 = vld [vmem:[%s12875_s1 + $0x780] ss:$16 sps:$4 sm:$0xff]  }
 0x16a   :  { %2356 = vmatprep.mubr.bf16.mxu0 %v10095_v44  ;;  %2533 = vmatmul.mubr.bf16.gmra.mrb[8].mxu1 %v10240_v0  ;;  %v10186_v44 = vld [vmem:[%s12875_s1 + $0x108] ss:$16 sps:$4 sm:$0xff]  }
 0x16b   :  { %v10243_v0 = vld [vmem:[%s12875_s1 + $0x308] ss:$16 sps:$4 sm:$0xff]  }
 0x171   :  { %2357 = vmatmul.mubr.bf16.gmra.mrb[152].mxu0 %v10097_v45  ;;  %v10187_v45 = vld [vmem:[%s12875_s1 + $0x12c] ss:$16 sps:$4 sm:$0xff]  }
 0x172   :  { %2364 = vmatprep.mubr.bf16.mxu0 %v10098_v46  ;;  %v10244_v46 = vld [vmem:[%s12875_s1 + $0x7a4] ss:$16 sps:$4 sm:$0xff]  }
 0x173   :  { %2540 = vmatprep.mubr.bf16.mxu1 %v10244_v46  ;;  %v10253_v46 = vld [vmem:[%s12875_s1 + $0x34c] ss:$16 sps:$4 sm:$0xff]  }
 0x174   :  { %2541 = vmatmul.mubr.bf16.gmra.mrb[12].mxu1 %v10246_v47  ;;  %v10255_v47 = vld [vmem:[%s12875_s1 + $0x348] ss:$16 sps:$4 sm:$0xff]  }
 0x179   :  { %2365 = vmatmul.mubr.bf16.gmra.mrb[156].mxu0 %v10100_v48  ;;  %v10189_v48 = vld [vmem:[%s12875_s1 + $0x128] ss:$16 sps:$4 sm:$0xff]  }
 0x17a   :  { %2372 = vmatprep.mubr.bf16.mxu0 %v10101_v49  ;;  %v10190_v49 = vld [vmem:[%s12875_s1 + $0x14c] ss:$16 sps:$4 sm:$0xff]  }
 0x181   :  { %2373 = vmatmul.mubr.bf16.gmra.mrb[160].mxu0 %v10103_v50  ;;  %v10250_v50 = vld [vmem:[%s12875_s1 + $0x7c4] ss:$16 sps:$4 sm:$0xff]  }
 0x182   :  { %2380 = vmatprep.mubr.bf16.mxu0 %v10105_v51  ;;  %v10252_v51 = vld [vmem:[%s12875_s1 + $0x7c0] ss:$16 sps:$4 sm:$0xff]   ;;  %2548 = vmatprep.mubr.bf16.mxu1 %v10250_v50 }
 0x183   :  { %2549 = vmatmul.mubr.bf16.gmra.mrb[16].mxu1 %v10252_v51  ;;  %v10261_v51 = vld [vmem:[%s12875_s1 + $0x368] ss:$16 sps:$4 sm:$0xff]  }
 0x189   :  { %2381 = vmatmul.mubr.bf16.gmra.mrb[164].mxu0 %v10107_v52  ;;  %v10192_v52 = vld [vmem:[%s12875_s1 + $0x148] ss:$16 sps:$4 sm:$0xff]  }
 0x18a   :  { %2388 = vmatprep.mubr.bf16.mxu0 %v10108_v53  ;;  %v10193_v53 = vld [vmem:[%s12875_s1 + $0x16c] ss:$16 sps:$4 sm:$0xff]  }
 0x191   :  { %2389 = vmatmul.mubr.bf16.gmra.mrb[168].mxu0 %v10110_v54  ;;  %v10195_v54 = vld [vmem:[%s12875_s1 + $0x168] ss:$16 sps:$4 sm:$0xff]  }
 0x192   :  { %2396 = vmatprep.mubr.bf16.mxu0 %v10111_v55  ;;  %v10256_v55 = vld [vmem:[%s12875_s1 + $0x7e4] ss:$16 sps:$4 sm:$0xff]  }
 0x193   :  { %2556 = vmatprep.mubr.bf16.mxu1 %v10256_v55 }
 0x199   :  { %2397 = vmatmul.mubr.bf16.gmra.mrb[172].mxu0 %v10113_v56  ;;  %v10196_v56 = vld [vmem:[%s12875_s1 + $0x18c] ss:$16 sps:$4 sm:$0xff]  }
 0x19a   :  { %2404 = vmatprep.mubr.bf16.mxu0 %v10115_v57  ;;  %v10258_v57 = vld [vmem:[%s12875_s1 + $0x7e0] ss:$16 sps:$4 sm:$0xff]  }
 0x19b   :  { %2557 = vmatmul.mubr.bf16.gmra.mrb[20].mxu1 %v10258_v57 }
 0x1a1   :  { %2405 = vmatmul.mubr.bf16.gmra.mrb[176].mxu0 %v10117_v58  ;;  %v10198_v58 = vld [vmem:[%s12875_s1 + $0x188] ss:$16 sps:$4 sm:$0xff]  }
 0x1a2   :  { %2412 = vmatprep.mubr.bf16.mxu0 %v10118_v59  ;;  %v10262_v59 = vld [vmem:[%s12875_s1 + $0x804] ss:$16 sps:$4 sm:$0xff]  }
 0x1a3   :  { %2564 = vmatprep.mubr.bf16.mxu1 %v10262_v59 }
 0x1a9   :  { %2413 = vmatmul.mubr.bf16.gmra.mrb[180].mxu0 %v10120_v60  ;;  %v10199_v60 = vld [vmem:[%s12875_s1 + $0x1ac] ss:$16 sps:$4 sm:$0xff]  }
 0x1aa   :  { %2420 = vmatprep.mubr.bf16.mxu0 %v10121_v61  ;;  %v10264_v61 = vld [vmem:[%s12875_s1 + $0x800] ss:$16 sps:$4 sm:$0xff]  }
 0x1ab   :  { %2565 = vmatmul.mubr.bf16.gmra.mrb[24].mxu1 %v10264_v61 }
 0x1b1   :  { %2421 = vmatmul.mubr.bf16.gmra.mrb[184].mxu0 %v10123_v62  ;;  %v10201_v62 = vld [vmem:[%s12875_s1 + $0x1a8] ss:$16 sps:$4 sm:$0xff]  }
 0x1b2   :  { %2428 = vmatprep.mubr.bf16.mxu0 %v10124_v63  ;;  %v10268_v63 = vld [vmem:[%s12875_s1 + $0x824] ss:$16 sps:$4 sm:$0xff]  }
 0x1b3   :  { %2572 = vmatprep.mubr.bf16.mxu1 %v10268_v63 }
 0x1b9   :  { %2429 = vmatmul.mubr.bf16.gmra.mrb[188].mxu0 %v10126_v1  ;;  %v10202_v1 = vld [vmem:[%s12875_s1 + $0x1cc] ss:$16 sps:$4 sm:$0xff]  }
 0x1ba   :  { %2436 = vmatprep.mubr.bf16.mxu0 %v10128_v2  ;;  %v10270_v2 = vld [vmem:[%s12875_s1 + $0x820] ss:$16 sps:$4 sm:$0xff]  }
 0x1bb   :  { %2573 = vmatmul.mubr.bf16.gmra.mrb[28].mxu1 %v10270_v2  ;;  %v10273_v2 = vld [vmem:[%s12875_s1 + $0x3a8] ss:$16 sps:$4 sm:$0xff]  }
 0x1c1   :  { %2437 = vmatmul.mubr.bf16.gmra.mrb[192].mxu0 %v10130_v3  ;;  %v10204_v3 = vld [vmem:[%s12875_s1 + $0x1c8] ss:$16 sps:$4 sm:$0xff]  }
 0x1c2   :  { %2444 = vmatprep.mubr.bf16.mxu0 %v10131_v4  ;;  %v10274_v4 = vld [vmem:[%s12875_s1 + $0x844] ss:$16 sps:$4 sm:$0xff]  }
 0x1c3   :  { %2580 = vmatprep.mubr.bf16.mxu1 %v10274_v4  ;;  %v10277_v4 = vld [vmem:[%s12875_s1 + $0x3cc] ss:$16 sps:$4 sm:$0xff]  }
 0x1c9   :  { %2445 = vmatmul.mubr.bf16.gmra.mrb[196].mxu0 %v10133_v5  ;;  %v10205_v5 = vld [vmem:[%s12875_s1 + $0x1ec] ss:$16 sps:$4 sm:$0xff]  }
 0x1ca   :  { %2452 = vmatprep.mubr.bf16.mxu0 %v10134_v6  ;;  %v10276_v6 = vld [vmem:[%s12875_s1 + $0x840] ss:$16 sps:$4 sm:$0xff]  }
 0x1cb   :  { %2581 = vmatmul.mubr.bf16.gmra.mrb[32].mxu1 %v10276_v6 }
 0x1d1   :  { %2453 = vmatmul.mubr.bf16.gmra.mrb[200].mxu0 %v10136_v7  ;;  %v10207_v7 = vld [vmem:[%s12875_s1 + $0x1e8] ss:$16 sps:$4 sm:$0xff]  }
 0x1d2   :  { %2460 = vmatprep.mubr.bf16.mxu0 %v10137_v8  ;;  %v10280_v8 = vld [vmem:[%s12875_s1 + $0x864] ss:$16 sps:$4 sm:$0xff]  }
 0x1d3   :  { %2588 = vmatprep.mubr.bf16.mxu1 %v10280_v8 }
 0x1d9   :  { %2461 = vmatmul.mubr.bf16.gmra.mrb[204].mxu0 %v10140_v9  ;;  %v10208_v9 = vld [vmem:[%s12875_s1 + $0x20c] ss:$16 sps:$4 sm:$0xff]  }
 0x1da   :  { %2468 = vmatprep.mubr.bf16.mxu0 %v10141_v10  ;;  %v10282_v10 = vld [vmem:[%s12875_s1 + $0x860] ss:$16 sps:$4 sm:$0xff]  }
 0x1db   :  { %2589 = vmatmul.mubr.bf16.gmra.mrb[36].mxu1 %v10282_v10 }
 0x1e1   :  { %2469 = vmatmul.mubr.bf16.gmra.mrb[208].mxu0 %v10143_v11  ;;  %v10210_v11 = vld [vmem:[%s12875_s1 + $0x208] ss:$16 sps:$4 sm:$0xff]  }
 0x1e2   :  { %2476 = vmatprep.mubr.bf16.mxu0 %v10144_v12  ;;  %v10286_v12 = vld [vmem:[%s12875_s1 + $0x884] ss:$16 sps:$4 sm:$0xff]  }
 0x1e3   :  { %2596 = vmatprep.mubr.bf16.mxu1 %v10286_v12 }
 0x1e9   :  { %2477 = vmatmul.mubr.bf16.gmra.mrb[212].mxu0 %v10146_v13  ;;  %v10211_v13 = vld [vmem:[%s12875_s1 + $0x22c] ss:$16 sps:$4 sm:$0xff]  }
 0x1ea   :  { %2484 = vmatprep.mubr.bf16.mxu0 %v10147_v14  ;;  %v10288_v14 = vld [vmem:[%s12875_s1 + $0x880] ss:$16 sps:$4 sm:$0xff]  }
 0x1eb   :  { %2597 = vmatmul.mubr.bf16.gmra.mrb[40].mxu1 %v10288_v14 }
 0x1f1   :  { %2485 = vmatmul.mubr.bf16.gmra.mrb[216].mxu0 %v10149_v15  ;;  %v10292_v15 = vld [vmem:[%s12876_s2 + $0x40] sm:$0xff]  }
 0x1f2   :  { %2492 = vmatprep.mubr.bf16.mxu0 %v10151_v16  ;;  %8775 = vmatprep.subr.bf16.mxu1 %v10292_v15  ;;  %v10213_v16 = vld [vmem:[%s12875_s1 + $0x228] ss:$16 sps:$4 sm:$0xff]  }
 0x1f3   :  { %8776 = vmatpush3.bf16.msra.mxu1 %v10292_v15 }
 0x1f9   :  { %2493 = vmatmul.mubr.bf16.gmra.mrb[220].mxu0 %v10153_v17  ;;  %v10293_v17 = vld [vmem:[%s12876_s2 + $0x48] sm:$0xff]  }
 0x1fa   :  { %2500 = vmatprep.mubr.bf16.mxu0 %v10154_v18  ;;  %8777 = vmatprep.subr.bf16.mxu1 %v10293_v17  ;;  %v10294_v18 = vld [vmem:[%s12875_s1 + $0x8a4] ss:$16 sps:$4 sm:$0xff]  }
 0x1fb   :  { %8778 = vmatpush3.bf16.msra.mxu1 %v10293_v17  ;;  %2604 = vmatprep.mubr.bf16.mxu1 %v10294_v18  ;;  %v10289_v18 = vld [vmem:[%s12875_s1 + $0x40c] ss:$16 sps:$4 sm:$0xff]  }
 0x201   :  { %2501 = vmatmul.mubr.bf16.gmra.mrb[224].mxu0 %v10156_v19  ;;  %v10214_v19 = vld [vmem:[%s12875_s1 + $0x24c] ss:$16 sps:$4 sm:$0xff]  }
 0x202   :  { %2508 = vmatprep.mubr.bf16.mxu0 %v10157_v20  ;;  %v10296_v20 = vld [vmem:[%s12875_s1 + $0x8a0] ss:$16 sps:$4 sm:$0xff]  }
 0x203   :  { %2605 = vmatmul.mubr.bf16.gmra.mrb[44].mxu1 %v10296_v20 }
 0x209   :  { %2509 = vmatmul.mubr.bf16.gmra.mrb[228].mxu0 %v10159_v21  ;;  %v10300_v21 = vld [vmem:[%s12876_s2 + $0x50] sm:$0xff]  }
 0x20a   :  { %2661 = vmatprep.mubr.bf16.mxu0 %v10162_v22  ;;  %8779 = vmatprep.subr.bf16.mxu1 %v10300_v21  ;;  %v10216_v22 = vld [vmem:[%s12875_s1 + $0x248] ss:$16 sps:$4 sm:$0xff]  }
 0x20b   :  { %8780 = vmatpush3.bf16.msra.mxu1 %v10300_v21 }
 0x211   :  { %2662 = vmatmul.mubr.bf16.vlgmr.msra.gmra.mrb[0].mxu0 %v10160_v23  ;;  %v10301_v23 = vld [vmem:[%s12876_s2 + $0x58] sm:$0xff]  }
 0x212   :  { %2669 = vmatprep.mubr.bf16.mxu0 %v10163_v24  ;;  %8781 = vmatprep.subr.bf16.mxu1 %v10301_v23  ;;  %v10302_v24 = vld [vmem:[%s12875_s1 + $0x8c4] ss:$16 sps:$4 sm:$0xff]  }
 0x213   :  { %8782 = vmatpush3.bf16.msra.mxu1 %v10301_v23  ;;  %2612 = vmatprep.mubr.bf16.mxu1 %v10302_v24  ;;  %v10291_v23 = vld [vmem:[%s12875_s1 + $0x408] ss:$16 sps:$4 sm:$0xff]  }
 0x219   :  { %2670 = vmatmul.mubr.bf16.gmra.mrb[4].mxu0 %v10165_v25  ;;  %v10217_v25 = vld [vmem:[%s12875_s1 + $0x26c] ss:$16 sps:$4 sm:$0xff]  }
 0x21a   :  { %2677 = vmatprep.mubr.bf16.mxu0 %v10166_v26  ;;  %v10304_v26 = vld [vmem:[%s12875_s1 + $0x8c0] ss:$16 sps:$4 sm:$0xff]  }
 0x21b   :  { %2613 = vmatmul.mubr.bf16.gmra.mrb[48].mxu1 %v10304_v26 }
 0x221   :  { %2678 = vmatmul.mubr.bf16.gmra.mrb[8].mxu0 %v10168_v27  ;;  %v10308_v27 = vld [vmem:[%s12876_s2 + $0x60] sm:$0xff]  }
 0x222   :  { %2685 = vmatprep.mubr.bf16.mxu0 %v10169_v28  ;;  %8783 = vmatprep.subr.bf16.mxu1 %v10308_v27  ;;  %v10219_v28 = vld [vmem:[%s12875_s1 + $0x268] ss:$16 sps:$4 sm:$0xff]  }
 0x223   :  { %8784 = vmatpush3.bf16.msra.mxu1 %v10308_v27 }
 0x229   :  { %2686 = vmatmul.mubr.bf16.gmra.mrb[12].mxu0 %v10171_v29  ;;  %v10309_v29 = vld [vmem:[%s12876_s2 + $0x68] sm:$0xff]  }
 0x22a   :  { %2693 = vmatprep.mubr.bf16.mxu0 %v10172_v30  ;;  %8785 = vmatprep.subr.bf16.mxu1 %v10309_v29  ;;  %v10310_v30 = vld [vmem:[%s12875_s1 + $0x8e4] ss:$16 sps:$4 sm:$0xff]  }
 0x22b   :  { %8786 = vmatpush3.bf16.msra.mxu1 %v10309_v29  ;;  %2620 = vmatprep.mubr.bf16.mxu1 %v10310_v30  ;;  %v10299_v30 = vld [vmem:[%s12875_s1 + $0x428] ss:$16 sps:$4 sm:$0xff]  }
 0x231   :  { %2694 = vmatmul.mubr.bf16.gmra.mrb[16].mxu0 %v10174_v31  ;;  %v10220_v31 = vld [vmem:[%s12875_s1 + $0x28c] ss:$16 sps:$4 sm:$0xff]  }
 0x232   :  { %2701 = vmatprep.mubr.bf16.mxu0 %v10175_v32  ;;  %v10312_v32 = vld [vmem:[%s12875_s1 + $0x8e0] ss:$16 sps:$4 sm:$0xff]  }
 0x233   :  { %2621 = vmatmul.mubr.bf16.gmra.mrb[52].mxu1 %v10312_v32  ;;  %v10305_v32 = vld [vmem:[%s12875_s1 + $0x44c] ss:$16 sps:$4 sm:$0xff]  }
 0x239   :  { %2702 = vmatmul.mubr.bf16.gmra.mrb[20].mxu0 %v10177_v33  ;;  %v10316_v33 = vld [vmem:[%s12876_s2 + $0x70] sm:$0xff]  }
 0x23a   :  { %2709 = vmatprep.mubr.bf16.mxu0 %v10178_v34  ;;  %8787 = vmatprep.subr.bf16.mxu1 %v10316_v33  ;;  %v10222_v34 = vld [vmem:[%s12875_s1 + $0x288] ss:$16 sps:$4 sm:$0xff]  }
 0x23b   :  { %8788 = vmatpush3.bf16.msra.mxu1 %v10316_v33 }
 0x23c   :  { %8789 = vmatprep.subr.bf16.mxu1 %v10317_v35 }
 0x23f   :  { %8790 = vmatpush3.bf16.msra.mxu1 %v10317_v35 }
 0x240   :  { %8807 = vmatprep.subr.bf16.mxu1 %v11465_v43 }
 0x241   :  { %2710 = vmatmul.mubr.bf16.gmra.mrb[24].mxu0 %v10180_v37  ;;  %v10225_v37 = vld [vmem:[%s12875_s1 + $0x2a8] ss:$16 sps:$4 sm:$0xff]  }
 0x242   :  { %2717 = vmatprep.mubr.bf16.mxu0 %v10181_v38  ;;  %v10229_v38 = vld [vmem:[%s12875_s1 + $0x2cc] ss:$16 sps:$4 sm:$0xff]  }
 0x249   :  { %2718 = vmatmul.mubr.bf16.gmra.mrb[28].mxu0 %v10183_v41  ;;  %v10237_v41 = vld [vmem:[%s12875_s1 + $0x2e8] ss:$16 sps:$4 sm:$0xff]  }
 0x24a   :  { %2725 = vmatprep.mubr.bf16.mxu0 %v10184_v42  ;;  %v10241_v42 = vld [vmem:[%s12875_s1 + $0x30c] ss:$16 sps:$4 sm:$0xff]  }
 0x251   :  { %2726 = vmatmul.mubr.bf16.gmra.mrb[32].mxu0 %v10186_v44  ;;  %v10247_v44 = vld [vmem:[%s12875_s1 + $0x32c] ss:$16 sps:$4 sm:$0xff]  }
 0x252   :  { %2733 = vmatprep.mubr.bf16.mxu0 %v10187_v45  ;;  %v10249_v45 = vld [vmem:[%s12875_s1 + $0x328] ss:$16 sps:$4 sm:$0xff]  }
 0x259   :  { %2734 = vmatmul.mubr.bf16.gmra.mrb[36].mxu0 %v10189_v48  ;;  %v10259_v48 = vld [vmem:[%s12875_s1 + $0x36c] ss:$16 sps:$4 sm:$0xff]  }
 0x25a   :  { %2741 = vmatprep.mubr.bf16.mxu0 %v10190_v49 }
 0x261   :  { %2742 = vmatmul.mubr.bf16.gmra.mrb[40].mxu0 %v10192_v52 }
 0x262   :  { %2749 = vmatprep.mubr.bf16.mxu0 %v10193_v53  ;;  %v10265_v53 = vld [vmem:[%s12875_s1 + $0x38c] ss:$16 sps:$4 sm:$0xff]  }
 0x269   :  { %2750 = vmatmul.mubr.bf16.gmra.mrb[44].mxu0 %v10195_v54 }
 0x26a   :  { %2757 = vmatprep.mubr.bf16.mxu0 %v10196_v56 }
 0x271   :  { %2758 = vmatmul.mubr.bf16.gmra.mrb[48].mxu0 %v10198_v58  ;;  %v10267_v58 = vld [vmem:[%s12875_s1 + $0x388] ss:$16 sps:$4 sm:$0xff]  }
 0x272   :  { %2765 = vmatprep.mubr.bf16.mxu0 %v10199_v60  ;;  %v10271_v60 = vld [vmem:[%s12875_s1 + $0x3ac] ss:$16 sps:$4 sm:$0xff]  }
 0x279   :  { %2766 = vmatmul.mubr.bf16.gmra.mrb[52].mxu0 %v10201_v62 }
 0x27a   :  { %2773 = vmatprep.mubr.bf16.mxu0 %v10202_v1 }
 0x281   :  { %2774 = vmatmul.mubr.bf16.gmra.mrb[56].mxu0 %v10204_v3 }
 0x282   :  { %2781 = vmatprep.mubr.bf16.mxu0 %v10205_v5 }
 0x289   :  { %2782 = vmatmul.mubr.bf16.gmra.mrb[60].mxu0 %v10207_v7 }
 0x28a   :  { %2789 = vmatprep.mubr.bf16.mxu0 %v10208_v9  ;;  %v10279_v9 = vld [vmem:[%s12875_s1 + $0x3c8] ss:$16 sps:$4 sm:$0xff]  }
 0x291   :  { %2790 = vmatmul.mubr.bf16.gmra.mrb[64].mxu0 %v10210_v11  ;;  %v10283_v11 = vld [vmem:[%s12875_s1 + $0x3ec] ss:$16 sps:$4 sm:$0xff]  }
 0x292   :  { %2797 = vmatprep.mubr.bf16.mxu0 %v10211_v13 }
 0x299   :  { %2798 = vmatmul.mubr.bf16.gmra.mrb[68].mxu0 %v10213_v16  ;;  %v10285_v16 = vld [vmem:[%s12875_s1 + $0x3e8] ss:$16 sps:$4 sm:$0xff]  }
 0x29a   :  { %2805 = vmatprep.mubr.bf16.mxu0 %v10214_v19 }
 0x2a1   :  { %2806 = vmatmul.mubr.bf16.gmra.mrb[72].mxu0 %v10216_v22 }
 0x2a2   :  { %2813 = vmatprep.mubr.bf16.mxu0 %v10217_v25  ;;  %v10297_v25 = vld [vmem:[%s12875_s1 + $0x42c] ss:$16 sps:$4 sm:$0xff]  }
 0x2a9   :  { %2814 = vmatmul.mubr.bf16.gmra.mrb[76].mxu0 %v10219_v28 }
 0x2aa   :  { %2821 = vmatprep.mubr.bf16.mxu0 %v10220_v31 }
 0x2b1   :  { %2822 = vmatmul.mubr.bf16.gmra.mrb[80].mxu0 %v10222_v34 }
 0x2b2   :  { %2829 = vmatprep.mubr.bf16.mxu0 %v10223_v36 }
 0x2b9   :  { %2830 = vmatmul.mubr.bf16.gmra.mrb[84].mxu0 %v10225_v37  ;;  %v10307_v37 = vld [vmem:[%s12875_s1 + $0x448] ss:$16 sps:$4 sm:$0xff]  }
 0x2ba   :  { %2837 = vmatprep.mubr.bf16.mxu0 %v10229_v38 }
 0x2c1   :  { %2838 = vmatmul.mubr.bf16.gmra.mrb[88].mxu0 %v10231_v39  ;;  %v10313_v39 = vld [vmem:[%s12875_s1 + $0x46c] ss:$16 sps:$4 sm:$0xff]  }
 0x2c2   :  { %2845 = vmatprep.mubr.bf16.mxu0 %v10235_v40 }
 0x2c9   :  { %2846 = vmatmul.mubr.bf16.gmra.mrb[92].mxu0 %v10237_v41 }
 0x2ca   :  { %2853 = vmatprep.mubr.bf16.mxu0 %v10241_v42 }
 0x2d1   :  { %2854 = vmatmul.mubr.bf16.gmra.mrb[96].mxu0 %v10243_v0 }
 0x2d2   :  { %2861 = vmatprep.mubr.bf16.mxu0 %v10247_v44  ;;  %v10315_v44 = vld [vmem:[%s12875_s1 + $0x468] ss:$16 sps:$4 sm:$0xff]  }
 0x2d9   :  { %2862 = vmatmul.mubr.bf16.gmra.mrb[100].mxu0 %v10249_v45 }
 0x2da   :  { %2869 = vmatprep.mubr.bf16.mxu0 %v10253_v46  ;;  %v10318_v46 = vld [vmem:[%s12875_s1 + $0x48c] ss:$16 sps:$4 sm:$0xff]  }
 0x2e1   :  { %2870 = vmatmul.mubr.bf16.gmra.mrb[104].mxu0 %v10255_v47 }
 0x2e2   :  { %2877 = vmatprep.mubr.bf16.mxu0 %v10259_v48 }
 0x2e4   :  { %v11486_v49 = vpop.f32.mrb[0].mxu0 }
 0x2e5   :  { %v2665_v50 = vpop.f32.mrb[1].mxu0 }
 0x2e6   :  { %v11491_v52 = vpop.f32.mrb[2].mxu0 }
 0x2e7   :  { %v3238_v54 = vpack.c.bf16 %v11491_v52, %v11486_v49  ;;  %v2668_v55 = vpop.f32.mrb[3].mxu0  ;;  %v10355_v49 = vld [vmem:[%s12876_s2 + $0x90] sm:$0xff]  }
 0x2e9   :  { %2878 = vmatmul.mubr.bf16.gmra.mrb[108].mxu0 %v10261_v51 }
 0x2ea   :  { %2885 = vmatprep.mubr.bf16.mxu0 %v10265_v53  ;;  %v10320_v53 = vld [vmem:[%s12875_s1 + $0x488] ss:$16 sps:$4 sm:$0xff]  }
 0x2ec   :  { %v11498_v56 = vpop.f32.mrb[4].mxu0 }
 0x2ed   :  { %v2673_v57 = vpop.f32.mrb[5].mxu0 }
 0x2ee   :  { %v11503_v59 = vpop.f32.mrb[6].mxu0  ;;  %v10321_v57 = vld [vmem:[%s12875_s1 + $0x4ac] ss:$16 sps:$4 sm:$0xff]  }
 0x2ef   :  { %v3239_v61 = vpack.c.bf16 %v11503_v59, %v11498_v56  ;;  %v2676_v62 = vpop.f32.mrb[7].mxu0 }
 0x2f0   :  { %v10331_v62 = vld [vmem:[%s12876_s2 + $0x8] sm:$0xff]  }
 0x2f1   :  { %2886 = vmatmul.mubr.bf16.gmra.mrb[112].mxu0 %v10267_v58 }
 0x2f2   :  { %2893 = vmatprep.mubr.bf16.mxu0 %v10271_v60 }
 0x2f4   :  { %v11510_v63 = vpop.f32.mrb[8].mxu0 }
 0x2f5   :  { %v2681_v1 = vpop.f32.mrb[9].mxu0 }
 0x2f6   :  { %v11515_v3 = vpop.f32.mrb[10].mxu0  ;;  %v10335_v1 = vld [vmem:[%s12876_s2 + $0x10] sm:$0xff]  }
 0x2f7   :  { %v3240_v5 = vpack.c.bf16 %v11515_v3, %v11510_v63  ;;  %v2684_v6 = vpop.f32.mrb[11].mxu0  ;;  %v10357_v63 = vld [vmem:[%s12875_s1 + $0x5ac] ss:$16 sps:$4 sm:$0xff]   ;;  %v10360_v3 = vld [vmem:[%s12876_s2 + $0xa0] sm:$0xff]  }
 0x2f8   :  { %v10323_v6 = vld [vmem:[%s12875_s1 + $0x4a8] ss:$16 sps:$4 sm:$0xff]  }
 0x2f9   :  { %2894 = vmatmul.mubr.bf16.gmra.mrb[116].mxu0 %v10273_v2 }
 0x2fa   :  { %2901 = vmatprep.mubr.bf16.mxu0 %v10277_v4 }
 0x2fc   :  { %v11522_v7 = vpop.f32.mrb[12].mxu0 }
 0x2fd   :  { %v2689_v8 = vpop.f32.mrb[13].mxu0 }
 0x2fe   :  { %v11527_v10 = vpop.f32.mrb[14].mxu0 }
 0x2ff   :  { %v3241_v12 = vpack.c.bf16 %v11527_v10, %v11522_v7  ;;  %v2692_v13 = vpop.f32.mrb[15].mxu0 }
 0x301   :  { %2902 = vmatmul.mubr.bf16.gmra.mrb[120].mxu0 %v10279_v9  ;;  %v10324_v9 = vld [vmem:[%s12875_s1 + $0x4cc] ss:$16 sps:$4 sm:$0xff]  }
 0x302   :  { %2909 = vmatprep.mubr.bf16.mxu0 %v10283_v11 }
 0x304   :  { %v11534_v14 = vpop.f32.mrb[16].mxu0 }
 0x305   :  { %v2697_v15 = vpop.f32.mrb[17].mxu0 }
 0x306   :  { %v11539_v17 = vpop.f32.mrb[18].mxu0  ;;  %v10340_v15 = vld [vmem:[%s12876_s2 + $0x20] sm:$0xff]  }
 0x307   :  { %v3242_v19 = vpack.c.bf16 %v11539_v17, %v11534_v14  ;;  %v2700_v20 = vpop.f32.mrb[19].mxu0  ;;  %v10362_v14 = vld [vmem:[%s12875_s1 + $0x5cc] ss:$16 sps:$4 sm:$0xff]   ;;  %v10365_v17 = vld [vmem:[%s12876_s2 + $0xb0] sm:$0xff]  }
 0x308   :  { %v10326_v20 = vld [vmem:[%s12875_s1 + $0x4c8] ss:$16 sps:$4 sm:$0xff]  }
 0x309   :  { %2910 = vmatmul.mubr.bf16.gmra.mrb[124].mxu0 %v10285_v16 }
 0x30a   :  { %2917 = vmatprep.mubr.bf16.mxu0 %v10289_v18 }
 0x30c   :  { %v11546_v21 = vpop.f32.mrb[20].mxu0 }
 0x30d   :  { %v2705_v22 = vpop.f32.mrb[21].mxu0 }
 0x30e   :  { %v11551_v24 = vpop.f32.mrb[22].mxu0 }
 0x30f   :  { %v3243_v26 = vpack.c.bf16 %v11551_v24, %v11546_v21  ;;  %v2708_v27 = vpop.f32.mrb[23].mxu0 }
 0x311   :  { %2918 = vmatmul.mubr.bf16.gmra.mrb[128].mxu0 %v10291_v23  ;;  %v10327_v23 = vld [vmem:[%s12875_s1 + $0x4ec] ss:$16 sps:$4 sm:$0xff]  }
 0x312   :  { %2925 = vmatprep.mubr.bf16.mxu0 %v10297_v25 }
 0x314   :  { %v11558_v28 = vpop.f32.mrb[24].mxu0 }
 0x315   :  { %v2713_v29 = vpop.f32.mrb[25].mxu0 }
 0x316   :  { %v11563_v31 = vpop.f32.mrb[26].mxu0  ;;  %v10341_v29 = vld [vmem:[%s12876_s2 + $0x28] sm:$0xff]  }
 0x317   :  { %v3244_v33 = vpack.c.bf16 %v11563_v31, %v11558_v28  ;;  %v2716_v34 = vpop.f32.mrb[27].mxu0  ;;  %v10367_v28 = vld [vmem:[%s12875_s1 + $0x5ec] ss:$16 sps:$4 sm:$0xff]   ;;  %v10373_v31 = vld [vmem:[%s12876_s2 + $0xc0] sm:$0xff]  }
 0x319   :  { %2926 = vmatmul.mubr.bf16.gmra.mrb[132].mxu0 %v10299_v30  ;;  %v10345_v30 = vld [vmem:[%s12876_s2 + $0x30] sm:$0xff]  }
 0x31a   :  { %2933 = vmatprep.mubr.bf16.mxu0 %v10305_v32 }
 0x31c   :  { %v11570_v35 = vpop.f32.mrb[28].mxu0 }
 0x31d   :  { %v2721_v36 = vpop.f32.mrb[29].mxu0 }
 0x31e   :  { %v11575_v38 = vpop.f32.mrb[30].mxu0  ;;  %v10329_v36 = vld [vmem:[%s12875_s1 + $0x4e8] ss:$16 sps:$4 sm:$0xff]  }
 0x31f   :  { %v3245_v40 = vpack.c.bf16 %v11575_v38, %v11570_v35  ;;  %v2724_v41 = vpop.f32.mrb[31].mxu0  ;;  %v10370_v35 = vld [vmem:[%s12875_s1 + $0x60c] ss:$16 sps:$4 sm:$0xff]  }
 0x321   :  { %2934 = vmatmul.mubr.bf16.gmra.mrb[136].mxu0 %v10307_v37 }
 0x322   :  { %2941 = vmatprep.mubr.bf16.mxu0 %v10313_v39  ;;  %v10332_v39 = vld [vmem:[%s12875_s1 + $0x50c] ss:$16 sps:$4 sm:$0xff]  }
 0x324   :  { %v2727_v42 = vpop.f32.mrb[32].mxu0 }
 0x325   :  { %v2729_v0 = vpop.f32.mrb[33].mxu0 }
 0x326   :  { %v2730_v45 = vpop.f32.mrb[34].mxu0  ;;  %v10346_v0 = vld [vmem:[%s12876_s2 + $0x38] sm:$0xff]  }
 0x327   :  { %v3246_v47 = vpack.c.bf16 %v2730_v45, %v2727_v42  ;;  %v2732_v48 = vpop.f32.mrb[35].mxu0 }
 0x329   :  { %2942 = vmatmul.mubr.bf16.gmra.mrb[140].mxu0 %v10315_v44  ;;  %8791 = vmatprep.mubr.bf16.mxu1 %v3246_v47  ;;  %v10350_v44 = vld [vmem:[%s12876_s2 + $0x80] sm:$0xff]   ;;  %v10334_v47 = vld [vmem:[%s12875_s1 + $0x508] ss:$16 sps:$4 sm:$0xff]  }
 0x32a   :  { %2949 = vmatprep.mubr.bf16.mxu0 %v10318_v46 }
 0x32c   :  { %v2735_v50 = vpop.f32.mrb[36].mxu0 }
 0x32d   :  { %v2737_v51 = vpop.f32.mrb[37].mxu0 }
 0x32e   :  { %v2738_v55 = vpop.f32.mrb[38].mxu0 }
 0x32f   :  { %v3247_v58 = vpack.c.bf16 %v2738_v55, %v2735_v50  ;;  %v2740_v60 = vpop.f32.mrb[39].mxu0  ;;  %v10337_v50 = vld [vmem:[%s12875_s1 + $0x52c] ss:$16 sps:$4 sm:$0xff]  }
 0x331   :  { %2950 = vmatmul.mubr.bf16.gmra.mrb[144].mxu0 %v10320_v53  ;;  %8792 = vmatmul.mubr.bf16.vlgmr.msra.gmra.mrb[56].mxu1 %v3247_v58  ;;  %v10339_v58 = vld [vmem:[%s12875_s1 + $0x528] ss:$16 sps:$4 sm:$0xff]  }
 0x332   :  { %2957 = vmatprep.mubr.bf16.mxu0 %v10321_v57  ;;  %8808 = vmatpush3.bf16.msra.mxu1 %v11465_v43  ;;  %v10336_v43 = vld [vmem:[%s12876_s2 + $0x18] sm:$0xff]  }
 0x333   :  { %8809 = vmatprep.subr.bf16.mxu1 %v10331_v62 }
 0x334   :  { %v2743_v2 = vpop.f32.mrb[40].mxu0 }
 0x335   :  { %v2745_v4 = vpop.f32.mrb[41].mxu0 }
 0x336   :  { %v2746_v8 = vpop.f32.mrb[42].mxu0  ;;  %8810 = vmatpush3.bf16.msra.mxu1 %v10331_v62  ;;  %v10342_v62 = vld [vmem:[%s12875_s1 + $0x54c] ss:$16 sps:$4 sm:$0xff]  }
 0x337   :  { %v3248_v11 = vpack.c.bf16 %v2746_v8, %v2743_v2  ;;  %v2748_v13 = vpop.f32.mrb[43].mxu0  ;;  %8811 = vmatprep.subr.bf16.mxu1 %v10335_v1  ;;  %v10344_v8 = vld [vmem:[%s12875_s1 + $0x548] ss:$16 sps:$4 sm:$0xff]  }
 0x339   :  { %2958 = vmatmul.mubr.bf16.gmra.mrb[148].mxu0 %v10323_v6  ;;  %8795 = vmatprep.mubr.bf16.mxu1 %v3248_v11  ;;  %v10347_v11 = vld [vmem:[%s12875_s1 + $0x56c] ss:$16 sps:$4 sm:$0xff]  }
 0x33a   :  { %2965 = vmatprep.mubr.bf16.mxu0 %v10324_v9  ;;  %8812 = vmatpush3.bf16.msra.mxu1 %v10335_v1 }
 0x33b   :  { %8813 = vmatprep.subr.bf16.mxu1 %v10336_v43 }
 0x33c   :  { %v2751_v16 = vpop.f32.mrb[44].mxu0 }
 0x33d   :  { %v2753_v18 = vpop.f32.mrb[45].mxu0 }
 0x33e   :  { %v2754_v22 = vpop.f32.mrb[46].mxu0  ;;  %8814 = vmatpush3.bf16.msra.mxu1 %v10336_v43  ;;  %v10349_v18 = vld [vmem:[%s12875_s1 + $0x568] ss:$16 sps:$4 sm:$0xff]  }
 0x33f   :  { %v3249_v25 = vpack.c.bf16 %v2754_v22, %v2751_v16  ;;  %v2756_v27 = vpop.f32.mrb[47].mxu0  ;;  %8815 = vmatprep.subr.bf16.mxu1 %v10340_v15 }
 0x340   :  { %v10352_v27 = vld [vmem:[%s12875_s1 + $0x58c] ss:$16 sps:$4 sm:$0xff]  }
 0x341   :  { %2966 = vmatmul.mubr.bf16.gmra.mrb[152].mxu0 %v10326_v20  ;;  %8796 = vmatmul.mubr.bf16.gmra.mrb[60].mxu1 %v3249_v25  ;;  %v10351_v25 = vld [vmem:[%s12876_s2 + $0x88] sm:$0xff]  }
 0x342   :  { %2973 = vmatprep.mubr.bf16.mxu0 %v10327_v23  ;;  %8816 = vmatpush3.bf16.msra.mxu1 %v10340_v15 }
 0x343   :  { %8817 = vmatprep.subr.bf16.mxu1 %v10341_v29 }
 0x344   :  { %v2759_v32 = vpop.f32.mrb[48].mxu0 }
 0x345   :  { %v2761_v34 = vpop.f32.mrb[49].mxu0 }
 0x346   :  { %v2762_v37 = vpop.f32.mrb[50].mxu0  ;;  %8818 = vmatpush3.bf16.msra.mxu1 %v10341_v29  ;;  %v10354_v29 = vld [vmem:[%s12875_s1 + $0x588] ss:$16 sps:$4 sm:$0xff]  }
 0x347   :  { %v3250_v41 = vpack.c.bf16 %v2762_v37, %v2759_v32  ;;  %v2764_v42 = vpop.f32.mrb[51].mxu0  ;;  %8819 = vmatprep.subr.bf16.mxu1 %v10345_v30  ;;  %v10359_v34 = vld [vmem:[%s12875_s1 + $0x5a8] ss:$16 sps:$4 sm:$0xff]  }
 0x349   :  { %2974 = vmatmul.mubr.bf16.gmra.mrb[156].mxu0 %v10329_v36  ;;  %8799 = vmatprep.mubr.bf16.mxu1 %v3250_v41 }
 0x34a   :  { %2981 = vmatprep.mubr.bf16.mxu0 %v10332_v39  ;;  %8820 = vmatpush3.bf16.msra.mxu1 %v10345_v30  ;;  %v10364_v39 = vld [vmem:[%s12875_s1 + $0x5c8] ss:$16 sps:$4 sm:$0xff]  }
 0x34b   :  { %8821 = vmatprep.subr.bf16.mxu1 %v10346_v0 }
 0x34c   :  { %v2767_v45 = vpop.f32.mrb[52].mxu0 }
 0x34d   :  { %v2769_v46 = vpop.f32.mrb[53].mxu0 }
 0x34e   :  { %v2770_v48 = vpop.f32.mrb[54].mxu0  ;;  %8822 = vmatpush3.bf16.msra.mxu1 %v10346_v0  ;;  %v10369_v0 = vld [vmem:[%s12875_s1 + $0x5e8] ss:$16 sps:$4 sm:$0xff]  }
 0x34f   :  { %v3251_v51 = vpack.c.bf16 %v2770_v48, %v2767_v45  ;;  %v2772_v53 = vpop.f32.mrb[55].mxu0  ;;  %8839 = vmatprep.subr.bf16.mxu1 %v10350_v44  ;;  %v10374_v45 = vld [vmem:[%s12876_s2 + $0xc8] sm:$0xff]  }
 0x350   :  { %v10375_v53 = vld [vmem:[%s12875_s1 + $0x62c] ss:$16 sps:$4 sm:$0xff]  }
 0x351   :  { %2982 = vmatmul.mubr.bf16.gmra.mrb[160].mxu0 %v10334_v47  ;;  %8800 = vmatmul.mubr.bf16.gmra.mrb[64].mxu1 %v3251_v51  ;;  %v10378_v47 = vld [vmem:[%s12876_s2 + $0xd0] sm:$0xff]  }
 0x352   :  { %2989 = vmatprep.mubr.bf16.mxu0 %v10337_v50  ;;  %v10372_v50 = vld [vmem:[%s12875_s1 + $0x608] ss:$16 sps:$4 sm:$0xff]  }
 0x354   :  { %v2775_v55 = vpop.f32.mrb[56].mxu0 }
 0x355   :  { %v2777_v57 = vpop.f32.mrb[57].mxu0 }
 0x356   :  { %v2778_v60 = vpop.f32.mrb[58].mxu0 }
 0x357   :  { %v3252_v1 = vpack.c.bf16 %v2778_v60, %v2775_v55  ;;  %v2780_v2 = vpop.f32.mrb[59].mxu0 }
 0x358   :  { %v10377_v2 = vld [vmem:[%s12875_s1 + $0x628] ss:$16 sps:$4 sm:$0xff]  }
 0x359   :  { %2990 = vmatmul.mubr.bf16.gmra.mrb[164].mxu0 %v10339_v58  ;;  %8803 = vmatprep.mubr.bf16.mxu1 %v3252_v1  ;;  %v10379_v58 = vld [vmem:[%s12876_s2 + $0xd8] sm:$0xff]  }
 0x35a   :  { %2997 = vmatprep.mubr.bf16.mxu0 %v10342_v62  ;;  %v10383_v62 = vld [vmem:[%s12876_s2 + $0xe0] sm:$0xff]  }
 0x35c   :  { %v2783_v4 = vpop.f32.mrb[60].mxu0 }
 0x35d   :  { %v2785_v6 = vpop.f32.mrb[61].mxu0 }
 0x35e   :  { %v2786_v9 = vpop.f32.mrb[62].mxu0  ;;  %v10380_v6 = vld [vmem:[%s12875_s1 + $0x64c] ss:$16 sps:$4 sm:$0xff]  }
 0x35f   :  { %v3253_v13 = vpack.c.bf16 %v2786_v9, %v2783_v4  ;;  %v2788_v43 = vpop.f32.mrb[63].mxu0 }
 0x360   :  { %v10388_v43 = vld [vmem:[%s12876_s2 + $0xf0] sm:$0xff]  }
 0x361   :  { %2998 = vmatmul.mubr.bf16.gmra.mrb[168].mxu0 %v10344_v8  ;;  %8804 = vmatmul.mubr.bf16.gmra.mrb[68].mxu1 %v3253_v13 }
 0x362   :  { %8823 = vmatprep.mubr.bf16.mxu1 %v3238_v54  ;;  %3005 = vmatprep.mubr.bf16.mxu0 %v10347_v11  ;;  %v10384_v11 = vld [vmem:[%s12876_s2 + $0xe8] sm:$0xff]  }
 0x364   :  { %v2791_v15 = vpop.f32.mrb[64].mxu0 }
 0x365   :  { %v2793_v16 = vpop.f32.mrb[65].mxu0 }
 0x366   :  { %v2794_v20 = vpop.f32.mrb[66].mxu0  ;;  %v10382_v16 = vld [vmem:[%s12875_s1 + $0x648] ss:$16 sps:$4 sm:$0xff]  }
 0x367   :  { %v3254_v22 = vpack.c.bf16 %v2794_v20, %v2791_v15  ;;  %v2796_v23 = vpop.f32.mrb[67].mxu0  ;;  %v10385_v20 = vld [vmem:[%s12875_s1 + $0x66c] ss:$16 sps:$4 sm:$0xff]  }
 0x369   :  { %3006 = vmatmul.mubr.bf16.gmra.mrb[172].mxu0 %v10349_v18  ;;  %8824 = vmatmul.mubr.bf16.vlgmr.msra.gmra.mrb[56].mxu1 %v3239_v61  ;;  %v10356_v61 = vld [vmem:[%s12876_s2 + $0x98] sm:$0xff]  }
 0x36a   :  { %8827 = vmatprep.mubr.bf16.mxu1 %v3240_v5  ;;  %8840 = vmatpush3.bf16.msra.mxu1 %v10350_v44 }
 0x36b   :  { %8841 = vmatprep.subr.bf16.mxu1 %v10351_v25  ;;  %3013 = vmatprep.mubr.bf16.mxu0 %v10352_v27 }
 0x36c   :  { %v2799_v52 = vpop.f32.mrb[68].mxu0 }
 0x36d   :  { %v2801_v54 = vpop.f32.mrb[69].mxu0 }
 0x36e   :  { %v2802_v30 = vpop.f32.mrb[70].mxu0  ;;  %8842 = vmatpush3.bf16.msra.mxu1 %v10351_v25  ;;  %v10389_v25 = vld [vmem:[%s12876_s2 + $0xf8] sm:$0xff]  }
 0x36f   :  { %v3255_v56 = vpack.c.bf16 %v2802_v30, %v2799_v52  ;;  %v2804_v59 = vpop.f32.mrb[71].mxu0  ;;  %8843 = vmatprep.subr.bf16.mxu1 %v10355_v49  ;;  %v10387_v54 = vld [vmem:[%s12875_s1 + $0x668] ss:$16 sps:$4 sm:$0xff]   ;;  %v10390_v30 = vld [vmem:[%s12875_s1 + $0x68c] ss:$16 sps:$4 sm:$0xff]  }
 0x371   :  { %3014 = vmatmul.mubr.bf16.gmra.mrb[176].mxu0 %v10354_v29  ;;  %8828 = vmatmul.mubr.bf16.gmra.mrb[60].mxu1 %v3241_v12  ;;  %v10361_v12 = vld [vmem:[%s12876_s2 + $0xa8] sm:$0xff]  }
 0x372   :  { %8831 = vmatprep.mubr.bf16.mxu1 %v3242_v19  ;;  %8844 = vmatpush3.bf16.msra.mxu1 %v10355_v49  ;;  %v10405_v49 = vld [vmem:[%s12876_s2 + $0x100] sm:$0xff]  }
 0x373   :  { %8845 = vmatprep.subr.bf16.mxu1 %v10356_v61  ;;  %3021 = vmatprep.mubr.bf16.mxu0 %v10357_v63 }
 0x374   :  { %v2807_v5 = vpop.f32.mrb[72].mxu0 }
 0x375   :  { %v2809_v32 = vpop.f32.mrb[73].mxu0 }
 0x376   :  { %v2810_v36 = vpop.f32.mrb[74].mxu0  ;;  %8846 = vmatpush3.bf16.msra.mxu1 %v10356_v61  ;;  %v10393_v32 = vld [vmem:[%s12875_s1 + $0x6ac] ss:$16 sps:$4 sm:$0xff]  }
 0x377   :  { %v3256_v7 = vpack.c.bf16 %v2810_v36, %v2807_v5  ;;  %v2812_v10 = vpop.f32.mrb[75].mxu0  ;;  %8847 = vmatprep.subr.bf16.mxu1 %v10360_v3 }
 0x378   :  { %v10410_v10 = vld [vmem:[%s12876_s2 + $0x110] sm:$0xff]  }
 0x379   :  { %3022 = vmatmul.mubr.bf16.gmra.mrb[180].mxu0 %v10359_v34  ;;  %8832 = vmatmul.mubr.bf16.gmra.mrb[64].mxu1 %v3243_v26  ;;  %v10366_v26 = vld [vmem:[%s12876_s2 + $0xb8] sm:$0xff]  }
 0x37a   :  { %8835 = vmatprep.mubr.bf16.mxu1 %v3244_v33  ;;  %8848 = vmatpush3.bf16.msra.mxu1 %v10360_v3  ;;  %v10392_v3 = vld [vmem:[%s12875_s1 + $0x688] ss:$16 sps:$4 sm:$0xff]  }
 0x37b   :  { %8849 = vmatprep.subr.bf16.mxu1 %v10361_v12  ;;  %3029 = vmatprep.mubr.bf16.mxu0 %v10362_v14 }
 0x37c   :  { %v2815_v19 = vpop.f32.mrb[76].mxu0 }
 0x37d   :  { %v2817_v37 = vpop.f32.mrb[77].mxu0 }
 0x37e   :  { %v2818_v41 = vpop.f32.mrb[78].mxu0  ;;  %8850 = vmatpush3.bf16.msra.mxu1 %v10361_v12  ;;  %v10396_v37 = vld [vmem:[%s12875_s1 + $0x6cc] ss:$16 sps:$4 sm:$0xff]  }
 0x37f   :  { %v3257_v21 = vpack.c.bf16 %v2818_v41, %v2815_v19  ;;  %v2820_v24 = vpop.f32.mrb[79].mxu0  ;;  %8851 = vmatprep.subr.bf16.mxu1 %v10365_v17 }
 0x380   :  { %v10415_v24 = vld [vmem:[%s12876_s2 + $0x120] sm:$0xff]  }
 0x381   :  { %3030 = vmatmul.mubr.bf16.gmra.mrb[184].mxu0 %v10364_v39  ;;  %8836 = vmatmul.mubr.bf16.gmra.mrb[68].mxu1 %v3245_v40 }
 0x382   :  { %8852 = vmatpush3.bf16.msra.mxu1 %v10365_v17  ;;  %8855 = vmatprep.mubr.bf16.mxu1 %v3254_v22  ;;  %v10395_v17 = vld [vmem:[%s12875_s1 + $0x6a8] ss:$16 sps:$4 sm:$0xff]  }
 0x383   :  { %8853 = vmatprep.subr.bf16.mxu1 %v10366_v26  ;;  %3037 = vmatprep.mubr.bf16.mxu0 %v10367_v28 }
 0x384   :  { %v2823_v33 = vpop.f32.mrb[80].mxu0 }
 0x385   :  { %v2825_v42 = vpop.f32.mrb[81].mxu0 }
 0x386   :  { %v2826_v44 = vpop.f32.mrb[82].mxu0  ;;  %8854 = vmatpush3.bf16.msra.mxu1 %v10366_v26  ;;  %v10399_v42 = vld [vmem:[%s12875_s1 + $0x6ec] ss:$16 sps:$4 sm:$0xff]  }
 0x387   :  { %v3258_v38 = vpack.c.bf16 %v2826_v44, %v2823_v33  ;;  %v2828_v40 = vpop.f32.mrb[83].mxu0  ;;  %8871 = vmatprep.subr.bf16.mxu1 %v10373_v31 }
 0x389   :  { %3038 = vmatmul.mubr.bf16.gmra.mrb[188].mxu0 %v10369_v0  ;;  %8856 = vmatmul.mubr.bf16.vlgmr.msra.gmra.mrb[56].mxu1 %v3255_v56 }
 0x38a   :  { %8859 = vmatprep.mubr.bf16.mxu1 %v3256_v7  ;;  %3045 = vmatprep.mubr.bf16.mxu0 %v10370_v35  ;;  %v10406_v7 = vld [vmem:[%s12876_s2 + $0x108] sm:$0xff]  }
 0x38b   :  { %8872 = vmatpush3.bf16.msra.mxu1 %v10373_v31  ;;  %v10398_v31 = vld [vmem:[%s12875_s1 + $0x6c8] ss:$16 sps:$4 sm:$0xff]  }
 0x38c   :  { %v2831_v46 = vpop.f32.mrb[84].mxu0  ;;  %8873 = vmatprep.subr.bf16.mxu1 %v10374_v45  ;;  %v10416_v35 = vld [vmem:[%s12876_s2 + $0x128] sm:$0xff]  }
 0x38d   :  { %v2833_v48 = vpop.f32.mrb[85].mxu0 }
 0x38e   :  { %v2834_v51 = vpop.f32.mrb[86].mxu0  ;;  %v10402_v48 = vld [vmem:[%s12875_s1 + $0x70c] ss:$16 sps:$4 sm:$0xff]  }
 0x38f   :  { %v3259_v55 = vpack.c.bf16 %v2834_v51, %v2831_v46  ;;  %v2836_v57 = vpop.f32.mrb[87].mxu0  ;;  %8874 = vmatpush3.bf16.msra.mxu1 %v10374_v45  ;;  %v10401_v46 = vld [vmem:[%s12875_s1 + $0x6e8] ss:$16 sps:$4 sm:$0xff]  }
 0x390   :  { %8875 = vmatprep.subr.bf16.mxu1 %v10378_v47 }
 0x391   :  { %3046 = vmatmul.mubr.bf16.gmra.mrb[192].mxu0 %v10372_v50  ;;  %8860 = vmatmul.mubr.bf16.gmra.mrb[60].mxu1 %v3257_v21  ;;  %v10411_v21 = vld [vmem:[%s12876_s2 + $0x118] sm:$0xff]  }
 0x392   :  { %8863 = vmatprep.mubr.bf16.mxu1 %v3258_v38  ;;  %3053 = vmatprep.mubr.bf16.mxu0 %v10375_v53  ;;  %v10420_v38 = vld [vmem:[%s12876_s2 + $0x130] sm:$0xff]   ;;  %v10421_v53 = vld [vmem:[%s12876_s2 + $0x138] sm:$0xff]  }
 0x393   :  { %8876 = vmatpush3.bf16.msra.mxu1 %v10378_v47 }
 0x394   :  { %v2839_v60 = vpop.f32.mrb[88].mxu0  ;;  %8877 = vmatprep.subr.bf16.mxu1 %v10379_v58 }
 0x395   :  { %v2841_v1 = vpop.f32.mrb[89].mxu0 }
 0x396   :  { %v2842_v4 = vpop.f32.mrb[90].mxu0  ;;  %v10407_v1 = vld [vmem:[%s12875_s1 + $0x72c] ss:$16 sps:$4 sm:$0xff]  }
 0x397   :  { %v3260_v8 = vpack.c.bf16 %v2842_v4, %v2839_v60  ;;  %v2844_v9 = vpop.f32.mrb[91].mxu0  ;;  %8878 = vmatpush3.bf16.msra.mxu1 %v10379_v58  ;;  %v10404_v60 = vld [vmem:[%s12875_s1 + $0x708] ss:$16 sps:$4 sm:$0xff]  }
 0x398   :  { %8879 = vmatprep.subr.bf16.mxu1 %v10383_v62  ;;  %v10409_v9 = vld [vmem:[%s12875_s1 + $0x728] ss:$16 sps:$4 sm:$0xff]  }
 0x399   :  { %3054 = vmatmul.mubr.bf16.gmra.mrb[196].mxu0 %v10377_v2  ;;  %8864 = vmatmul.mubr.bf16.gmra.mrb[64].mxu1 %v3259_v55  ;;  %v10437_v55 = vld [vmem:[%s12876_s2 + $0x140] sm:$0xff]  }
 0x39a   :  { %8867 = vmatprep.mubr.bf16.mxu1 %v3260_v8  ;;  %3061 = vmatprep.mubr.bf16.mxu0 %v10380_v6 }
 0x39b   :  { %8880 = vmatpush3.bf16.msra.mxu1 %v10383_v62 }
 0x39c   :  { %v2847_v13 = vpop.f32.mrb[92].mxu0  ;;  %8881 = vmatprep.subr.bf16.mxu1 %v10384_v11 }
 0x39d   :  { %v2849_v15 = vpop.f32.mrb[93].mxu0 }
 0x39e   :  { %v2850_v18 = vpop.f32.mrb[94].mxu0 }
 0x39f   :  { %v3261_v22 = vpack.c.bf16 %v2850_v18, %v2847_v13  ;;  %v2852_v23 = vpop.f32.mrb[95].mxu0  ;;  %8882 = vmatpush3.bf16.msra.mxu1 %v10384_v11  ;;  %v10412_v13 = vld [vmem:[%s12875_s1 + $0x74c] ss:$16 sps:$4 sm:$0xff]  }
 0x3a0   :  { %8883 = vmatprep.subr.bf16.mxu1 %v10388_v43  ;;  %v10417_v23 = vld [vmem:[%s12875_s1 + $0x76c] ss:$16 sps:$4 sm:$0xff]  }
 0x3a1   :  { %3062 = vmatmul.mubr.bf16.gmra.mrb[200].mxu0 %v10382_v16  ;;  %8868 = vmatmul.mubr.bf16.gmra.mrb[68].mxu1 %v3261_v22 }
 0x3a2   :  { %3069 = vmatprep.mubr.bf16.mxu0 %v10385_v20  ;;  %v10414_v20 = vld [vmem:[%s12875_s1 + $0x748] ss:$16 sps:$4 sm:$0xff]  }
 0x3a3   :  { %8884 = vmatpush3.bf16.msra.mxu1 %v10388_v43 }
 0x3a4   :  { %v2855_v27 = vpop.f32.mrb[96].mxu0  ;;  %8885 = vmatprep.subr.bf16.mxu1 %v10389_v25 }
 0x3a5   :  { %v2857_v52 = vpop.f32.mrb[97].mxu0 }
 0x3a6   :  { %v2858_v29 = vpop.f32.mrb[98].mxu0 }
 0x3a7   :  { %v3262_v56 = vpack.c.bf16 %v2858_v29, %v2855_v27  ;;  %v2860_v59 = vpop.f32.mrb[99].mxu0  ;;  %8886 = vmatpush3.bf16.msra.mxu1 %v10389_v25 }
 0x3a8   :  { %8903 = vmatprep.subr.bf16.mxu1 %v10405_v49 }
 0x3a9   :  { %3070 = vmatmul.mubr.bf16.gmra.mrb[204].mxu0 %v10387_v54  ;;  %8887 = vmatprep.mubr.bf16.mxu1 %v3262_v56  ;;  %v10419_v54 = vld [vmem:[%s12875_s1 + $0x768] ss:$16 sps:$4 sm:$0xff]  }
 0x3aa   :  { %3077 = vmatprep.mubr.bf16.mxu0 %v10390_v30  ;;  %v10422_v30 = vld [vmem:[%s12875_s1 + $0x78c] ss:$16 sps:$4 sm:$0xff]  }
 0x3ac   :  { %v2863_v61 = vpop.f32.mrb[100].mxu0 }
 0x3ad   :  { %v2865_v63 = vpop.f32.mrb[101].mxu0 }
 0x3ae   :  { %v2866_v5 = vpop.f32.mrb[102].mxu0 }
 0x3af   :  { %v3263_v34 = vpack.c.bf16 %v2866_v5, %v2863_v61  ;;  %v2868_v36 = vpop.f32.mrb[103].mxu0  ;;  %v11853_v61 = vpop.f32.mrb[0].mxu1 }
 0x3b0   :  { %v2520_v63 = vpop.f32.mrb[1].mxu1 }
 0x3b1   :  { %3078 = vmatmul.mubr.bf16.gmra.mrb[208].mxu0 %v10392_v3  ;;  %8888 = vmatmul.mubr.bf16.vlgmr.msra.gmra.mrb[56].mxu1 %v3263_v34  ;;  %v11855_v5 = vpop.f32.mrb[2].mxu1  ;;  %v10424_v34 = vld [vmem:[%s12875_s1 + $0x788] ss:$16 sps:$4 sm:$0xff]  }
 0x3b2   :  { %3085 = vmatprep.mubr.bf16.mxu0 %v10393_v32  ;;  %8904 = vmatpush3.bf16.msra.mxu1 %v10405_v49  ;;  %v2523_v36 = vpop.f32.mrb[3].mxu1 }
 0x3b3   :  { %8905 = vmatprep.subr.bf16.mxu1 %v10406_v7  ;;  %v10439_v36 = vld [vmem:[%s12875_s1 + $0x828] ss:$16 sps:$4 sm:$0xff]  }
 0x3b4   :  { %v2871_v12 = vpop.f32.mrb[104].mxu0 }
 0x3b5   :  { %v2873_v14 = vpop.f32.mrb[105].mxu0 }
 0x3b6   :  { %v2874_v19 = vpop.f32.mrb[106].mxu0  ;;  %8906 = vmatpush3.bf16.msra.mxu1 %v10406_v7 }
 0x3b7   :  { %v3264_v39 = vpack.c.bf16 %v2874_v19, %v2871_v12  ;;  %v2876_v41 = vpop.f32.mrb[107].mxu0  ;;  %8907 = vmatprep.subr.bf16.mxu1 %v10410_v10  ;;  %v11866_v19 = vpop.f32.mrb[4].mxu1 }
 0x3b9   :  { %3086 = vmatmul.mubr.bf16.gmra.mrb[212].mxu0 %v10395_v17  ;;  %8891 = vmatprep.mubr.bf16.mxu1 %v3264_v39  ;;  %v10438_v17 = vld [vmem:[%s12876_s2 + $0x148] sm:$0xff]   ;;  %v10442_v39 = vld [vmem:[%s12876_s2 + $0x150] sm:$0xff]  }
 0x3ba   :  { %3093 = vmatprep.mubr.bf16.mxu0 %v10396_v37  ;;  %8908 = vmatpush3.bf16.msra.mxu1 %v10410_v10  ;;  %v10425_v10 = vld [vmem:[%s12875_s1 + $0x7ac] ss:$16 sps:$4 sm:$0xff]   ;;  %v2528_v37 = vpop.f32.mrb[5].mxu1 }
 0x3bb   :  { %8909 = vmatprep.subr.bf16.mxu1 %v10411_v21 }
 0x3bc   :  { %v2879_v26 = vpop.f32.mrb[108].mxu0 }
 0x3bd   :  { %v2881_v28 = vpop.f32.mrb[109].mxu0 }
 0x3be   :  { %v2882_v33 = vpop.f32.mrb[110].mxu0  ;;  %8910 = vmatpush3.bf16.msra.mxu1 %v10411_v21  ;;  %v11871_v21 = vpop.f32.mrb[6].mxu1 }
 0x3bf   :  { %v3265_v0 = vpack.c.bf16 %v2882_v33, %v2879_v26  ;;  %v2884_v44 = vpop.f32.mrb[111].mxu0  ;;  %8911 = vmatprep.subr.bf16.mxu1 %v10415_v24  ;;  %v10427_v26 = vld [vmem:[%s12875_s1 + $0x7a8] ss:$16 sps:$4 sm:$0xff]   ;;  %v2531_v28 = vpop.f32.mrb[7].mxu1  ;;  %v10428_v33 = vld [vmem:[%s12875_s1 + $0x7cc] ss:$16 sps:$4 sm:$0xff]  }
 0x3c0   :  { %v10443_v44 = vld [vmem:[%s12876_s2 + $0x158] sm:$0xff]  }
 0x3c1   :  { %3094 = vmatmul.mubr.bf16.gmra.mrb[216].mxu0 %v10398_v31  ;;  %8892 = vmatmul.mubr.bf16.gmra.mrb[60].mxu1 %v3265_v0  ;;  %v10444_v28 = vld [vmem:[%s12875_s1 + $0x848] ss:$16 sps:$4 sm:$0xff]  }
 0x3c2   :  { %3101 = vmatprep.mubr.bf16.mxu0 %v10399_v42  ;;  %8912 = vmatpush3.bf16.msra.mxu1 %v10415_v24 }
 0x3c3   :  { %8913 = vmatprep.subr.bf16.mxu1 %v10416_v35 }
 0x3c4   :  { %v2887_v40 = vpop.f32.mrb[112].mxu0 }
 0x3c5   :  { %v2889_v45 = vpop.f32.mrb[113].mxu0 }
 0x3c6   :  { %v2890_v47 = vpop.f32.mrb[114].mxu0  ;;  %8914 = vmatpush3.bf16.msra.mxu1 %v10416_v35  ;;  %v11882_v35 = vpop.f32.mrb[8].mxu1 }
 0x3c7   :  { %v3266_v50 = vpack.c.bf16 %v2890_v47, %v2887_v40  ;;  %v2892_v51 = vpop.f32.mrb[115].mxu0  ;;  %8915 = vmatprep.subr.bf16.mxu1 %v10420_v38  ;;  %v10447_v40 = vld [vmem:[%s12876_s2 + $0x160] sm:$0xff]  }
 0x3c9   :  { %3102 = vmatmul.mubr.bf16.gmra.mrb[220].mxu0 %v10401_v46  ;;  %8895 = vmatprep.mubr.bf16.mxu1 %v3266_v50 }
 0x3ca   :  { %3109 = vmatprep.mubr.bf16.mxu0 %v10402_v48  ;;  %8916 = vmatpush3.bf16.msra.mxu1 %v10420_v38  ;;  %v2536_v38 = vpop.f32.mrb[9].mxu1  ;;  %v10430_v48 = vld [vmem:[%s12875_s1 + $0x7c8] ss:$16 sps:$4 sm:$0xff]  }
 0x3cb   :  { %8917 = vmatprep.subr.bf16.mxu1 %v10421_v53  ;;  %v11887_v46 = vpop.f32.mrb[10].mxu1 }
 0x3cc   :  { %v2895_v57 = vpop.f32.mrb[116].mxu0  ;;  %v2539_v50 = vpop.f32.mrb[11].mxu1 }
 0x3cd   :  { %v2897_v58 = vpop.f32.mrb[117].mxu0  ;;  %v10449_v50 = vld [vmem:[%s12875_s1 + $0x868] ss:$16 sps:$4 sm:$0xff]  }
 0x3ce   :  { %v2898_v62 = vpop.f32.mrb[118].mxu0  ;;  %8918 = vmatpush3.bf16.msra.mxu1 %v10421_v53  ;;  %v10431_v53 = vld [vmem:[%s12875_s1 + $0x7ec] ss:$16 sps:$4 sm:$0xff]  }
 0x3cf   :  { %v3267_v2 = vpack.c.bf16 %v2898_v62, %v2895_v57  ;;  %v2900_v4 = vpop.f32.mrb[119].mxu0  ;;  %8935 = vmatprep.subr.bf16.mxu1 %v10437_v55  ;;  %v10448_v58 = vld [vmem:[%s12876_s2 + $0x168] sm:$0xff]  }
 0x3d1   :  { %3110 = vmatmul.mubr.bf16.gmra.mrb[224].mxu0 %v10404_v60  ;;  %8896 = vmatmul.mubr.bf16.gmra.mrb[64].mxu1 %v3267_v2  ;;  %v11898_v60 = vpop.f32.mrb[12].mxu1 }
 0x3d2   :  { %3117 = vmatprep.mubr.bf16.mxu0 %v10407_v1  ;;  %v2544_v62 = vpop.f32.mrb[13].mxu1  ;;  %v10452_v1 = vld [vmem:[%s12876_s2 + $0x170] sm:$0xff]  }
 0x3d3   :  { %v11903_v4 = vpop.f32.mrb[14].mxu1 }
 0x3d4   :  { %v2903_v6 = vpop.f32.mrb[120].mxu0 }
 0x3d5   :  { %v2905_v8 = vpop.f32.mrb[121].mxu0 }
 0x3d6   :  { %v2906_v11 = vpop.f32.mrb[122].mxu0  ;;  %v10433_v8 = vld [vmem:[%s12875_s1 + $0x7e8] ss:$16 sps:$4 sm:$0xff]  }
 0x3d7   :  { %v3268_v43 = vpack.c.bf16 %v2906_v11, %v2903_v6  ;;  %v2908_v15 = vpop.f32.mrb[123].mxu0 }
 0x3d9   :  { %3118 = vmatmul.mubr.bf16.gmra.mrb[228].mxu0 %v10409_v9  ;;  %8899 = vmatprep.mubr.bf16.mxu1 %v3268_v43  ;;  %v2547_v9 = vpop.f32.mrb[15].mxu1 }
 0x3da   :  { %3125 = vmatprep.mubr.bf16.mxu0 %v10412_v13  ;;  %v10436_v13 = vld [vmem:[%s12875_s1 + $0x80c] ss:$16 sps:$4 sm:$0xff]   ;;  %v10454_v9 = vld [vmem:[%s12875_s1 + $0x888] ss:$16 sps:$4 sm:$0xff]  }
 0x3dc   :  { %v2911_v16 = vpop.f32.mrb[124].mxu0 }
 0x3dd   :  { %v2913_v18 = vpop.f32.mrb[125].mxu0 }
 0x3de   :  { %v2914_v22 = vpop.f32.mrb[126].mxu0  ;;  %v11914_v18 = vpop.f32.mrb[16].mxu1 }
 0x3df   :  { %v3269_v25 = vpack.c.bf16 %v2914_v22, %v2911_v16  ;;  %v2916_v27 = vpop.f32.mrb[127].mxu0  ;;  %v10453_v16 = vld [vmem:[%s12876_s2 + $0x178] sm:$0xff]   ;;  %v11919_v22 = vld [vmem:[%s12876_s2 + $0x180] sm:$0xff]  }
 0x3e1   :  { %3126 = vmatmul.mubr.bf16.gmra.mrb[232].mxu0 %v10414_v20  ;;  %8900 = vmatmul.mubr.bf16.gmra.mrb[68].mxu1 %v3269_v25  ;;  %v2552_v20 = vpop.f32.mrb[17].mxu1 }
 0x3e2   :  { %3133 = vmatprep.mubr.bf16.mxu0 %v10417_v23  ;;  %v11921_v25 = vpop.f32.mrb[18].mxu1  ;;  %v10467_v20 = vld [vmem:[%s12876_s2 + $0x188] sm:$0xff]  }
 0x3e4   :  { %v2919_v49 = vpop.f32.mrb[128].mxu0 }
 0x3e5   :  { %v2921_v52 = vpop.f32.mrb[129].mxu0 }
 0x3e6   :  { %v2922_v29 = vpop.f32.mrb[130].mxu0  ;;  %v2555_v52 = vpop.f32.mrb[19].mxu1 }
 0x3e7   :  { %v3270_v56 = vpack.c.bf16 %v2922_v29, %v2919_v49  ;;  %v2924_v59 = vpop.f32.mrb[131].mxu0  ;;  %v10434_v49 = vld [vmem:[%s12875_s1 + $0x808] ss:$16 sps:$4 sm:$0xff]   ;;  %v10441_v29 = vld [vmem:[%s12875_s1 + $0x82c] ss:$16 sps:$4 sm:$0xff]  }
 0x3e8   :  { %v11930_v59 = vpop.f32.mrb[20].mxu1 }
 0x3e9   :  { %3134 = vmatmul.mubr.bf16.gmra.mrb[236].mxu0 %v10419_v54  ;;  %8919 = vmatprep.mubr.bf16.mxu1 %v3270_v56  ;;  %v2560_v63 = vpop.f32.mrb[21].mxu1 }
 0x3ea   :  { %3141 = vmatprep.mubr.bf16.mxu0 %v10422_v30  ;;  %v10462_v63 = vld [vmem:[%s12875_s1 + $0x8cc] ss:$16 sps:$4 sm:$0xff]  }
 0x3ec   :  { %v2927_v3 = vpop.f32.mrb[132].mxu0 }
 0x3ed   :  { %v2929_v32 = vpop.f32.mrb[133].mxu0 }
 0x3ee   :  { %v2930_v7 = vpop.f32.mrb[134].mxu0  ;;  %v11932_v32 = vpop.f32.mrb[22].mxu1 }
 0x3ef   :  { %v3271_v12 = vpack.c.bf16 %v2930_v7, %v2927_v3  ;;  %v2932_v14 = vpop.f32.mrb[135].mxu0  ;;  %v2563_v7 = vpop.f32.mrb[23].mxu1 }
 0x3f0   :  { %v11940_v37 = vpop.f32.mrb[24].mxu1 }
 0x3f1   :  { %3142 = vmatmul.mubr.bf16.gmra.mrb[240].mxu0 %v10424_v34  ;;  %8920 = vmatmul.mubr.bf16.vlgmr.msra.gmra.mrb[56].mxu1 %v3271_v12  ;;  %v10446_v12 = vld [vmem:[%s12875_s1 + $0x84c] ss:$16 sps:$4 sm:$0xff]  }
 0x3f2   :  { %3149 = vmatprep.mubr.bf16.mxu0 %v10425_v10  ;;  %8936 = vmatpush3.bf16.msra.mxu1 %v10437_v55 }
 0x3f3   :  { %8937 = vmatprep.subr.bf16.mxu1 %v10438_v17 }
 0x3f4   :  { %v2935_v41 = vpop.f32.mrb[136].mxu0 }
 0x3f5   :  { %v2937_v24 = vpop.f32.mrb[137].mxu0 }
 0x3f6   :  { %v2938_v31 = vpop.f32.mrb[138].mxu0  ;;  %8938 = vmatpush3.bf16.msra.mxu1 %v10438_v17 }
 0x3f7   :  { %v3272_v42 = vpack.c.bf16 %v2938_v31, %v2935_v41  ;;  %v2940_v0 = vpop.f32.mrb[139].mxu0  ;;  %8939 = vmatprep.subr.bf16.mxu1 %v10442_v39 }
 0x3f9   :  { %3150 = vmatmul.mubr.bf16.gmra.mrb[244].mxu0 %v10427_v26  ;;  %8923 = vmatprep.mubr.bf16.mxu1 %v3272_v42  ;;  %v10451_v42 = vld [vmem:[%s12875_s1 + $0x86c] ss:$16 sps:$4 sm:$0xff]  }
 0x3fa   :  { %3157 = vmatprep.mubr.bf16.mxu0 %v10428_v33  ;;  %8940 = vmatpush3.bf16.msra.mxu1 %v10442_v39  ;;  %v2568_v39 = vpop.f32.mrb[25].mxu1 }
 0x3fb   :  { %8941 = vmatprep.subr.bf16.mxu1 %v10443_v44  ;;  %v11942_v24 = vpop.f32.mrb[26].mxu1  ;;  %v10460_v39 = vld [vmem:[%s12875_s1 + $0x8c8] ss:$16 sps:$4 sm:$0xff]  }
 0x3fc   :  { %v2943_v45 = vpop.f32.mrb[140].mxu0  ;;  %v2571_v31 = vpop.f32.mrb[27].mxu1 }
 0x3fd   :  { %v2945_v47 = vpop.f32.mrb[141].mxu0  ;;  %v11950_v38 = vpop.f32.mrb[28].mxu1 }
 0x3fe   :  { %v2946_v51 = vpop.f32.mrb[142].mxu0  ;;  %8942 = vmatpush3.bf16.msra.mxu1 %v10443_v44 }
 0x3ff   :  { %v3273_v55 = vpack.c.bf16 %v2946_v51, %v2943_v45  ;;  %v2948_v57 = vpop.f32.mrb[143].mxu0  ;;  %8943 = vmatprep.subr.bf16.mxu1 %v10447_v40 }
 0x401   :  { %3158 = vmatmul.mubr.bf16.gmra.mrb[248].mxu0 %v10430_v48  ;;  %8924 = vmatmul.mubr.bf16.gmra.mrb[60].mxu1 %v3273_v55  ;;  %v10456_v55 = vld [vmem:[%s12875_s1 + $0x88c] ss:$16 sps:$4 sm:$0xff]  }
 0x402   :  { %3165 = vmatprep.mubr.bf16.mxu0 %v10431_v53  ;;  %8944 = vmatpush3.bf16.msra.mxu1 %v10447_v40  ;;  %v2576_v40 = vpop.f32.mrb[29].mxu1 }
 0x403   :  { %8945 = vmatprep.subr.bf16.mxu1 %v10448_v58  ;;  %v11952_v47 = vpop.f32.mrb[30].mxu1 }
 0x404   :  { %v2951_v2 = vpop.f32.mrb[144].mxu0  ;;  %v2579_v51 = vpop.f32.mrb[31].mxu1 }
 0x405   :  { %v2953_v6 = vpop.f32.mrb[145].mxu0  ;;  %v11960_v62 = vpop.f32.mrb[32].mxu1  ;;  %v10463_v51 = vld [vmem:[%s12875_s1 + $0x8e8] ss:$16 sps:$4 sm:$0xff]  }
 0x406   :  { %v2954_v11 = vpop.f32.mrb[146].mxu0  ;;  %8946 = vmatpush3.bf16.msra.mxu1 %v10448_v58 }
 0x407   :  { %v3274_v43 = vpack.c.bf16 %v2954_v11, %v2951_v2  ;;  %v2956_v15 = vpop.f32.mrb[147].mxu0  ;;  %8947 = vmatprep.subr.bf16.mxu1 %v10452_v1 }
 0x409   :  { %3166 = vmatmul.mubr.bf16.gmra.mrb[252].mxu0 %v10433_v8  ;;  %8927 = vmatprep.mubr.bf16.mxu1 %v3274_v43  ;;  %v10459_v43 = vld [vmem:[%s12875_s1 + $0x8ac] ss:$16 sps:$4 sm:$0xff]  }
 0x40a   :  { %3173 = vmatprep.mubr.bf16.mxu0 %v10436_v13  ;;  %8948 = vmatpush3.bf16.msra.mxu1 %v10452_v1  ;;  %v2584_v1 = vpop.f32.mrb[33].mxu1 }
 0x40b   :  { %8949 = vmatprep.subr.bf16.mxu1 %v10453_v16  ;;  %v11962_v6 = vpop.f32.mrb[34].mxu1 }
 0x40c   :  { %v2959_v23 = vpop.f32.mrb[148].mxu0  ;;  %v2587_v11 = vpop.f32.mrb[35].mxu1 }
 0x40d   :  { %v2961_v27 = vpop.f32.mrb[149].mxu0  ;;  %v10474_v11 = vld [vmem:[%s12876_s2 + $0x1c0] sm:$0xff]  }
 0x40e   :  { %v2962_v54 = vpop.f32.mrb[150].mxu0  ;;  %8950 = vmatpush3.bf16.msra.mxu1 %v10453_v16 }
 0x40f   :  { %v3275_v30 = vpack.c.bf16 %v2962_v54, %v2959_v23  ;;  %v2964_v56 = vpop.f32.mrb[151].mxu0  ;;  %8967 = vmatprep.subr.bf16.mxu1 %v11919_v22  ;;  %v11973_v23 = vpop.f32.mrb[36].mxu1 }
 0x410   :  { %v2592_v27 = vpop.f32.mrb[37].mxu1 }
 0x411   :  { %3174 = vmatmul.mubr.bf16.gmra.mrb[0].mxu0 %v10434_v49  ;;  %8928 = vmatmul.mubr.bf16.gmra.mrb[64].mxu1 %v3275_v30  ;;  %v10468_v49 = vld [vmem:[%s12876_s2 + $0x190] sm:$0xff]   ;;  %v11982_v30 = vpop.f32.mrb[38].mxu1 }
 0x412   :  { %3181 = vmatprep.mubr.bf16.mxu0 %v10441_v29  ;;  %v10457_v29 = vld [vmem:[%s12875_s1 + $0x8a8] ss:$16 sps:$4 sm:$0xff]  }
 0x414   :  { %v2967_v3 = vpop.f32.mrb[152].mxu0 }
 0x415   :  { %v2969_v34 = vpop.f32.mrb[153].mxu0 }
 0x416   :  { %v2970_v10 = vpop.f32.mrb[154].mxu0 }
 0x417   :  { %v3276_v14 = vpack.c.bf16 %v2970_v10, %v2967_v3  ;;  %v2972_v17 = vpop.f32.mrb[155].mxu0 }
 0x419   :  { %3182 = vmatmul.mubr.bf16.gmra.mrb[4].mxu0 %v10439_v36  ;;  %8931 = vmatprep.mubr.bf16.mxu1 %v3276_v14  ;;  %v10469_v36 = vld [vmem:[%s12876_s2 + $0x198] sm:$0xff]  }
 0x41a   :  { %3189 = vmatprep.mubr.bf16.mxu0 %v10446_v12  ;;  %v10470_v12 = vld [vmem:[%s12876_s2 + $0x1a0] sm:$0xff]  }
 0x41c   :  { %v2975_v41 = vpop.f32.mrb[156].mxu0 }
 0x41d   :  { %v2977_v26 = vpop.f32.mrb[157].mxu0 }
 0x41e   :  { %v2978_v33 = vpop.f32.mrb[158].mxu0 }
 0x41f   :  { %v3277_v0 = vpack.c.bf16 %v2978_v33, %v2975_v41  ;;  %v2980_v44 = vpop.f32.mrb[159].mxu0 }
 0x421   :  { %3190 = vmatmul.mubr.bf16.gmra.mrb[8].mxu0 %v10444_v28  ;;  %8932 = vmatmul.mubr.bf16.gmra.mrb[68].mxu1 %v3277_v0  ;;  %v10465_v28 = vld [vmem:[%s12875_s1 + $0x8ec] ss:$16 sps:$4 sm:$0xff]  }
 0x422   :  { %3197 = vmatprep.mubr.bf16.mxu0 %v10451_v42  ;;  %v10471_v0 = vld [vmem:[%s12876_s2 + $0x1a8] sm:$0xff]  }
 0x424   :  { %v2983_v45 = vpop.f32.mrb[160].mxu0 }
 0x425   :  { %v2985_v48 = vpop.f32.mrb[161].mxu0 }
 0x426   :  { %v2986_v53 = vpop.f32.mrb[162].mxu0 }
 0x427   :  { %v3278_v57 = vpack.c.bf16 %v2986_v53, %v2983_v45  ;;  %v2988_v58 = vpop.f32.mrb[163].mxu0  ;;  %v10472_v45 = vld [vmem:[%s12876_s2 + $0x1b0] sm:$0xff]  }
 0x429   :  { %3198 = vmatmul.mubr.bf16.gmra.mrb[12].mxu0 %v10449_v50  ;;  %8951 = vmatprep.mubr.bf16.mxu1 %v3278_v57 }
 0x42a   :  { %3205 = vmatprep.mubr.bf16.mxu0 %v10456_v55 }
 0x42c   :  { %v2991_v2 = vpop.f32.mrb[164].mxu0 }
 0x42d   :  { %v2993_v8 = vpop.f32.mrb[165].mxu0 }
 0x42e   :  { %v2994_v13 = vpop.f32.mrb[166].mxu0 }
 0x42f   :  { %v3279_v15 = vpack.c.bf16 %v2994_v13, %v2991_v2  ;;  %v2996_v16 = vpop.f32.mrb[167].mxu0  ;;  %v10473_v2 = vld [vmem:[%s12876_s2 + $0x1b8] sm:$0xff]  }
 0x431   :  { %3206 = vmatmul.mubr.bf16.gmra.mrb[16].mxu0 %v10454_v9  ;;  %8952 = vmatmul.mubr.bf16.vlgmr.msra.gmra.mrb[56].mxu1 %v3279_v15 }
 0x432   :  { %3213 = vmatprep.mubr.bf16.mxu0 %v10459_v43  ;;  %8968 = vmatpush3.bf16.msra.mxu1 %v11919_v22  ;;  %v2595_v22 = vpop.f32.mrb[39].mxu1 }
 0x433   :  { %8969 = vmatprep.subr.bf16.mxu1 %v10467_v20  ;;  %v11990_v7 = vpop.f32.mrb[40].mxu1 }
 0x434   :  { %v2999_v52 = vpop.f32.mrb[168].mxu0  ;;  %v2600_v10 = vpop.f32.mrb[41].mxu1 }
 0x435   :  { %v3001_v54 = vpop.f32.mrb[169].mxu0  ;;  %v11998_v41 = vpop.f32.mrb[42].mxu1 }
 0x436   :  { %v3002_v56 = vpop.f32.mrb[170].mxu0  ;;  %8970 = vmatpush3.bf16.msra.mxu1 %v10467_v20  ;;  %v2603_v31 = vpop.f32.mrb[43].mxu1 }
 0x437   :  { %v3280_v3 = vpack.c.bf16 %v3002_v56, %v2999_v52  ;;  %v3004_v34 = vpop.f32.mrb[171].mxu0  ;;  %8971 = vmatprep.subr.bf16.mxu1 %v10468_v49  ;;  %v12006_v44 = vpop.f32.mrb[44].mxu1 }
 0x438   :  { %v2608_v40 = vpop.f32.mrb[45].mxu1 }
 0x439   :  { %3214 = vmatmul.mubr.bf16.gmra.mrb[20].mxu0 %v10457_v29  ;;  %8955 = vmatprep.mubr.bf16.mxu1 %v3280_v3  ;;  %v12014_v53 = vpop.f32.mrb[46].mxu1 }
 0x43a   :  { %3221 = vmatprep.mubr.bf16.mxu0 %v10462_v63  ;;  %8972 = vmatpush3.bf16.msra.mxu1 %v10468_v49  ;;  %v2611_v57 = vpop.f32.mrb[47].mxu1 }
 0x43b   :  { %8973 = vmatprep.subr.bf16.mxu1 %v10469_v36  ;;  %v12019_v8 = vpop.f32.mrb[48].mxu1 }
 0x43c   :  { %v3007_v14 = vpop.f32.mrb[172].mxu0  ;;  %v2616_v9 = vpop.f32.mrb[49].mxu1 }
 0x43d   :  { %v3009_v17 = vpop.f32.mrb[173].mxu0  ;;  %v12024_v15 = vpop.f32.mrb[50].mxu1 }
 0x43e   :  { %v3010_v26 = vpop.f32.mrb[174].mxu0  ;;  %8974 = vmatpush3.bf16.msra.mxu1 %v10469_v36  ;;  %v2619_v20 = vpop.f32.mrb[51].mxu1 }
 0x43f   :  { %v3281_v33 = vpack.c.bf16 %v3010_v26, %v3007_v14  ;;  %v3012_v42 = vpop.f32.mrb[175].mxu0  ;;  %8975 = vmatprep.subr.bf16.mxu1 %v10470_v12  ;;  %v12026_v52 = vpop.f32.mrb[52].mxu1 }
 0x440   :  { %v2624_v54 = vpop.f32.mrb[53].mxu1 }
 0x441   :  { %3222 = vmatmul.mubr.bf16.gmra.mrb[24].mxu0 %v10460_v39  ;;  %8956 = vmatmul.mubr.bf16.gmra.mrb[60].mxu1 %v3281_v33  ;;  %v12028_v63 = vpop.f32.mrb[54].mxu1  ;;  %v10479_v54 = vld [vmem:[%s12876_s2 + $0x1e8] sm:$0xff]  }
 0x442   :  { %3229 = vmatprep.mubr.bf16.mxu0 %v10465_v28  ;;  %8976 = vmatpush3.bf16.msra.mxu1 %v10470_v12  ;;  %v2627_v3 = vpop.f32.mrb[55].mxu1 }
 0x443   :  { %8977 = vmatprep.subr.bf16.mxu1 %v10471_v0 }
 0x444   :  { %v3015_v48 = vpop.f32.mrb[176].mxu0 }
 0x445   :  { %v3017_v50 = vpop.f32.mrb[177].mxu0 }
 0x446   :  { %v3018_v55 = vpop.f32.mrb[178].mxu0  ;;  %8978 = vmatpush3.bf16.msra.mxu1 %v10471_v0 }
 0x447   :  { %v3282_v58 = vpack.c.bf16 %v3018_v55, %v3015_v48  ;;  %v3020_v1 = vpop.f32.mrb[179].mxu0  ;;  %8979 = vmatprep.subr.bf16.mxu1 %v10472_v45  ;;  %v10476_v55 = vld [vmem:[%s12876_s2 + $0x1d0] sm:$0xff]  }
 0x449   :  { %3230 = vmatmul.mubr.bf16.gmra.mrb[28].mxu0 %v10463_v51  ;;  %8959 = vmatprep.mubr.bf16.mxu1 %v3282_v58  ;;  %v10475_v51 = vld [vmem:[%s12876_s2 + $0x1c8] sm:$0xff]  }
 0x44a   :  { %8980 = vmatpush3.bf16.msra.mxu1 %v10472_v45 }
 0x44b   :  { %8981 = vmatprep.subr.bf16.mxu1 %v10473_v2 }
 0x44c   :  { %v3023_v13 = vpop.f32.mrb[180].mxu0 }
 0x44d   :  { %v3025_v43 = vpop.f32.mrb[181].mxu0 }
 0x44e   :  { %v3026_v16 = vpop.f32.mrb[182].mxu0  ;;  %8982 = vmatpush3.bf16.msra.mxu1 %v10473_v2 }
 0x44f   :  { %v3283_v27 = vpack.c.bf16 %v3026_v16, %v3023_v13  ;;  %v3028_v49 = vpop.f32.mrb[183].mxu0  ;;  %8999 = vmatprep.subr.bf16.mxu1 %v10474_v11  ;;  %v10477_v13 = vld [vmem:[%s12876_s2 + $0x1d8] sm:$0xff]  }
 0x451   :  { %8960 = vmatmul.mubr.bf16.gmra.mrb[64].mxu1 %v3283_v27 }
 0x454   :  { %v3031_v29 = vpop.f32.mrb[184].mxu0 }
 0x455   :  { %v3033_v56 = vpop.f32.mrb[185].mxu0 }
 0x456   :  { %v3034_v22 = vpop.f32.mrb[186].mxu0 }
 0x457   :  { %v3284_v34 = vpack.c.bf16 %v3034_v22, %v3031_v29  ;;  %v3036_v36 = vpop.f32.mrb[187].mxu0  ;;  %v10480_v29 = vld [vmem:[%s12876_s2 + $0x1f0] sm:$0xff]  }
 0x459   :  { %8963 = vmatprep.mubr.bf16.mxu1 %v3284_v34 }
 0x45c   :  { %v3039_v10 = vpop.f32.mrb[188].mxu0 }
 0x45d   :  { %v3041_v12 = vpop.f32.mrb[189].mxu0 }
 0x45e   :  { %v3042_v14 = vpop.f32.mrb[190].mxu0  ;;  %v10482_v12 = vld [vmem:[%s12876_s2 + $0x200] sm:$0xff]  }
 0x45f   :  { %v3285_v17 = vpack.c.bf16 %v3042_v14, %v3039_v10  ;;  %v3044_v39 = vpop.f32.mrb[191].mxu0  ;;  %v10481_v10 = vld [vmem:[%s12876_s2 + $0x1f8] sm:$0xff]  }
 0x461   :  { %8964 = vmatmul.mubr.bf16.gmra.mrb[68].mxu1 %v3285_v17 }
 0x464   :  { %v3047_v26 = vpop.f32.mrb[192].mxu0 }
 0x465   :  { %v3049_v28 = vpop.f32.mrb[193].mxu0 }
 0x466   :  { %v3050_v31 = vpop.f32.mrb[194].mxu0 }
 0x467   :  { %v3286_v33 = vpack.c.bf16 %v3050_v31, %v3047_v26  ;;  %v3052_v42 = vpop.f32.mrb[195].mxu0 }
 0x469   :  { %8983 = vmatprep.mubr.bf16.mxu1 %v3286_v33 }
 0x46c   :  { %v3055_v0 = vpop.f32.mrb[196].mxu0 }
 0x46d   :  { %v3057_v40 = vpop.f32.mrb[197].mxu0 }
 0x46e   :  { %v3058_v45 = vpop.f32.mrb[198].mxu0 }
 0x46f   :  { %v3287_v48 = vpack.c.bf16 %v3058_v45, %v3055_v0  ;;  %v3060_v50 = vpop.f32.mrb[199].mxu0 }
 0x471   :  { %8984 = vmatmul.mubr.bf16.vlgmr.msra.gmra.mrb[56].mxu1 %v3287_v48 }
 0x472   :  { %9000 = vmatpush3.bf16.msra.mxu1 %v10474_v11  ;;  %v10478_v11 = vld [vmem:[%s12876_s2 + $0x1e0] sm:$0xff]  }
 0x473   :  { %9001 = vmatprep.subr.bf16.mxu1 %v10475_v51 }
 0x474   :  { %v3063_v57 = vpop.f32.mrb[200].mxu0 }
 0x475   :  { %v3065_v58 = vpop.f32.mrb[201].mxu0 }
 0x476   :  { %v3066_v1 = vpop.f32.mrb[202].mxu0  ;;  %9002 = vmatpush3.bf16.msra.mxu1 %v10475_v51 }
 0x477   :  { %v3288_v2 = vpack.c.bf16 %v3066_v1, %v3063_v57  ;;  %v3068_v9 = vpop.f32.mrb[203].mxu0  ;;  %9003 = vmatprep.subr.bf16.mxu1 %v10476_v55 }
 0x479   :  { %8987 = vmatprep.mubr.bf16.mxu1 %v3288_v2 }
 0x47a   :  { %9004 = vmatpush3.bf16.msra.mxu1 %v10476_v55 }
 0x47b   :  { %9005 = vmatprep.subr.bf16.mxu1 %v10477_v13 }
 0x47c   :  { %v3071_v43 = vpop.f32.mrb[204].mxu0 }
 0x47d   :  { %v3073_v16 = vpop.f32.mrb[205].mxu0 }
 0x47e   :  { %v3074_v20 = vpop.f32.mrb[206].mxu0  ;;  %9006 = vmatpush3.bf16.msra.mxu1 %v10477_v13 }
 0x47f   :  { %v3289_v27 = vpack.c.bf16 %v3074_v20, %v3071_v43  ;;  %v3076_v49 = vpop.f32.mrb[207].mxu0  ;;  %9007 = vmatprep.subr.bf16.mxu1 %v10478_v11 }
 0x480   :  { %v10484_v49 = vld [vmem:[%s12876_s2 + $0x210] sm:$0xff]  }
 0x481   :  { %8988 = vmatmul.mubr.bf16.gmra.mrb[60].mxu1 %v3289_v27  ;;  %v10483_v27 = vld [vmem:[%s12876_s2 + $0x208] sm:$0xff]  }
 0x482   :  { %9008 = vmatpush3.bf16.msra.mxu1 %v10478_v11 }
 0x483   :  { %9009 = vmatprep.subr.bf16.mxu1 %v10479_v54 }
 0x484   :  { %v3079_v56 = vpop.f32.mrb[208].mxu0 }
 0x485   :  { %v3081_v22 = vpop.f32.mrb[209].mxu0 }
 0x486   :  { %v3082_v3 = vpop.f32.mrb[210].mxu0  ;;  %9010 = vmatpush3.bf16.msra.mxu1 %v10479_v54 }
 0x487   :  { %v3290_v34 = vpack.c.bf16 %v3082_v3, %v3079_v56  ;;  %v3084_v36 = vpop.f32.mrb[211].mxu0  ;;  %9011 = vmatprep.subr.bf16.mxu1 %v10480_v29 }
 0x488   :  { %v10485_v36 = vld [vmem:[%s12876_s2 + $0x218] sm:$0xff]  }
 0x489   :  { %8991 = vmatprep.mubr.bf16.mxu1 %v3290_v34 }
 0x48a   :  { %9012 = vmatpush3.bf16.msra.mxu1 %v10480_v29 }
 0x48b   :  { %9013 = vmatprep.subr.bf16.mxu1 %v10481_v10 }
 0x48c   :  { %v3087_v14 = vpop.f32.mrb[212].mxu0 }
 0x48d   :  { %v3089_v17 = vpop.f32.mrb[213].mxu0 }
 0x48e   :  { %v3090_v39 = vpop.f32.mrb[214].mxu0  ;;  %9014 = vmatpush3.bf16.msra.mxu1 %v10481_v10 }
 0x48f   :  { %v3291_v26 = vpack.c.bf16 %v3090_v39, %v3087_v14  ;;  %v3092_v28 = vpop.f32.mrb[215].mxu0  ;;  %9031 = vmatprep.subr.bf16.mxu1 %v10482_v12 }
 0x490   :  { %v10487_v28 = vld [vmem:[%s12876_s2 + $0x228] sm:$0xff]  }
 0x491   :  { %8992 = vmatmul.mubr.bf16.gmra.mrb[64].mxu1 %v3291_v26 }
 0x494   :  { %v3095_v31 = vpop.f32.mrb[216].mxu0 }
 0x495   :  { %v3097_v33 = vpop.f32.mrb[217].mxu0 }
 0x496   :  { %v3098_v42 = vpop.f32.mrb[218].mxu0  ;;  %v10488_v33 = vld [vmem:[%s12876_s2 + $0x230] sm:$0xff]  }
 0x497   :  { %v3292_v0 = vpack.c.bf16 %v3098_v42, %v3095_v31  ;;  %v3100_v40 = vpop.f32.mrb[219].mxu0 }
 0x499   :  { %8995 = vmatprep.mubr.bf16.mxu1 %v3292_v0 }
 0x49c   :  { %v3103_v45 = vpop.f32.mrb[220].mxu0 }
 0x49d   :  { %v3105_v48 = vpop.f32.mrb[221].mxu0 }
 0x49e   :  { %v3106_v50 = vpop.f32.mrb[222].mxu0  ;;  %v10489_v48 = vld [vmem:[%s12876_s2 + $0x238] sm:$0xff]  }
 0x49f   :  { %v3293_v51 = vpack.c.bf16 %v3106_v50, %v3103_v45  ;;  %v3108_v55 = vpop.f32.mrb[223].mxu0 }
 0x4a1   :  { %8996 = vmatmul.mubr.bf16.gmra.mrb[68].mxu1 %v3293_v51 }
 0x4a4   :  { %v3111_v57 = vpop.f32.mrb[224].mxu0 }
 0x4a5   :  { %v3113_v58 = vpop.f32.mrb[225].mxu0 }
 0x4a6   :  { %v3114_v1 = vpop.f32.mrb[226].mxu0 }
 0x4a7   :  { %v3294_v2 = vpack.c.bf16 %v3114_v1, %v3111_v57  ;;  %v3116_v9 = vpop.f32.mrb[227].mxu0 }
 0x4a9   :  { %9015 = vmatprep.mubr.bf16.mxu1 %v3294_v2 }
 0x4ac   :  { %v3119_v13 = vpop.f32.mrb[228].mxu0 }
 0x4ad   :  { %v3121_v11 = vpop.f32.mrb[229].mxu0 }
 0x4ae   :  { %v3122_v43 = vpop.f32.mrb[230].mxu0 }
 0x4af   :  { %v3295_v16 = vpack.c.bf16 %v3122_v43, %v3119_v13  ;;  %v3124_v20 = vpop.f32.mrb[231].mxu0 }
 0x4b1   :  { %9016 = vmatmul.mubr.bf16.vlgmr.msra.gmra.mrb[56].mxu1 %v3295_v16 }
 0x4b2   :  { %9032 = vmatpush3.bf16.msra.mxu1 %v10482_v12  ;;  %v10486_v12 = vld [vmem:[%s12876_s2 + $0x220] sm:$0xff]  }
 0x4b3   :  { %9033 = vmatprep.subr.bf16.mxu1 %v10483_v27 }
 0x4b4   :  { %v3127_v54 = vpop.f32.mrb[232].mxu0 }
 0x4b5   :  { %v3128_v29 = vadd.f32 %v3127_v54, %v11853_v61  ;;  %v3129_v56 = vpop.f32.mrb[233].mxu0 }
 0x4b6   :  { %v3130_v22 = vpop.f32.mrb[234].mxu0  ;;  %9034 = vmatpush3.bf16.msra.mxu1 %v10483_v27 }
 0x4b7   :  { %v3131_v3 = vadd.f32 %v3130_v22, %v11855_v5  ;;  %v3132_v34 = vpop.f32.mrb[235].mxu0  ;;  %9035 = vmatprep.subr.bf16.mxu1 %v10484_v49 }
 0x4b9   :  { %v3296_v10 = vpack.c.bf16 %v3131_v3, %v3128_v29 }
 0x4ba   :  { %9036 = vmatpush3.bf16.msra.mxu1 %v10484_v49 }
 0x4bb   :  { %9019 = vmatprep.mubr.bf16.mxu1 %v3296_v10  ;;  %9037 = vmatprep.subr.bf16.mxu1 %v10485_v36 }
 0x4bc   :  { %v3135_v61 = vpop.f32.mrb[236].mxu0 }
 0x4bd   :  { %v3136_v14 = vadd.f32 %v3135_v61, %v11866_v19  ;;  %v3137_v17 = vpop.f32.mrb[237].mxu0 }
 0x4be   :  { %v3138_v39 = vpop.f32.mrb[238].mxu0  ;;  %9038 = vmatpush3.bf16.msra.mxu1 %v10485_v36 }
 0x4bf   :  { %v3139_v5 = vadd.f32 %v3138_v39, %v11871_v21  ;;  %v3140_v26 = vpop.f32.mrb[239].mxu0  ;;  %9039 = vmatprep.subr.bf16.mxu1 %v10486_v12 }
 0x4c1   :  { %v3297_v31 = vpack.c.bf16 %v3139_v5, %v3136_v14 }
 0x4c2   :  { %9040 = vmatpush3.bf16.msra.mxu1 %v10486_v12 }
 0x4c3   :  { %9020 = vmatmul.mubr.bf16.gmra.mrb[60].mxu1 %v3297_v31  ;;  %9041 = vmatprep.subr.bf16.mxu1 %v10487_v28 }
 0x4c4   :  { %v3143_v19 = vpop.f32.mrb[240].mxu0 }
 0x4c5   :  { %v3144_v42 = vadd.f32 %v3143_v19, %v11882_v35  ;;  %v3145_v0 = vpop.f32.mrb[241].mxu0 }
 0x4c6   :  { %v3146_v40 = vpop.f32.mrb[242].mxu0  ;;  %9042 = vmatpush3.bf16.msra.mxu1 %v10487_v28 }
 0x4c7   :  { %v3147_v21 = vadd.f32 %v3146_v40, %v11887_v46  ;;  %v3148_v45 = vpop.f32.mrb[243].mxu0  ;;  %9043 = vmatprep.subr.bf16.mxu1 %v10488_v33 }
 0x4c9   :  { %v3298_v50 = vpack.c.bf16 %v3147_v21, %v3144_v42 }
 0x4ca   :  { %9044 = vmatpush3.bf16.msra.mxu1 %v10488_v33 }
 0x4cb   :  { %9023 = vmatprep.mubr.bf16.mxu1 %v3298_v50  ;;  %9045 = vmatprep.subr.bf16.mxu1 %v10489_v48 }
 0x4cc   :  { %v3151_v51 = vpop.f32.mrb[244].mxu0 }
 0x4cd   :  { %v3152_v55 = vadd.f32 %v3151_v51, %v11898_v60  ;;  %v3153_v57 = vpop.f32.mrb[245].mxu0 }
 0x4ce   :  { %v3154_v35 = vpop.f32.mrb[246].mxu0  ;;  %9046 = vmatpush3.bf16.msra.mxu1 %v10489_v48 }
 0x4cf   :  { %v3155_v58 = vadd.f32 %v3154_v35, %v11903_v4  ;;  %v3156_v1 = vpop.f32.mrb[247].mxu0 }
 0x4d1   :  { %v3299_v46 = vpack.c.bf16 %v3155_v58, %v3152_v55 }
 0x4d3   :  { %9024 = vmatmul.mubr.bf16.gmra.mrb[64].mxu1 %v3299_v46 }
 0x4d4   :  { %v3159_v2 = vpop.f32.mrb[248].mxu0 }
 0x4d5   :  { %v3160_v9 = vadd.f32 %v3159_v2, %v11914_v18  ;;  %v3161_v13 = vpop.f32.mrb[249].mxu0 }
 0x4d6   :  { %v3162_v11 = vpop.f32.mrb[250].mxu0 }
 0x4d7   :  { %v3163_v43 = vadd.f32 %v3162_v11, %v11921_v25  ;;  %v3164_v16 = vpop.f32.mrb[251].mxu0 }
 0x4d9   :  { %v3300_v20 = vpack.c.bf16 %v3163_v43, %v3160_v9 }
 0x4db   :  { %9027 = vmatprep.mubr.bf16.mxu1 %v3300_v20 }
 0x4dc   :  { %v3167_v27 = vpop.f32.mrb[252].mxu0 }
 0x4dd   :  { %v3168_v60 = vadd.f32 %v3167_v27, %v11930_v59  ;;  %v3169_v49 = vpop.f32.mrb[253].mxu0 }
 0x4de   :  { %v3170_v54 = vpop.f32.mrb[254].mxu0 }
 0x4df   :  { %v3171_v4 = vadd.f32 %v3170_v54, %v11932_v32  ;;  %v3172_v29 = vpop.f32.mrb[255].mxu0 }
 0x4e1   :  { %v3301_v56 = vpack.c.bf16 %v3171_v4, %v3168_v60 }
 0x4e3   :  { %9028 = vmatmul.mubr.bf16.gmra.mrb[68].mxu1 %v3301_v56 }
 0x4e4   :  { %v3175_v22 = vpop.f32.mrb[0].mxu0 }
 0x4e5   :  { %v3176_v18 = vadd.f32 %v3175_v22, %v11940_v37  ;;  %v3177_v3 = vpop.f32.mrb[1].mxu0 }
 0x4e6   :  { %v3178_v34 = vpop.f32.mrb[2].mxu0 }
 0x4e7   :  { %v3179_v25 = vadd.f32 %v3178_v34, %v11942_v24  ;;  %v3180_v36 = vpop.f32.mrb[3].mxu0 }
 0x4e9   :  { %v3302_v10 = vpack.c.bf16 %v3179_v25, %v3176_v18 }
 0x4eb   :  { %9047 = vmatprep.mubr.bf16.mxu1 %v3302_v10 }
 0x4ec   :  { %v3183_v12 = vpop.f32.mrb[4].mxu0 }
 0x4ed   :  { %v3184_v59 = vadd.f32 %v3183_v12, %v11950_v38  ;;  %v3185_v61 = vpop.f32.mrb[5].mxu0 }
 0x4ee   :  { %v3186_v14 = vpop.f32.mrb[6].mxu0 }
 0x4ef   :  { %v3187_v32 = vadd.f32 %v3186_v14, %v11952_v47  ;;  %v3188_v17 = vpop.f32.mrb[7].mxu0 }
 0x4f1   :  { %v3303_v39 = vpack.c.bf16 %v3187_v32, %v3184_v59 }
 0x4f3   :  { %9048 = vmatmul.mubr.bf16.vlgmr.msra.gmra.mrb[56].mxu1 %v3303_v39 }
 0x4f4   :  { %v3191_v5 = vpop.f32.mrb[8].mxu0 }
 0x4f5   :  { %v3192_v37 = vadd.f32 %v3191_v5, %v11960_v62  ;;  %v3193_v26 = vpop.f32.mrb[9].mxu0 }
 0x4f6   :  { %v3194_v28 = vpop.f32.mrb[10].mxu0 }
 0x4f7   :  { %v3195_v24 = vadd.f32 %v3194_v28, %v11962_v6  ;;  %v3196_v31 = vpop.f32.mrb[11].mxu0 }
 0x4f9   :  { %v3304_v33 = vpack.c.bf16 %v3195_v24, %v3192_v37 }
 0x4fb   :  { %9051 = vmatprep.mubr.bf16.mxu1 %v3304_v33 }
 0x4fc   :  { %v3199_v19 = vpop.f32.mrb[12].mxu0 }
 0x4fd   :  { %v3200_v38 = vadd.f32 %v3199_v19, %v11973_v23  ;;  %v3201_v42 = vpop.f32.mrb[13].mxu0 }
 0x4fe   :  { %v3202_v0 = vpop.f32.mrb[14].mxu0 }
 0x4ff   :  { %v3203_v47 = vadd.f32 %v3202_v0, %v11982_v30  ;;  %v3204_v40 = vpop.f32.mrb[15].mxu0 }
 0x501   :  { %v3305_v21 = vpack.c.bf16 %v3203_v47, %v3200_v38 }
 0x503   :  { %9052 = vmatmul.mubr.bf16.gmra.mrb[60].mxu1 %v3305_v21 }
 0x504   :  { %v3207_v45 = vpop.f32.mrb[16].mxu0 }
 0x505   :  { %v3208_v62 = vadd.f32 %v3207_v45, %v11990_v7  ;;  %v3209_v48 = vpop.f32.mrb[17].mxu0 }
 0x506   :  { %v3210_v50 = vpop.f32.mrb[18].mxu0 }
 0x507   :  { %v3211_v6 = vadd.f32 %v3210_v50, %v11998_v41  ;;  %v3212_v51 = vpop.f32.mrb[19].mxu0 }
 0x509   :  { %v3306_v55 = vpack.c.bf16 %v3211_v6, %v3208_v62 }
 0x50b   :  { %9055 = vmatprep.mubr.bf16.mxu1 %v3306_v55 }
 0x50c   :  { %v3215_v57 = vpop.f32.mrb[20].mxu0 }
 0x50d   :  { %v3216_v23 = vadd.f32 %v3215_v57, %v12006_v44  ;;  %v3217_v35 = vpop.f32.mrb[21].mxu0 }
 0x50e   :  { %v3218_v58 = vpop.f32.mrb[22].mxu0 }
 0x50f   :  { %v3219_v30 = vadd.f32 %v3218_v58, %v12014_v53  ;;  %v3220_v1 = vpop.f32.mrb[23].mxu0 }
 0x511   :  { %v3307_v46 = vpack.c.bf16 %v3219_v30, %v3216_v23 }
 0x513   :  { %9056 = vmatmul.mubr.bf16.gmra.mrb[64].mxu1 %v3307_v46 }
 0x514   :  { %v3223_v2 = vpop.f32.mrb[24].mxu0 }
 0x515   :  { %v3224_v7 = vadd.f32 %v3223_v2, %v12019_v8  ;;  %v3225_v9 = vpop.f32.mrb[25].mxu0  ;;  %v10490_v8 = vld [vmem:[%s12877_s4] sm:$0xff]  }
 0x516   :  { %v3226_v13 = vpop.f32.mrb[26].mxu0 }
 0x517   :  { %v3227_v41 = vadd.f32 %v3226_v13, %v12024_v15  ;;  %v3228_v11 = vpop.f32.mrb[27].mxu0  ;;  %v12109_v15 = vld [vmem:[%s12879_s3] ss:$0 sm:$0xff] }
 0x519   :  { %v3308_v43 = vpack.c.bf16 %v3227_v41, %v3224_v7 }
 0x51b   :  { %9059 = vmatprep.mubr.bf16.mxu1 %v3308_v43 }
 0x51c   :  { %v3231_v16 = vpop.f32.mrb[28].mxu0 }
 0x51d   :  { %v3232_v44 = vadd.f32 %v3231_v16, %v12026_v52  ;;  %v3233_v20 = vpop.f32.mrb[29].mxu0 }
 0x51e   :  { %v3234_v27 = vpop.f32.mrb[30].mxu0 }
 0x51f   :  { %v3235_v53 = vadd.f32 %v3234_v27, %v12028_v63  ;;  %v3236_v60 = vpop.f32.mrb[31].mxu0 }
 0x521   :  { %v3309_v49 = vpack.c.bf16 %v3235_v53, %v3232_v44 }
 0x523   :  { %9060 = vmatmul.mubr.bf16.gmra.mrb[68].mxu1 %v3309_v49 }
 0x524   :  { %9079 = vmatprep.mubr.bf16.mxu1 %v10490_v8 }
 0x5c6   :  { %v9049_v54 = vpop.f32.mrb[56].mxu1 }
 0x5c7   :  { %v4888_v52 = vadd.f32 %v9049_v54, %v12109_v15  ;;  %v4800_v4 = vpop.f32.mrb[57].mxu1 }
 0x5c8   :  { %v4886_v29 = vadd.f32 %v12109_v15, %v4800_v4  ;;  %v9050_v63 = vpop.f32.mrb[58].mxu1 }
 0x5c9   :  { %v4920_v56 = vmul.f32 0.01, %v4888_v52  ;;  %v4889_v22 = vadd.f32 %v9050_v63, %v12109_v15  ;;  %v4803_v18 = vpop.f32.mrb[59].mxu1  ;;  %vm4904_vm0 = vcmp.ge.f32.partialorder %v4888_v52, 0.0 }
 0x5ca   :  { %v4918_v3 = vmul.f32 0.01, %v4886_v29  ;;  %v4887_v34 = vadd.f32 %v12109_v15, %v4803_v18  ;;  %vm4902_vm1 = vcmp.ge.f32.partialorder %v4886_v29, 0.0 }
 0x5cb   :  { %vm4905_vm2 = vcmp.ge.f32.partialorder %v4889_v22, 0.0  ;;  %v4921_v25 = vmul.f32 0.01, %v4889_v22  ;;  %v4936_v10 = vsel %vm4904_vm0, %v4888_v52, %v4920_v56  ;;  %vm10659_vm0 = vmmov 0  }
 0x5cc   :  { %vm4903_vm3 = vcmp.ge.f32.partialorder %v4887_v34, 0.0  ;;  %v4919_v36 = vmul.f32 0.01, %v4887_v34  ;;  %v4934_v59 = vsel %vm4902_vm1, %v4886_v29, %v4918_v3 }
 0x5cd   :  { %v4937_v12 = vsel %vm4905_vm2, %v4889_v22, %v4921_v25  ;;  %v10492_v25 = vld [vmem:[%s12877_s4 + $0x10] sm:$0xff]  }
 0x5ce   :  { %v4935_v61 = vsel %vm4903_vm3, %v4887_v34, %v4919_v36  ;;  %v4951_v14 = vpack.c.bf16 %v4937_v12, %v4936_v10  ;;  %v10500_v34 = vld [vmem:[%s12878_s5 + $0x40] sm:$0xff]   ;;  %v10501_v36 = vld [vmem:[%s12878_s5 + $0x48] sm:$0xff]   ;;  %v10504_v10 = vld [vmem:[%s12878_s5 + $0x50] sm:$0xff]  }
 0x5cf   :  { %v4950_v32 = vpack.c.bf16 %v4935_v61, %v4934_v59  ;;  %v10493_v12 = vld [vmem:[%s12877_s4 + $0x18] sm:$0xff]   ;;  %v10494_v59 = vld [vmem:[%s12877_s4 + $0x20] sm:$0xff]  }
 0x5d0   :  { %v10505_v61 = vld [vmem:[%s12878_s5 + $0x58] sm:$0xff]  }
 0x5d1   :  { %9063 = vmatprep.subr.bf16.mxu1 %v4950_v32 }
 0x5d2   :  { %9064 = vmatpush3.bf16.msra.mxu1 %v4950_v32  ;;  %v10495_v32 = vld [vmem:[%s12877_s4 + $0x28] sm:$0xff]  }
 0x5d3   :  { %9065 = vmatprep.subr.bf16.mxu1 %v4951_v14 }
 0x5d6   :  { %v9053_v17 = vpop.f32.mrb[60].mxu1  ;;  %9066 = vmatpush3.bf16.msra.mxu1 %v4951_v14  ;;  %v10506_v14 = vld [vmem:[%s12878_s5 + $0x60] sm:$0xff]  }
 0x5d7   :  { %v4892_v39 = vadd.f32 %v9053_v17, %v12109_v15  ;;  %v4816_v5 = vpop.f32.mrb[61].mxu1  ;;  %v10496_v17 = vld [vmem:[%s12877_s4 + $0x30] sm:$0xff]  }
 0x5d8   :  { %v4890_v37 = vadd.f32 %v12109_v15, %v4816_v5  ;;  %v9054_v26 = vpop.f32.mrb[62].mxu1  ;;  %v10512_v5 = vld [vmem:[%s12878_s5 + $0x70] sm:$0xff]  }
 0x5d9   :  { %v4924_v28 = vmul.f32 0.01, %v4892_v39  ;;  %v4893_v24 = vadd.f32 %v9054_v26, %v12109_v15  ;;  %v4819_v31 = vpop.f32.mrb[63].mxu1  ;;  %vm4908_vm4 = vcmp.ge.f32.partialorder %v4892_v39, 0.0  ;;  %v10498_v26 = vld [vmem:[%s12877_s4 + $0x40] sm:$0xff]  }
 0x5da   :  { %v4922_v33 = vmul.f32 0.01, %v4890_v37  ;;  %v4891_v19 = vadd.f32 %v12109_v15, %v4819_v31  ;;  %vm4906_vm5 = vcmp.ge.f32.partialorder %v4890_v37, 0.0  ;;  %v10503_v31 = vld [vmem:[%s12877_s4 + $0x58] sm:$0xff]  }
 0x5db   :  { %vm4909_vm6 = vcmp.ge.f32.partialorder %v4893_v24, 0.0  ;;  %v4925_v38 = vmul.f32 0.01, %v4893_v24  ;;  %v4940_v0 = vsel %vm4908_vm4, %v4892_v39, %v4924_v28  ;;  %v10509_v39 = vld [vmem:[%s12878_s5 + $0x68] sm:$0xff]  }
 0x5dc   :  { %vm4907_vm7 = vcmp.ge.f32.partialorder %v4891_v19, 0.0  ;;  %v4923_v42 = vmul.f32 0.01, %v4891_v19  ;;  %v4938_v40 = vsel %vm4906_vm5, %v4890_v37, %v4922_v33  ;;  %v10497_v37 = vld [vmem:[%s12877_s4 + $0x38] sm:$0xff]   ;;  %v10499_v28 = vld [vmem:[%s12877_s4 + $0x48] sm:$0xff]   ;;  %v10507_v33 = vld [vmem:[%s12877_s4 + $0x60] sm:$0xff]  }
 0x5dd   :  { %v4941_v47 = vsel %vm4909_vm6, %v4893_v24, %v4925_v38  ;;  %v10502_v24 = vld [vmem:[%s12877_s4 + $0x50] sm:$0xff]   ;;  %vm6407_vm5 = vcmask 261120  }
 0x5de   :  { %v4939_v21 = vsel %vm4907_vm7, %v4891_v19, %v4923_v42  ;;  %v4953_v45 = vpack.c.bf16 %v4941_v47, %v4940_v0  ;;  %v10508_v19 = vld [vmem:[%s12877_s4 + $0x68] sm:$0xff]   ;;  %v10510_v38 = vld [vmem:[%s12877_s4 + $0x70] sm:$0xff]   ;;  %v10511_v42 = vld [vmem:[%s12877_s4 + $0x78] sm:$0xff]  }
 0x5df   :  { %v4952_v62 = vpack.c.bf16 %v4939_v21, %v4938_v40  ;;  %v10513_v0 = vld [vmem:[%s12877_s4 + $0x80] sm:$0xff]   ;;  %v10514_v47 = vld [vmem:[%s12877_s4 + $0x88] sm:$0xff]   ;;  %v10515_v40 = vld [vmem:[%s12878_s5 + $0x78] sm:$0xff]  }
 0x5e0   :  { %v10516_v21 = vld [vmem:[%s12878_s5] sm:$0xff]  }
 0x5e1   :  { %9067 = vmatprep.subr.bf16.mxu1 %v4952_v62 }
 0x5e2   :  { %9068 = vmatpush3.bf16.msra.mxu1 %v4952_v62 }
 0x5e3   :  { %9069 = vmatprep.subr.bf16.mxu1 %v4953_v45 }
 0x5e6   :  { %v9057_v48 = vpop.f32.mrb[64].mxu1  ;;  %9070 = vmatpush3.bf16.msra.mxu1 %v4953_v45 }
 0x5e7   :  { %v4896_v50 = vadd.f32 %v9057_v48, %v12109_v15  ;;  %v4832_v6 = vpop.f32.mrb[65].mxu1 }
 0x5e8   :  { %v4894_v51 = vadd.f32 %v12109_v15, %v4832_v6  ;;  %v9058_v55 = vpop.f32.mrb[66].mxu1 }
 0x5e9   :  { %v4928_v57 = vmul.f32 0.01, %v4896_v50  ;;  %v4897_v23 = vadd.f32 %v9058_v55, %v12109_v15  ;;  %v4835_v35 = vpop.f32.mrb[67].mxu1  ;;  %vm4912_vm8 = vcmp.ge.f32.partialorder %v4896_v50, 0.0 }
 0x5ea   :  { %v4926_v58 = vmul.f32 0.01, %v4894_v51  ;;  %v4895_v30 = vadd.f32 %v12109_v15, %v4835_v35  ;;  %vm4910_vm9 = vcmp.ge.f32.partialorder %v4894_v51, 0.0 }
 0x5eb   :  { %vm4913_vm10 = vcmp.ge.f32.partialorder %v4897_v23, 0.0  ;;  %v4929_v1 = vmul.f32 0.01, %v4897_v23  ;;  %v4944_v2 = vsel %vm4912_vm8, %v4896_v50, %v4928_v57 }
 0x5ec   :  { %vm4911_vm11 = vcmp.ge.f32.partialorder %v4895_v30, 0.0  ;;  %v4927_v46 = vmul.f32 0.01, %v4895_v30  ;;  %v4942_v9 = vsel %vm4910_vm9, %v4894_v51, %v4926_v58 }
 0x5ed   :  { %v4945_v7 = vsel %vm4913_vm10, %v4897_v23, %v4929_v1  ;;  %v10517_v1 = vld [vmem:[%s12878_s5 + $0x8] sm:$0xff]  }
 0x5ee   :  { %v4943_v13 = vsel %vm4911_vm11, %v4895_v30, %v4927_v46  ;;  %v4955_v41 = vpack.c.bf16 %v4945_v7, %v4944_v2  ;;  %v10518_v2 = vld [vmem:[%s12878_s5 + $0x10] sm:$0xff]  }
 0x5ef   :  { %v4954_v11 = vpack.c.bf16 %v4943_v13, %v4942_v9 }
 0x5f1   :  { %9071 = vmatprep.subr.bf16.mxu1 %v4954_v11 }
 0x5f2   :  { %9072 = vmatpush3.bf16.msra.mxu1 %v4954_v11 }
 0x5f3   :  { %9073 = vmatprep.subr.bf16.mxu1 %v4955_v41 }
 0x5f6   :  { %v9061_v43 = vpop.f32.mrb[68].mxu1  ;;  %9074 = vmatpush3.bf16.msra.mxu1 %v4955_v41 }
 0x5f7   :  { %v4900_v16 = vadd.f32 %v9061_v43, %v12109_v15  ;;  %v4848_v44 = vpop.f32.mrb[69].mxu1  ;;  %v10519_v43 = vld [vmem:[%s12878_s5 + $0x18] sm:$0xff]  }
 0x5f8   :  { %v4898_v20 = vadd.f32 %v12109_v15, %v4848_v44  ;;  %v9062_v27 = vpop.f32.mrb[70].mxu1  ;;  %v10520_v44 = vld [vmem:[%s12878_s5 + $0x20] sm:$0xff]  }
 0x5f9   :  { %v4932_v53 = vmul.f32 0.01, %v4900_v16  ;;  %v4901_v60 = vadd.f32 %v9062_v27, %v12109_v15  ;;  %v4851_v49 = vpop.f32.mrb[71].mxu1  ;;  %vm4916_vm12 = vcmp.ge.f32.partialorder %v4900_v16, 0.0 }
 0x5fa   :  { %v4930_v8 = vmul.f32 0.01, %v4898_v20  ;;  %v4899_v54 = vadd.f32 %v12109_v15, %v4851_v49  ;;  %vm4914_vm13 = vcmp.ge.f32.partialorder %v4898_v20, 0.0  ;;  %v10491_v15 = vld [vmem:[%s12877_s4 + $0x8] sm:$0xff]  }
 0x5fb   :  { %vm4917_vm14 = vcmp.ge.f32.partialorder %v4901_v60, 0.0  ;;  %v4933_v52 = vmul.f32 0.01, %v4901_v60  ;;  %v4948_v29 = vsel %vm4916_vm12, %v4900_v16, %v4932_v53 }
 0x5fc   :  { %vm4915_vm15 = vcmp.ge.f32.partialorder %v4899_v54, 0.0  ;;  %v4931_v4 = vmul.f32 0.01, %v4899_v54  ;;  %v4946_v56 = vsel %vm4914_vm13, %v4898_v20, %v4930_v8  ;;  %v10521_v8 = vld [vmem:[%s12878_s5 + $0x28] sm:$0xff]  }
 0x5fd   :  { %v4949_v63 = vsel %vm4917_vm14, %v4901_v60, %v4933_v52  ;;  %v10522_v52 = vld [vmem:[%s12878_s5 + $0x30] sm:$0xff]  }
 0x5fe   :  { %v4947_v22 = vsel %vm4915_vm15, %v4899_v54, %v4931_v4  ;;  %v4957_v18 = vpack.c.bf16 %v4949_v63, %v4948_v29 }
 0x5ff   :  { %v4956_v3 = vpack.c.bf16 %v4947_v22, %v4946_v56 }
 0x601   :  { %9075 = vmatprep.subr.bf16.mxu1 %v4956_v3 }
 0x602   :  { %9076 = vmatpush3.bf16.msra.mxu1 %v4956_v3 }
 0x603   :  { %9077 = vmatprep.subr.bf16.mxu1 %v4957_v18 }
 0x606   :  { %9078 = vmatpush3.bf16.msra.mxu1 %v4957_v18  ;;  %v10523_v18 = vld [vmem:[%s12878_s5 + $0x38] sm:$0xff]  }
 0x607   :  { %9115 = vmatprep.subr.bf16.mxu1 %v10500_v34 }
 0x609   :  { %9080 = vmatmul.mubr.bf16.vlgmr.msra.gmra.mrb[72].mxu1 %v10491_v15 }
 0x60a   :  { %9083 = vmatprep.mubr.bf16.mxu1 %v10492_v25  ;;  %9116 = vmatpush3.bf16.msra.mxu1 %v10500_v34  ;;  %v10524_v34 = vld [vmem:[%s12878_s5 + $0x80] sm:$0xff]  }
 0x60b   :  { %9117 = vmatprep.subr.bf16.mxu1 %v10501_v36 }
 0x60e   :  { %9118 = vmatpush3.bf16.msra.mxu1 %v10501_v36 }
 0x60f   :  { %9119 = vmatprep.subr.bf16.mxu1 %v10504_v10 }
 0x611   :  { %9084 = vmatmul.mubr.bf16.gmra.mrb[76].mxu1 %v10493_v12 }
 0x612   :  { %9087 = vmatprep.mubr.bf16.mxu1 %v10494_v59  ;;  %9120 = vmatpush3.bf16.msra.mxu1 %v10504_v10  ;;  %v10525_v59 = vld [vmem:[%s12878_s5 + $0x88] sm:$0xff]  }
 0x613   :  { %9121 = vmatprep.subr.bf16.mxu1 %v10505_v61 }
 0x616   :  { %9122 = vmatpush3.bf16.msra.mxu1 %v10505_v61  ;;  %v10526_v61 = vld [vmem:[%s12878_s5 + $0x90] sm:$0xff]  }
 0x617   :  { %9123 = vmatprep.subr.bf16.mxu1 %v10506_v14 }
 0x619   :  { %9088 = vmatmul.mubr.bf16.gmra.mrb[80].mxu1 %v10495_v32  ;;  %v10528_v32 = vld [vmem:[%s12878_s5 + $0xa0] sm:$0xff]  }
 0x61a   :  { %9091 = vmatprep.mubr.bf16.mxu1 %v10496_v17  ;;  %9124 = vmatpush3.bf16.msra.mxu1 %v10506_v14  ;;  %v10527_v14 = vld [vmem:[%s12878_s5 + $0x98] sm:$0xff]   ;;  %v10529_v17 = vld [vmem:[%s12878_s5 + $0xa8] sm:$0xff]  }
 0x61b   :  { %9125 = vmatprep.subr.bf16.mxu1 %v10509_v39 }
 0x61e   :  { %9126 = vmatpush3.bf16.msra.mxu1 %v10509_v39  ;;  %v10530_v39 = vld [vmem:[%s12878_s5 + $0xb0] sm:$0xff]  }
 0x61f   :  { %9127 = vmatprep.subr.bf16.mxu1 %v10512_v5 }
 0x621   :  { %9092 = vmatmul.mubr.bf16.gmra.mrb[84].mxu1 %v10497_v37  ;;  %v10531_v37 = vld [vmem:[%s12878_s5 + $0xb8] sm:$0xff]  }
 0x622   :  { %9095 = vmatprep.mubr.bf16.mxu1 %v10498_v26  ;;  %9128 = vmatpush3.bf16.msra.mxu1 %v10512_v5 }
 0x623   :  { %9129 = vmatprep.subr.bf16.mxu1 %v10515_v40 }
 0x626   :  { %9130 = vmatpush3.bf16.msra.mxu1 %v10515_v40 }
 0x627   :  { %9135 = vmatprep.subr.bf16.mxu1 %v10516_v21 }
 0x629   :  { %9096 = vmatmul.mubr.bf16.gmra.mrb[88].mxu1 %v10499_v28 }
 0x62a   :  { %9099 = vmatprep.mubr.bf16.mxu1 %v10502_v24 }
 0x631   :  { %9100 = vmatmul.mubr.bf16.gmra.mrb[92].mxu1 %v10503_v31 }
 0x632   :  { %9103 = vmatprep.mubr.bf16.mxu1 %v10507_v33  ;;  %v10532_v33 = vld [vmem:[%s12878_s5 + $0xc0] sm:$0xff]  }
 0x639   :  { %9104 = vmatmul.mubr.bf16.gmra.mrb[96].mxu1 %v10508_v19 }
 0x63a   :  { %9107 = vmatprep.mubr.bf16.mxu1 %v10510_v38  ;;  %v10533_v38 = vld [vmem:[%s12878_s5 + $0xc8] sm:$0xff]  }
 0x641   :  { %9108 = vmatmul.mubr.bf16.gmra.mrb[100].mxu1 %v10511_v42 }
 0x642   :  { %9111 = vmatprep.mubr.bf16.mxu1 %v10513_v0 }
 0x649   :  { %9112 = vmatmul.mubr.bf16.gmra.mrb[104].mxu1 %v10514_v47  ;;  %v10534_v47 = vld [vmem:[%s12878_s5 + $0xd0] sm:$0xff]  }
 0x6dc   :  { %v12205_v45 = vpop.f32.mrb[72].mxu1 }
 0x6dd   :  { %v5136_v62 = vpop.f32.mrb[73].mxu1 }
 0x6de   :  { %v9082_v48 = vpop.f32.mrb[74].mxu1 }
 0x6df   :  { %v5280_v50 = vpack.c.bf16 %v9082_v48, %v12205_v45  ;;  %v5139_v6 = vpop.f32.mrb[75].mxu1  ;;  %v10535_v48 = vld [vmem:[%s12878_s5 + $0xd8] sm:$0xff]  }
 0x6e0   :  { %v5279_v51 = vpack.c.bf16 %v5139_v6, %v5136_v62 }
 0x6e4   :  { %v9085_v55 = vpop.f32.mrb[76].mxu1 }
 0x6e5   :  { %v5152_v57 = vpop.f32.mrb[77].mxu1 }
 0x6e6   :  { %v9086_v23 = vpop.f32.mrb[78].mxu1 }
 0x6e7   :  { %v5282_v35 = vpack.c.bf16 %v9086_v23, %v9085_v55  ;;  %v5155_v58 = vpop.f32.mrb[79].mxu1 }
 0x6e8   :  { %v5281_v30 = vpack.c.bf16 %v5155_v58, %v5152_v57  ;;  %v10537_v58 = vld [vmem:[%s12878_s5 + $0xe8] sm:$0xff]  }
 0x6ea   :  { %9131 = vmatprep.mubr.bf16.mxu1 %v5281_v30  ;;  %v10538_v30 = vld [vmem:[%s12878_s5 + $0xf0] sm:$0xff]  }
 0x6eb   :  { %9132 = vmatmul.mubr.bf16.vlgmr.msra.gmra.mrb[108].mxu1 %v5282_v35 }
 0x6ec   :  { %9136 = vmatpush3.bf16.msra.mxu1 %v10516_v21  ;;  %9151 = vmatprep.mubr.bf16.mxu1 %v5279_v51  ;;  %v12211_v46 = vpop.f32.mrb[80].mxu1  ;;  %v10536_v51 = vld [vmem:[%s12878_s5 + $0xe0] sm:$0xff]  }
 0x6ed   :  { %9137 = vmatprep.subr.bf16.mxu1 %v10517_v1  ;;  %v5168_v7 = vpop.f32.mrb[81].mxu1 }
 0x6ee   :  { %v12216_v9 = vpop.f32.mrb[82].mxu1 }
 0x6ef   :  { %v5284_v13 = vpack.c.bf16 %v12216_v9, %v12211_v46  ;;  %v5171_v41 = vpop.f32.mrb[83].mxu1  ;;  %v10540_v46 = vld [vmem:[%s12878_s5 + $0x100] sm:$0xff]   ;;  %v10543_v9 = vld [vmem:[%s12878_s5 + $0x118] sm:$0xff]  }
 0x6f0   :  { %9138 = vmatpush3.bf16.msra.mxu1 %v10517_v1  ;;  %v5283_v11 = vpack.c.bf16 %v5171_v41, %v5168_v7  ;;  %v10539_v1 = vld [vmem:[%s12878_s5 + $0xf8] sm:$0xff]   ;;  %v10542_v7 = vld [vmem:[%s12878_s5 + $0x110] sm:$0xff]   ;;  %v10545_v41 = vld [vmem:[%s12878_s5 + $0x128] sm:$0xff]  }
 0x6f1   :  { %9139 = vmatprep.subr.bf16.mxu1 %v10518_v2 }
 0x6f4   :  { %9140 = vmatpush3.bf16.msra.mxu1 %v10518_v2  ;;  %v12223_v16 = vpop.f32.mrb[84].mxu1  ;;  %v10541_v2 = vld [vmem:[%s12878_s5 + $0x108] sm:$0xff]  }
 0x6f5   :  { %9141 = vmatprep.subr.bf16.mxu1 %v10519_v43  ;;  %v12228_v20 = vpop.f32.mrb[85].mxu1 }
 0x6f6   :  { %v12230_v27 = vpop.f32.mrb[86].mxu1 }
 0x6f7   :  { %v5286_v53 = vpack.c.bf16 %v12230_v27, %v12223_v16  ;;  %v12234_v60 = vpop.f32.mrb[87].mxu1  ;;  %v10548_v16 = vld [vmem:[%s12878_s5 + $0x140] sm:$0xff]   ;;  %v10551_v27 = vld [vmem:[%s12878_s5 + $0x158] sm:$0xff]  }
 0x6f8   :  { %9142 = vmatpush3.bf16.msra.mxu1 %v10519_v43  ;;  %v5285_v49 = vpack.c.bf16 %v12234_v60, %v12228_v20  ;;  %v10547_v43 = vld [vmem:[%s12878_s5 + $0x138] sm:$0xff]   ;;  %v10550_v20 = vld [vmem:[%s12878_s5 + $0x150] sm:$0xff]   ;;  %v10553_v60 = vld [vmem:[%s12878_s5 + $0x168] sm:$0xff]  }
 0x6f9   :  { %9143 = vmatprep.subr.bf16.mxu1 %v10520_v44 }
 0x6fc   :  { %9144 = vmatpush3.bf16.msra.mxu1 %v10520_v44  ;;  %v12241_v54 = vpop.f32.mrb[88].mxu1  ;;  %v10549_v44 = vld [vmem:[%s12878_s5 + $0x148] sm:$0xff]  }
 0x6fd   :  { %9145 = vmatprep.subr.bf16.mxu1 %v10521_v8  ;;  %v12246_v4 = vpop.f32.mrb[89].mxu1 }
 0x6fe   :  { %v12248_v29 = vpop.f32.mrb[90].mxu1 }
 0x6ff   :  { %v5288_v63 = vpack.c.bf16 %v12248_v29, %v12241_v54  ;;  %v12252_v56 = vpop.f32.mrb[91].mxu1  ;;  %v10556_v54 = vld [vmem:[%s12878_s5 + $0x180] sm:$0xff]   ;;  %v10559_v29 = vld [vmem:[%s12878_s5 + $0x198] sm:$0xff]  }
 0x700   :  { %9146 = vmatpush3.bf16.msra.mxu1 %v10521_v8  ;;  %v5287_v22 = vpack.c.bf16 %v12252_v56, %v12246_v4  ;;  %v10555_v8 = vld [vmem:[%s12878_s5 + $0x178] sm:$0xff]   ;;  %v10558_v4 = vld [vmem:[%s12878_s5 + $0x190] sm:$0xff]   ;;  %v10561_v56 = vld [vmem:[%s12878_s5 + $0x1a8] sm:$0xff]  }
 0x701   :  { %9147 = vmatprep.subr.bf16.mxu1 %v10522_v52 }
 0x704   :  { %9148 = vmatpush3.bf16.msra.mxu1 %v10522_v52  ;;  %v12259_v3 = vpop.f32.mrb[92].mxu1  ;;  %v10557_v52 = vld [vmem:[%s12878_s5 + $0x188] sm:$0xff]  }
 0x705   :  { %9149 = vmatprep.subr.bf16.mxu1 %v10523_v18  ;;  %v12264_v15 = vpop.f32.mrb[93].mxu1 }
 0x706   :  { %v12266_v25 = vpop.f32.mrb[94].mxu1 }
 0x707   :  { %v5290_v36 = vpack.c.bf16 %v12266_v25, %v12259_v3  ;;  %v12270_v10 = vpop.f32.mrb[95].mxu1  ;;  %v10564_v3 = vld [vmem:[%s12878_s5 + $0x1c0] sm:$0xff]   ;;  %v10567_v25 = vld [vmem:[%s12878_s5 + $0x1d8] sm:$0xff]  }
 0x708   :  { %9150 = vmatpush3.bf16.msra.mxu1 %v10523_v18  ;;  %v5289_v12 = vpack.c.bf16 %v12270_v10, %v12264_v15  ;;  %v10563_v18 = vld [vmem:[%s12878_s5 + $0x1b8] sm:$0xff]   ;;  %v10566_v15 = vld [vmem:[%s12878_s5 + $0x1d0] sm:$0xff]   ;;  %v10569_v10 = vld [vmem:[%s12878_s5 + $0x1e8] sm:$0xff]  }
 0x709   :  { %9155 = vmatprep.subr.bf16.mxu1 %v10524_v34 }
 0x70b   :  { %9152 = vmatmul.mubr.bf16.vlgmr.msra.gmra.mrb[108].mxu1 %v5280_v50 }
 0x70c   :  { %9156 = vmatpush3.bf16.msra.mxu1 %v10524_v34  ;;  %9171 = vmatprep.mubr.bf16.mxu1 %v5283_v11  ;;  %v12292_v5 = vpop.f32.mrb[96].mxu1  ;;  %v10546_v11 = vld [vmem:[%s12878_s5 + $0x130] sm:$0xff]   ;;  %v10565_v34 = vld [vmem:[%s12878_s5 + $0x1c8] sm:$0xff]  }
 0x70d   :  { %9157 = vmatprep.subr.bf16.mxu1 %v10525_v59  ;;  %v12297_v26 = vpop.f32.mrb[97].mxu1 }
 0x70e   :  { %v12299_v28 = vpop.f32.mrb[98].mxu1 }
 0x70f   :  { %v5292_v24 = vpack.c.bf16 %v12299_v28, %v12292_v5  ;;  %v12303_v31 = vpop.f32.mrb[99].mxu1  ;;  %v10577_v5 = vld [vmem:[%s12878_s5 + $0x228] sm:$0xff]   ;;  %v10658_v28 = vmov 0.0  }
 0x710   :  { %9158 = vmatpush3.bf16.msra.mxu1 %v10525_v59  ;;  %v5291_v19 = vpack.c.bf16 %v12303_v31, %v12297_v26  ;;  %v10571_v59 = vld [vmem:[%s12878_s5 + $0x1f8] sm:$0xff]  }
 0x711   :  { %9159 = vmatprep.subr.bf16.mxu1 %v10526_v61  ;;  %v10579_v26 = vld [vmem:[%s12878_s5 + $0x238] sm:$0xff]  }
 0x714   :  { %9160 = vmatpush3.bf16.msra.mxu1 %v10526_v61  ;;  %v12316_v42 = vpop.f32.mrb[100].mxu1  ;;  %v10572_v61 = vld [vmem:[%s12878_s5 + $0x200] sm:$0xff]  }
 0x715   :  { %9161 = vmatprep.subr.bf16.mxu1 %v10527_v14  ;;  %v12318_v0 = vpop.f32.mrb[101].mxu1 }
 0x716   :  { %v12323_v40 = vpop.f32.mrb[102].mxu1 }
 0x717   :  { %v5294_v21 = vpack.c.bf16 %v12323_v40, %v12316_v42  ;;  %v12327_v45 = vpop.f32.mrb[103].mxu1 }
 0x718   :  { %9162 = vmatpush3.bf16.msra.mxu1 %v10527_v14  ;;  %v5293_v62 = vpack.c.bf16 %v12327_v45, %v12318_v0  ;;  %v10573_v14 = vld [vmem:[%s12878_s5 + $0x208] sm:$0xff]  }
 0x719   :  { %9163 = vmatprep.subr.bf16.mxu1 %v10528_v32 }
 0x71c   :  { %9164 = vmatpush3.bf16.msra.mxu1 %v10528_v32  ;;  %v12334_v50 = vpop.f32.mrb[104].mxu1  ;;  %v10574_v32 = vld [vmem:[%s12878_s5 + $0x210] sm:$0xff]  }
 0x71d   :  { %9165 = vmatprep.subr.bf16.mxu1 %v10529_v17  ;;  %v12336_v6 = vpop.f32.mrb[105].mxu1 }
 0x71e   :  { %v12341_v55 = vpop.f32.mrb[106].mxu1 }
 0x71f   :  { %v5296_v57 = vpack.c.bf16 %v12341_v55, %v12334_v50  ;;  %v12345_v23 = vpop.f32.mrb[107].mxu1 }
 0x720   :  { %9166 = vmatpush3.bf16.msra.mxu1 %v10529_v17  ;;  %v5295_v35 = vpack.c.bf16 %v12345_v23, %v12336_v6  ;;  %v10575_v17 = vld [vmem:[%s12878_s5 + $0x218] sm:$0xff]  }
 0x721   :  { %9167 = vmatprep.subr.bf16.mxu1 %v10530_v39 }
 0x724   :  { %9168 = vmatpush3.bf16.msra.mxu1 %v10530_v39  ;;  %v10576_v39 = vld [vmem:[%s12878_s5 + $0x220] sm:$0xff]  }
 0x725   :  { %9169 = vmatprep.subr.bf16.mxu1 %v10531_v37 }
 0x728   :  { %9170 = vmatpush3.bf16.msra.mxu1 %v10531_v37  ;;  %v10578_v37 = vld [vmem:[%s12878_s5 + $0x230] sm:$0xff]  }
 0x729   :  { %9175 = vmatprep.subr.bf16.mxu1 %v10532_v33 }
 0x72b   :  { %9172 = vmatmul.mubr.bf16.vlgmr.msra.gmra.mrb[108].mxu1 %v5284_v13  ;;  %v10544_v13 = vld [vmem:[%s12878_s5 + $0x120] sm:$0xff]  }
 0x72c   :  { %9176 = vmatpush3.bf16.msra.mxu1 %v10532_v33  ;;  %9191 = vmatprep.mubr.bf16.mxu1 %v5285_v49  ;;  %v10554_v49 = vld [vmem:[%s12878_s5 + $0x170] sm:$0xff]  }
 0x72d   :  { %9177 = vmatprep.subr.bf16.mxu1 %v10533_v38 }
 0x730   :  { %9178 = vmatpush3.bf16.msra.mxu1 %v10533_v38 }
 0x731   :  { %9179 = vmatprep.subr.bf16.mxu1 %v10534_v47 }
 0x734   :  { %9180 = vmatpush3.bf16.msra.mxu1 %v10534_v47 }
 0x735   :  { %9181 = vmatprep.subr.bf16.mxu1 %v10535_v48 }
 0x738   :  { %9182 = vmatpush3.bf16.msra.mxu1 %v10535_v48 }
 0x739   :  { %9183 = vmatprep.subr.bf16.mxu1 %v10536_v51 }
 0x73c   :  { %9184 = vmatpush3.bf16.msra.mxu1 %v10536_v51 }
 0x73d   :  { %9185 = vmatprep.subr.bf16.mxu1 %v10537_v58 }
 0x740   :  { %9186 = vmatpush3.bf16.msra.mxu1 %v10537_v58  ;;  %v10583_v58 = vld [vmem:[%s12881_s8 + $0x40] sm:$0xff]  }
 0x741   :  { %9187 = vmatprep.subr.bf16.mxu1 %v10538_v30 }
 0x744   :  { %9188 = vmatpush3.bf16.msra.mxu1 %v10538_v30  ;;  %v10584_v30 = vld [vmem:[%s12881_s8 + $0x48] sm:$0xff]  }
 0x745   :  { %9189 = vmatprep.subr.bf16.mxu1 %v10539_v1 }
 0x748   :  { %9190 = vmatpush3.bf16.msra.mxu1 %v10539_v1  ;;  %v10581_v1 = vld [vmem:[%s12880_s7 + $0x8] sm:$0xff]  }
 0x749   :  { %9195 = vmatprep.subr.bf16.mxu1 %v10540_v46 }
 0x74b   :  { %9192 = vmatmul.mubr.bf16.vlgmr.msra.gmra.mrb[108].mxu1 %v5286_v53  ;;  %v10552_v53 = vld [vmem:[%s12878_s5 + $0x160] sm:$0xff]  }
 0x74c   :  { %9196 = vmatpush3.bf16.msra.mxu1 %v10540_v46  ;;  %9211 = vmatprep.mubr.bf16.mxu1 %v5287_v22  ;;  %v10562_v22 = vld [vmem:[%s12878_s5 + $0x1b0] sm:$0xff]  }
 0x74d   :  { %9197 = vmatprep.subr.bf16.mxu1 %v10541_v2  ;;  %v10585_v46 = vld [vmem:[%s12881_s8 + $0x50] sm:$0xff]  }
 0x750   :  { %9198 = vmatpush3.bf16.msra.mxu1 %v10541_v2  ;;  %v10587_v2 = vld [vmem:[%s12881_s8 + $0x58] sm:$0xff]  }
 0x751   :  { %9199 = vmatprep.subr.bf16.mxu1 %v10542_v7 }
 0x754   :  { %9200 = vmatpush3.bf16.msra.mxu1 %v10542_v7  ;;  %v10582_v7 = vld [vmem:[%s12880_s7 + $0x10] sm:$0xff]  }
 0x755   :  { %9201 = vmatprep.subr.bf16.mxu1 %v10543_v9 }
 0x758   :  { %9202 = vmatpush3.bf16.msra.mxu1 %v10543_v9  ;;  %v10588_v9 = vld [vmem:[%s12881_s8 + $0x60] sm:$0xff]  }
 0x759   :  { %9203 = vmatprep.subr.bf16.mxu1 %v10544_v13 }
 0x75c   :  { %9204 = vmatpush3.bf16.msra.mxu1 %v10544_v13  ;;  %v10589_v13 = vld [vmem:[%s12881_s8 + $0x68] sm:$0xff]  }
 0x75d   :  { %9205 = vmatprep.subr.bf16.mxu1 %v10545_v41 }
 0x760   :  { %9206 = vmatpush3.bf16.msra.mxu1 %v10545_v41  ;;  %v10586_v41 = vld [vmem:[%s12880_s7 + $0x18] sm:$0xff]  }
 0x761   :  { %9207 = vmatprep.subr.bf16.mxu1 %v10546_v11 }
 0x764   :  { %9208 = vmatpush3.bf16.msra.mxu1 %v10546_v11  ;;  %v10591_v11 = vld [vmem:[%s12881_s8 + $0x70] sm:$0xff]  }
 0x765   :  { %9209 = vmatprep.subr.bf16.mxu1 %v10547_v43 }
 0x768   :  { %9210 = vmatpush3.bf16.msra.mxu1 %v10547_v43  ;;  %v10590_v43 = vld [vmem:[%s12880_s7 + $0x20] ss:$0 sps:$4 sm:$0xff]  }
 0x769   :  { %9215 = vmatprep.subr.bf16.mxu1 %v10548_v16 }
 0x76b   :  { %9212 = vmatmul.mubr.bf16.vlgmr.msra.gmra.mrb[108].mxu1 %v5288_v63  ;;  %v10560_v63 = vld [vmem:[%s12878_s5 + $0x1a0] sm:$0xff]  }
 0x76c   :  { %9216 = vmatpush3.bf16.msra.mxu1 %v10548_v16  ;;  %9231 = vmatprep.mubr.bf16.mxu1 %v5289_v12  ;;  %v10570_v12 = vld [vmem:[%s12878_s5 + $0x1f0] sm:$0xff]   ;;  %v10592_v16 = vld [vmem:[%s12881_s8 + $0x78] sm:$0xff]  }
 0x76d   :  { %9217 = vmatprep.subr.bf16.mxu1 %v10549_v44 }
 0x770   :  { %9218 = vmatpush3.bf16.msra.mxu1 %v10549_v44 }
 0x771   :  { %9219 = vmatprep.subr.bf16.mxu1 %v10550_v20 }
 0x774   :  { %9220 = vmatpush3.bf16.msra.mxu1 %v10550_v20 }
 0x775   :  { %9221 = vmatprep.subr.bf16.mxu1 %v10551_v27 }
 0x778   :  { %9222 = vmatpush3.bf16.msra.mxu1 %v10551_v27 }
 0x779   :  { %9223 = vmatprep.subr.bf16.mxu1 %v10552_v53 }
 0x77c   :  { %9224 = vmatpush3.bf16.msra.mxu1 %v10552_v53 }
 0x77d   :  { %9225 = vmatprep.subr.bf16.mxu1 %v10553_v60 }
 0x780   :  { %9226 = vmatpush3.bf16.msra.mxu1 %v10553_v60 }
 0x781   :  { %9227 = vmatprep.subr.bf16.mxu1 %v10554_v49 }
 0x784   :  { %9228 = vmatpush3.bf16.msra.mxu1 %v10554_v49  ;;  %v10593_v49 = vld [vmem:[%s12881_s8] sm:$0xff]  }
 0x785   :  { %9229 = vmatprep.subr.bf16.mxu1 %v10555_v8 }
 0x788   :  { %9230 = vmatpush3.bf16.msra.mxu1 %v10555_v8 }
 0x789   :  { %9235 = vmatprep.subr.bf16.mxu1 %v10556_v54 }
 0x78b   :  { %9232 = vmatmul.mubr.bf16.vlgmr.msra.gmra.mrb[108].mxu1 %v5290_v36  ;;  %v10568_v36 = vld [vmem:[%s12878_s5 + $0x1e0] sm:$0xff]  }
 0x78c   :  { %9236 = vmatpush3.bf16.msra.mxu1 %v10556_v54  ;;  %9251 = vmatprep.mubr.bf16.mxu1 %v5291_v19  ;;  %v10594_v54 = vld [vmem:[%s12881_s8 + $0x8] sm:$0xff]  }
 0x78d   :  { %9237 = vmatprep.subr.bf16.mxu1 %v10557_v52 }
 0x790   :  { %9238 = vmatpush3.bf16.msra.mxu1 %v10557_v52 }
 0x791   :  { %9239 = vmatprep.subr.bf16.mxu1 %v10558_v4 }
 0x794   :  { %9240 = vmatpush3.bf16.msra.mxu1 %v10558_v4 }
 0x795   :  { %9241 = vmatprep.subr.bf16.mxu1 %v10559_v29 }
 0x798   :  { %9242 = vmatpush3.bf16.msra.mxu1 %v10559_v29 }
 0x799   :  { %9243 = vmatprep.subr.bf16.mxu1 %v10560_v63 }
 0x79c   :  { %9244 = vmatpush3.bf16.msra.mxu1 %v10560_v63 }
 0x79d   :  { %9245 = vmatprep.subr.bf16.mxu1 %v10561_v56 }
 0x7a0   :  { %9246 = vmatpush3.bf16.msra.mxu1 %v10561_v56 }
 0x7a1   :  { %9247 = vmatprep.subr.bf16.mxu1 %v10562_v22 }
 0x7a4   :  { %9248 = vmatpush3.bf16.msra.mxu1 %v10562_v22  ;;  %v10595_v22 = vld [vmem:[%s12881_s8 + $0x10] sm:$0xff]  }
 0x7a5   :  { %9249 = vmatprep.subr.bf16.mxu1 %v10563_v18 }
 0x7a8   :  { %9250 = vmatpush3.bf16.msra.mxu1 %v10563_v18  ;;  %v10596_v18 = vld [vmem:[%s12881_s8 + $0x18] sm:$0xff]  }
 0x7a9   :  { %9255 = vmatprep.subr.bf16.mxu1 %v10564_v3 }
 0x7ab   :  { %9252 = vmatmul.mubr.bf16.vlgmr.msra.gmra.mrb[108].mxu1 %v5292_v24  ;;  %v8215_v24 = vld [vmem:[%s12882_s6] ss:$0 sm:$0xff] }
 0x7ac   :  { %9256 = vmatpush3.bf16.msra.mxu1 %v10564_v3  ;;  %9271 = vmatprep.mubr.bf16.mxu1 %v5293_v62 }
 0x7ad   :  { %9257 = vmatprep.subr.bf16.mxu1 %v10565_v34 }
 0x7b0   :  { %9258 = vmatpush3.bf16.msra.mxu1 %v10565_v34 }
 0x7b1   :  { %9259 = vmatprep.subr.bf16.mxu1 %v10566_v15 }
 0x7b4   :  { %9260 = vmatpush3.bf16.msra.mxu1 %v10566_v15 }
 0x7b5   :  { %9261 = vmatprep.subr.bf16.mxu1 %v10567_v25 }
 0x7b8   :  { %9262 = vmatpush3.bf16.msra.mxu1 %v10567_v25 }
 0x7b9   :  { %9263 = vmatprep.subr.bf16.mxu1 %v10568_v36 }
 0x7bc   :  { %9264 = vmatpush3.bf16.msra.mxu1 %v10568_v36 }
 0x7bd   :  { %9265 = vmatprep.subr.bf16.mxu1 %v10569_v10 }
 0x7c0   :  { %9266 = vmatpush3.bf16.msra.mxu1 %v10569_v10  ;;  %v10597_v10 = vld [vmem:[%s12881_s8 + $0x20] sm:$0xff]  }
 0x7c1   :  { %9267 = vmatprep.subr.bf16.mxu1 %v10570_v12 }
 0x7c4   :  { %9268 = vmatpush3.bf16.msra.mxu1 %v10570_v12  ;;  %v10598_v12 = vld [vmem:[%s12881_s8 + $0x28] sm:$0xff]  }
 0x7c5   :  { %9269 = vmatprep.subr.bf16.mxu1 %v10571_v59 }
 0x7c8   :  { %9270 = vmatpush3.bf16.msra.mxu1 %v10571_v59  ;;  %v10599_v59 = vld [vmem:[%s12881_s8 + $0x30] sm:$0xff]  }
 0x7c9   :  { %9275 = vmatprep.subr.bf16.mxu1 %v10572_v61 }
 0x7cb   :  { %9272 = vmatmul.mubr.bf16.vlgmr.msra.gmra.mrb[108].mxu1 %v5294_v21 }
 0x7cc   :  { %9276 = vmatpush3.bf16.msra.mxu1 %v10572_v61  ;;  %9291 = vmatprep.mubr.bf16.mxu1 %v5295_v35  ;;  %v10580_v35 = vld [vmem:[%s12880_s7] sm:$0xff]   ;;  %v10600_v61 = vld [vmem:[%s12881_s8 + $0x38] sm:$0xff]  }
 0x7cd   :  { %9277 = vmatprep.subr.bf16.mxu1 %v10573_v14 }
 0x7d0   :  { %9278 = vmatpush3.bf16.msra.mxu1 %v10573_v14  ;;  %v10601_v14 = vld [vmem:[%s12881_s8 + $0x80] sm:$0xff]  }
 0x7d1   :  { %9279 = vmatprep.subr.bf16.mxu1 %v10574_v32 }
 0x7d4   :  { %9280 = vmatpush3.bf16.msra.mxu1 %v10574_v32  ;;  %v10602_v32 = vld [vmem:[%s12881_s8 + $0x88] sm:$0xff]  }
 0x7d5   :  { %9281 = vmatprep.subr.bf16.mxu1 %v10575_v17 }
 0x7d8   :  { %9282 = vmatpush3.bf16.msra.mxu1 %v10575_v17  ;;  %v10603_v17 = vld [vmem:[%s12881_s8 + $0x90] sm:$0xff]  }
 0x7d9   :  { %9283 = vmatprep.subr.bf16.mxu1 %v10576_v39 }
 0x7dc   :  { %9284 = vmatpush3.bf16.msra.mxu1 %v10576_v39  ;;  %v10604_v39 = vld [vmem:[%s12881_s8 + $0x98] sm:$0xff]  }
 0x7dd   :  { %9285 = vmatprep.subr.bf16.mxu1 %v10577_v5 }
 0x7e0   :  { %9286 = vmatpush3.bf16.msra.mxu1 %v10577_v5  ;;  %v10605_v5 = vld [vmem:[%s12881_s8 + $0xa0] sm:$0xff]  }
 0x7e1   :  { %9287 = vmatprep.subr.bf16.mxu1 %v10578_v37 }
 0x7e4   :  { %9288 = vmatpush3.bf16.msra.mxu1 %v10578_v37  ;;  %v10606_v37 = vld [vmem:[%s12881_s8 + $0xa8] sm:$0xff]  }
 0x7e5   :  { %9289 = vmatprep.subr.bf16.mxu1 %v10579_v26 }
 0x7e8   :  { %9290 = vmatpush3.bf16.msra.mxu1 %v10579_v26  ;;  %v10607_v26 = vld [vmem:[%s12881_s8 + $0xb0] sm:$0xff]  }
 0x7e9   :  { %9295 = vmatprep.subr.bf16.mxu1 %v10658_v28 }
 0x7eb   :  { %9292 = vmatmul.mubr.bf16.vlgmr.msra.gmra.mrb[108].mxu1 %v5296_v57 }
 0x7ec   :  { %9299 = vmatprep.mubr.msk.bf16.mxu1 %vm10659_vm0, %v10658_v28 }
 0x8be   :  { %v9293_v31 = vpop.f32.mrb[108].mxu1 }
 0x8bf   :  { %v6359_v33 = vadd.f32 %v9293_v31, %v8215_v24  ;;  %v6331_v19 = vpop.f32.mrb[109].mxu1 }
 0x8c0   :  { %v6357_v38 = vadd.f32 %v8215_v24, %v6331_v19  ;;  %v9294_v42 = vpop.f32.mrb[110].mxu1 }
 0x8c1   :  { %v6367_v0 = vmul.f32 0.01, %v6359_v33  ;;  %v6360_v47 = vadd.f32 %v9294_v42, %v8215_v24  ;;  %v6334_v40 = vpop.f32.mrb[111].mxu1  ;;  %vm6363_vm1 = vcmp.ge.f32.partialorder %v6359_v33, 0.0 }
 0x8c2   :  { %v6365_v21 = vmul.f32 0.01, %v6357_v38  ;;  %v6358_v45 = vadd.f32 %v8215_v24, %v6334_v40  ;;  %vm6361_vm2 = vcmp.ge.f32.partialorder %v6357_v38, 0.0  ;;  %v10608_v24 = vld [vmem:[%s12881_s8 + $0xb8] sm:$0xff]   ;;  %v10611_v40 = vld [vmem:[%s12881_s8 + $0xd0] sm:$0xff]  }
 0x8c3   :  { %vm6364_vm3 = vcmp.ge.f32.partialorder %v6360_v47, 0.0  ;;  %v6368_v62 = vmul.f32 0.01, %v6360_v47  ;;  %v6371_v50 = vsel %vm6363_vm1, %v6359_v33, %v6367_v0  ;;  %v10609_v0 = vld [vmem:[%s12881_s8 + $0xc0] sm:$0xff]  }
 0x8c4   :  { %vm6362_vm4 = vcmp.ge.f32.partialorder %v6358_v45, 0.0  ;;  %v6366_v48 = vmul.f32 0.01, %v6358_v45  ;;  %v6369_v51 = vsel %vm6361_vm2, %v6357_v38, %v6365_v21  ;;  %v10612_v21 = vld [vmem:[%s12881_s8 + $0xd8] sm:$0xff]  }
 0x8c5   :  { %v6372_v6 = vsel %vm6364_vm3, %v6360_v47, %v6368_v62  ;;  %v10610_v47 = vld [vmem:[%s12881_s8 + $0xc8] sm:$0xff]  }
 0x8c6   :  { %v6374_v55 = vpack.c.bf16 %v6372_v6, %v6371_v50  ;;  %v6370_v57 = vsel %vm6362_vm4, %v6358_v45, %v6366_v48  ;;  %v10613_v6 = vld [vmem:[%s12881_s8 + $0xe0] sm:$0xff]  }
 0x8c7   :  { %v6373_v23 = vpack.c.bf16 %v6370_v57, %v6369_v51  ;;  %v10614_v51 = vld [vmem:[%s12881_s8 + $0xe8] sm:$0xff]   ;;  %v10616_v57 = vld [vmem:[%s12881_s8 + $0xf8] sm:$0xff]  }
 0x8c9   :  { %9296 = vmatpush3.bf16.msra.mxu1 %v6373_v23  ;;  %v10617_v23 = vld [vmem:[%s12881_s8 + $0x100] sm:$0xff]  }
 0x8ca   :  { %9297 = vmatprep.subr.bf16.mxu1 %v10658_v28 }
 0x8cd   :  { %9298 = vmatpush3.bf16.msra.mxu1 %v6374_v55  ;;  %v10615_v55 = vld [vmem:[%s12881_s8 + $0xf0] sm:$0xff]  }
 0x8ce   :  { %9319 = vmatprep.subr.bf16.mxu1 %v10658_v28 }
 0x8d0   :  { %9300 = vmatmul.mubr.msk.bf16.vlgmr.msra.gmra.mrb[112].mxu1 %vm6407_vm5, %v10580_v35 }
 0x8d1   :  { %9303 = vmatprep.mubr.msk.bf16.mxu1 %vm10659_vm0, %v10658_v28  ;;  %9320 = vmatpush3.bf16.msra.mxu1 %v10583_v58  ;;  %v10618_v58 = vld [vmem:[%s12881_s8 + $0x108] sm:$0xff]  }
 0x8d2   :  { %9321 = vmatprep.subr.bf16.mxu1 %v10658_v28 }
 0x8d5   :  { %9322 = vmatpush3.bf16.msra.mxu1 %v10584_v30  ;;  %v10619_v30 = vld [vmem:[%s12881_s8 + $0x110] sm:$0xff]  }
 0x8d6   :  { %9323 = vmatprep.subr.bf16.mxu1 %v10658_v28 }
 0x8d8   :  { %9304 = vmatmul.mubr.msk.bf16.gmra.mrb[116].mxu1 %vm6407_vm5, %v10581_v1  ;;  %v10620_v1 = vld [vmem:[%s12881_s8 + $0x118] sm:$0xff]  }
 0x8d9   :  { %9307 = vmatprep.mubr.msk.bf16.mxu1 %vm10659_vm0, %v10658_v28  ;;  %9324 = vmatpush3.bf16.msra.mxu1 %v10585_v46  ;;  %v10621_v46 = vld [vmem:[%s12881_s8 + $0x120] sm:$0xff]  }
 0x8da   :  { %9325 = vmatprep.subr.bf16.mxu1 %v10658_v28 }
 0x8dd   :  { %9326 = vmatpush3.bf16.msra.mxu1 %v10587_v2  ;;  %v10622_v2 = vld [vmem:[%s12881_s8 + $0x128] sm:$0xff]  }
 0x8de   :  { %9327 = vmatprep.subr.bf16.mxu1 %v10658_v28 }
 0x8e0   :  { %9308 = vmatmul.mubr.msk.bf16.gmra.mrb[120].mxu1 %vm6407_vm5, %v10582_v7  ;;  %v10623_v7 = vld [vmem:[%s12881_s8 + $0x130] sm:$0xff]  }
 0x8e1   :  { %9311 = vmatprep.mubr.msk.bf16.mxu1 %vm10659_vm0, %v10658_v28  ;;  %9328 = vmatpush3.bf16.msra.mxu1 %v10588_v9  ;;  %v10624_v9 = vld [vmem:[%s12881_s8 + $0x138] sm:$0xff]  }
 0x8e2   :  { %9329 = vmatprep.subr.bf16.mxu1 %v10658_v28 }
 0x8e5   :  { %9330 = vmatpush3.bf16.msra.mxu1 %v10589_v13  ;;  %v10625_v13 = vld [vmem:[%s12881_s8 + $0x140] sm:$0xff]  }
 0x8e6   :  { %9331 = vmatprep.subr.bf16.mxu1 %v10658_v28 }
 0x8e8   :  { %9312 = vmatmul.mubr.msk.bf16.gmra.mrb[124].mxu1 %vm6407_vm5, %v10586_v41  ;;  %v10626_v41 = vld [vmem:[%s12881_s8 + $0x148] sm:$0xff]  }
 0x8e9   :  { %9315 = vmatprep.mubr.msk.bf16.mxu1 %vm10659_vm0, %v10658_v28  ;;  %9332 = vmatpush3.bf16.msra.mxu1 %v10591_v11  ;;  %v10627_v11 = vld [vmem:[%s12881_s8 + $0x150] sm:$0xff]  }
 0x8ea   :  { %9333 = vmatprep.subr.bf16.mxu1 %v10658_v28 }
 0x8ed   :  { %9334 = vmatpush3.bf16.msra.mxu1 %v10592_v16  ;;  %v10629_v16 = vld [vmem:[%s12881_s8 + $0x160] sm:$0xff]  }
 0x8ee   :  { %9339 = vmatprep.subr.bf16.mxu1 %v10658_v28 }
 0x8f0   :  { %9316 = vmatmul.mubr.msk.bf16.gmra.mrb[128].mxu1 %vm6407_vm5, %v10590_v43  ;;  %v10628_v43 = vld [vmem:[%s12881_s8 + $0x158] sm:$0xff]  }
 0x8f1   :  { %9335 = vmatprep.mubr.msk.bf16.mxu1 %vm10659_vm0, %v10658_v28 }
 0x9a3   :  { %v6457_v44 = vpop.f32.mrb[112].mxu1 }
 0x9a4   :  { %v9301_v20 = vpop.f32.mrb[113].mxu1 }
 0x9a5   :  { %v6460_v27 = vpop.f32.mrb[114].mxu1  ;;  %v10631_v20 = vld [vmem:[%s12881_s8 + $0x170] sm:$0xff]  }
 0x9a6   :  { %v6495_v53 = vpack.c.bf16 %v6460_v27, %v6457_v44  ;;  %v9302_v60 = vpop.f32.mrb[115].mxu1  ;;  %v10630_v44 = vld [vmem:[%s12881_s8 + $0x168] sm:$0xff]   ;;  %v10632_v27 = vld [vmem:[%s12881_s8 + $0x178] sm:$0xff]  }
 0x9a8   :  { %v6534_v8 = vrot.slane %v6495_v53, 4 }
 0x9aa   :  { %9336 = vmatmul.mubr.bf16.vlgmr.msra.gmra.mrb[132].mxu1 %v6534_v8  ;;  %v10635_v8 = vld [vmem:[%s12881_s8 + $0x190] sm:$0xff]  }
 0x9ab   :  { %9340 = vmatpush3.bf16.msra.mxu1 %v10593_v49  ;;  %9355 = vmatprep.mubr.msk.bf16.mxu1 %vm10659_vm0, %v10658_v28  ;;  %v6465_v52 = vpop.f32.mrb[116].mxu1  ;;  %v10634_v49 = vld [vmem:[%s12881_s8 + $0x188] sm:$0xff]  }
 0x9ac   :  { %9341 = vmatprep.subr.bf16.mxu1 %v10658_v28  ;;  %v9305_v4 = vpop.f32.mrb[117].mxu1 }
 0x9ad   :  { %v6468_v29 = vpop.f32.mrb[118].mxu1  ;;  %v10638_v4 = vld [vmem:[%s12881_s8 + $0x1a8] sm:$0xff]  }
 0x9ae   :  { %v12590_v63 = vpack.c.bf16 %v6468_v29, %v6465_v52  ;;  %v9306_v56 = vpop.f32.mrb[119].mxu1  ;;  %v10637_v52 = vld [vmem:[%s12881_s8 + $0x1a0] sm:$0xff]   ;;  %v10639_v29 = vld [vmem:[%s12881_s8 + $0x1b0] sm:$0xff]  }
 0x9af   :  { %9342 = vmatpush3.bf16.msra.mxu1 %v10594_v54  ;;  %v10636_v54 = vld [vmem:[%s12881_s8 + $0x198] sm:$0xff]   ;;  %v10641_v56 = vld [vmem:[%s12881_s8 + $0x1c0] sm:$0xff]  }
 0x9b0   :  { %9343 = vmatprep.subr.bf16.mxu1 %v10658_v28  ;;  %v6836_v35 = vrot.slane %v12590_v63, 4 }
 0x9b3   :  { %9344 = vmatpush3.bf16.msra.mxu1 %v10595_v22  ;;  %v6473_v3 = vpop.f32.mrb[120].mxu1  ;;  %v10642_v22 = vld [vmem:[%s12881_s8 + $0x1c8] sm:$0xff]  }
 0x9b4   :  { %9345 = vmatprep.subr.bf16.mxu1 %v10658_v28  ;;  %v9309_v34 = vpop.f32.mrb[121].mxu1 }
 0x9b5   :  { %v6476_v15 = vpop.f32.mrb[122].mxu1  ;;  %v10645_v34 = vld [vmem:[%s12881_s8 + $0x1e0] sm:$0xff]  }
 0x9b6   :  { %v12600_v25 = vpack.c.bf16 %v6476_v15, %v6473_v3  ;;  %v9310_v36 = vpop.f32.mrb[123].mxu1  ;;  %v10644_v3 = vld [vmem:[%s12881_s8 + $0x1d8] sm:$0xff]   ;;  %v10646_v15 = vld [vmem:[%s12881_s8 + $0x1e8] sm:$0xff]  }
 0x9b7   :  { %9346 = vmatpush3.bf16.msra.mxu1 %v10596_v18  ;;  %v10643_v18 = vld [vmem:[%s12881_s8 + $0x1d0] sm:$0xff]  }
 0x9b8   :  { %9347 = vmatprep.subr.bf16.mxu1 %v10658_v28  ;;  %v7051_v60 = vrot.slane %v12600_v25, 4 }
 0x9bb   :  { %9348 = vmatpush3.bf16.msra.mxu1 %v10597_v10  ;;  %v6481_v31 = vpop.f32.mrb[124].mxu1 }
 0x9bc   :  { %9349 = vmatprep.subr.bf16.mxu1 %v10658_v28  ;;  %v9313_v33 = vpop.f32.mrb[125].mxu1 }
 0x9bd   :  { %v6484_v19 = vpop.f32.mrb[126].mxu1 }
 0x9be   :  { %v12652_v38 = vpack.c.bf16 %v6484_v19, %v6481_v31  ;;  %v9314_v42 = vpop.f32.mrb[127].mxu1 }
 0x9bf   :  { %9350 = vmatpush3.bf16.msra.mxu1 %v10598_v12  ;;  %v10647_v12 = vld [vmem:[%s12881_s8 + $0x1f0] sm:$0xff]  }
 0x9c0   :  { %9351 = vmatprep.subr.bf16.mxu1 %v10658_v28 }
 0x9c3   :  { %9352 = vmatpush3.bf16.msra.mxu1 %v10599_v59  ;;  %v12672_v45 = vpop.f32.mrb[128].mxu1 }
 0x9c4   :  { %9353 = vmatprep.subr.bf16.mxu1 %v10658_v28  ;;  %v9317_v62 = vpop.f32.mrb[129].mxu1 }
 0x9c5   :  { %v6492_v48 = vpop.f32.mrb[130].mxu1 }
 0x9c6   :  { %v9318_v50 = vpop.f32.mrb[131].mxu1 }
 0x9c7   :  { %9354 = vmatpush3.bf16.msra.mxu1 %v10600_v61  ;;  %v10648_v61 = vld [vmem:[%s12881_s8 + $0x1f8] sm:$0xff]  }
 0x9c8   :  { %9359 = vmatprep.subr.bf16.mxu1 %v10658_v28 }
 0x9ca   :  { %9356 = vmatmul.mubr.bf16.vlgmr.msra.gmra.mrb[136].mxu1 %v6495_v53  ;;  %v10633_v53 = vld [vmem:[%s12881_s8 + $0x180] sm:$0xff]  }
 0x9cb   :  { %9360 = vmatpush3.bf16.msra.mxu1 %v10601_v14  ;;  %9375 = vmatprep.mubr.msk.bf16.mxu1 %vm10659_vm0, %v10658_v28  ;;  %v10649_v14 = vld [vmem:[%s12881_s8 + $0x200] sm:$0xff]  }
 0x9cc   :  { %9361 = vmatprep.subr.bf16.mxu1 %v10658_v28 }
 0x9cf   :  { %9362 = vmatpush3.bf16.msra.mxu1 %v10602_v32  ;;  %v7266_v32 = vrot.slane %v12652_v38, 4 }
 0x9d0   :  { %9363 = vmatprep.subr.bf16.mxu1 %v10658_v28 }
 0x9d3   :  { %9364 = vmatpush3.bf16.msra.mxu1 %v10603_v17  ;;  %v10650_v17 = vld [vmem:[%s12881_s8 + $0x208] sm:$0xff]  }
 0x9d4   :  { %9365 = vmatprep.subr.bf16.mxu1 %v10658_v28 }
 0x9d7   :  { %9366 = vmatpush3.bf16.msra.mxu1 %v10604_v39  ;;  %v10651_v39 = vld [vmem:[%s12881_s8 + $0x210] sm:$0xff]  }
 0x9d8   :  { %9367 = vmatprep.subr.bf16.mxu1 %v10658_v28 }
 0x9db   :  { %9368 = vmatpush3.bf16.msra.mxu1 %v10605_v5  ;;  %v10652_v5 = vld [vmem:[%s12881_s8 + $0x218] sm:$0xff]  }
 0x9dc   :  { %9369 = vmatprep.subr.bf16.mxu1 %v10658_v28 }
 0x9df   :  { %9370 = vmatpush3.bf16.msra.mxu1 %v10606_v37  ;;  %v10653_v37 = vld [vmem:[%s12881_s8 + $0x220] sm:$0xff]  }
 0x9e0   :  { %9371 = vmatprep.subr.bf16.mxu1 %v10658_v28 }
 0x9e3   :  { %9372 = vmatpush3.bf16.msra.mxu1 %v10607_v26  ;;  %v10654_v26 = vld [vmem:[%s12881_s8 + $0x228] sm:$0xff]  }
 0x9e4   :  { %9373 = vmatprep.subr.bf16.mxu1 %v10658_v28 }
 0x9e7   :  { %9374 = vmatpush3.bf16.msra.mxu1 %v10608_v24 }
 0x9e8   :  { %9379 = vmatprep.subr.bf16.mxu1 %v10658_v28 }
 0x9ea   :  { %9376 = vmatmul.mubr.bf16.vlgmr.msra.gmra.mrb[140].mxu1 %v12590_v63  ;;  %v10640_v63 = vld [vmem:[%s12881_s8 + $0x1b8] sm:$0xff]  }
 0x9eb   :  { %9380 = vmatpush3.bf16.msra.mxu1 %v10609_v0  ;;  %9395 = vmatprep.mubr.msk.bf16.mxu1 %vm10659_vm0, %v10658_v28  ;;  %v10656_v0 = vld [vmem:[%s12881_s8 + $0x238] sm:$0xff]  }
 0x9ec   :  { %9381 = vmatprep.subr.bf16.mxu1 %v10658_v28 }
 0x9ef   :  { %9382 = vmatpush3.bf16.msra.mxu1 %v10610_v47  ;;  %v6499_v47 = vpack.c.bf16 %v12672_v45, %v12672_v45 }
 0x9f0   :  { %9383 = vmatprep.subr.bf16.mxu1 %v10658_v28 }
 0x9f3   :  { %9384 = vmatpush3.bf16.msra.mxu1 %v10611_v40 }
 0x9f4   :  { %9385 = vmatprep.subr.bf16.mxu1 %v10658_v28 }
 0x9f7   :  { %9386 = vmatpush3.bf16.msra.mxu1 %v10612_v21 }
 0x9f8   :  { %9387 = vmatprep.subr.bf16.mxu1 %v10658_v28 }
 0x9fb   :  { %9388 = vmatpush3.bf16.msra.mxu1 %v10613_v6 }
 0x9fc   :  { %9389 = vmatprep.subr.bf16.mxu1 %v10658_v28 }
 0x9ff   :  { %9390 = vmatpush3.bf16.msra.mxu1 %v10614_v51 }
 0xa00   :  { %9391 = vmatprep.subr.bf16.mxu1 %v10658_v28 }
 0xa03   :  { %9392 = vmatpush3.bf16.msra.mxu1 %v10615_v55 }
 0xa04   :  { %9393 = vmatprep.subr.bf16.mxu1 %v10658_v28 }
 0xa07   :  { %9394 = vmatpush3.bf16.msra.mxu1 %v10616_v57 }
 0xa08   :  { %9399 = vmatprep.subr.bf16.mxu1 %v10658_v28 }
 0xa0a   :  { %9396 = vmatmul.mubr.bf16.vlgmr.msra.gmra.mrb[144].mxu1 %v6836_v35 }
 0xa0b   :  { %9400 = vmatpush3.bf16.msra.mxu1 %v10617_v23  ;;  %9415 = vmatprep.mubr.msk.bf16.mxu1 %vm10659_vm0, %v10658_v28 }
 0xa0c   :  { %9401 = vmatprep.subr.bf16.mxu1 %v10658_v28 }
 0xa0f   :  { %9402 = vmatpush3.bf16.msra.mxu1 %v10618_v58 }
 0xa10   :  { %9403 = vmatprep.subr.bf16.mxu1 %v10658_v28 }
 0xa13   :  { %9404 = vmatpush3.bf16.msra.mxu1 %v10619_v30 }
 0xa14   :  { %9405 = vmatprep.subr.bf16.mxu1 %v10658_v28 }
 0xa17   :  { %9406 = vmatpush3.bf16.msra.mxu1 %v10620_v1 }
 0xa18   :  { %9407 = vmatprep.subr.bf16.mxu1 %v10658_v28 }
 0xa1b   :  { %9408 = vmatpush3.bf16.msra.mxu1 %v10621_v46 }
 0xa1c   :  { %9409 = vmatprep.subr.bf16.mxu1 %v10658_v28 }
 0xa1f   :  { %9410 = vmatpush3.bf16.msra.mxu1 %v10622_v2 }
 0xa20   :  { %9411 = vmatprep.subr.bf16.mxu1 %v10658_v28 }
 0xa23   :  { %9412 = vmatpush3.bf16.msra.mxu1 %v10623_v7 }
 0xa24   :  { %9413 = vmatprep.subr.bf16.mxu1 %v10658_v28 }
 0xa27   :  { %9414 = vmatpush3.bf16.msra.mxu1 %v10624_v9 }
 0xa28   :  { %9419 = vmatprep.subr.bf16.mxu1 %v10658_v28 }
 0xa2a   :  { %9416 = vmatmul.mubr.bf16.vlgmr.msra.gmra.mrb[148].mxu1 %v12600_v25 }
 0xa2b   :  { %9420 = vmatpush3.bf16.msra.mxu1 %v10625_v13  ;;  %9435 = vmatprep.mubr.msk.bf16.mxu1 %vm10659_vm0, %v10658_v28 }
 0xa2c   :  { %9421 = vmatprep.subr.bf16.mxu1 %v10658_v28 }
 0xa2f   :  { %9422 = vmatpush3.bf16.msra.mxu1 %v10626_v41 }
 0xa30   :  { %9423 = vmatprep.subr.bf16.mxu1 %v10658_v28 }
 0xa33   :  { %9424 = vmatpush3.bf16.msra.mxu1 %v10627_v11 }
 0xa34   :  { %9425 = vmatprep.subr.bf16.mxu1 %v10658_v28 }
 0xa37   :  { %9426 = vmatpush3.bf16.msra.mxu1 %v10628_v43 }
 0xa38   :  { %9427 = vmatprep.subr.bf16.mxu1 %v10658_v28 }
 0xa3b   :  { %9428 = vmatpush3.bf16.msra.mxu1 %v10629_v16 }
 0xa3c   :  { %9429 = vmatprep.subr.bf16.mxu1 %v10658_v28 }
 0xa3f   :  { %9430 = vmatpush3.bf16.msra.mxu1 %v10630_v44 }
 0xa40   :  { %9431 = vmatprep.subr.bf16.mxu1 %v10658_v28 }
 0xa43   :  { %9432 = vmatpush3.bf16.msra.mxu1 %v10631_v20 }
 0xa44   :  { %9433 = vmatprep.subr.bf16.mxu1 %v10658_v28 }
 0xa47   :  { %9434 = vmatpush3.bf16.msra.mxu1 %v10632_v27 }
 0xa48   :  { %9439 = vmatprep.subr.bf16.mxu1 %v10658_v28 }
 0xa4a   :  { %9436 = vmatmul.mubr.bf16.vlgmr.msra.gmra.mrb[152].mxu1 %v7051_v60 }
 0xa4b   :  { %9440 = vmatpush3.bf16.msra.mxu1 %v10633_v53  ;;  %9455 = vmatprep.mubr.msk.bf16.mxu1 %vm10659_vm0, %v10658_v28 }
 0xa4c   :  { %9441 = vmatprep.subr.bf16.mxu1 %v10658_v28 }
 0xa4f   :  { %9442 = vmatpush3.bf16.msra.mxu1 %v10634_v49 }
 0xa50   :  { %9443 = vmatprep.subr.bf16.mxu1 %v10658_v28 }
 0xa53   :  { %9444 = vmatpush3.bf16.msra.mxu1 %v10635_v8  ;;  %v8426_v8 = vld [vmem:[%s12883_s9] ss:$0 sm:$0xff] }
 0xa54   :  { %9445 = vmatprep.subr.bf16.mxu1 %v10658_v28 }
 0xa57   :  { %9446 = vmatpush3.bf16.msra.mxu1 %v10636_v54 }
 0xa58   :  { %9447 = vmatprep.subr.bf16.mxu1 %v10658_v28 }
 0xa5b   :  { %9448 = vmatpush3.bf16.msra.mxu1 %v10637_v52 }
 0xa5c   :  { %9449 = vmatprep.subr.bf16.mxu1 %v10658_v28 }
 0xa5f   :  { %9450 = vmatpush3.bf16.msra.mxu1 %v10638_v4 }
 0xa60   :  { %9451 = vmatprep.subr.bf16.mxu1 %v10658_v28 }
 0xa63   :  { %9452 = vmatpush3.bf16.msra.mxu1 %v10639_v29 }
 0xa64   :  { %9453 = vmatprep.subr.bf16.mxu1 %v10658_v28 }
 0xa67   :  { %9454 = vmatpush3.bf16.msra.mxu1 %v10640_v63 }
 0xa68   :  { %9459 = vmatprep.subr.bf16.mxu1 %v10658_v28 }
 0xa6a   :  { %9456 = vmatmul.mubr.bf16.vlgmr.msra.gmra.mrb[156].mxu1 %v12652_v38  ;;  %v10655_v38 = vld [vmem:[%s12881_s8 + $0x230] sm:$0xff]  }
 0xa6b   :  { %9460 = vmatpush3.bf16.msra.mxu1 %v10641_v56  ;;  %9475 = vmatprep.mubr.msk.bf16.mxu1 %vm10659_vm0, %v10658_v28 }
 0xa6c   :  { %9461 = vmatprep.subr.bf16.mxu1 %v10658_v28 }
 0xa6f   :  { %9462 = vmatpush3.bf16.msra.mxu1 %v10642_v22 }
 0xa70   :  { %9463 = vmatprep.subr.bf16.mxu1 %v10658_v28 }
 0xa73   :  { %9464 = vmatpush3.bf16.msra.mxu1 %v10643_v18 }
 0xa74   :  { %9465 = vmatprep.subr.bf16.mxu1 %v10658_v28 }
 0xa77   :  { %9466 = vmatpush3.bf16.msra.mxu1 %v10644_v3 }
 0xa78   :  { %9467 = vmatprep.subr.bf16.mxu1 %v10658_v28 }
 0xa7b   :  { %9468 = vmatpush3.bf16.msra.mxu1 %v10645_v34 }
 0xa7c   :  { %9469 = vmatprep.subr.bf16.mxu1 %v10658_v28 }
 0xa7d   :  { %v6618_v25 = vpop.f32.mrb[132].mxu1 }
 0xa7e   :  { %v9337_v36 = vpop.f32.mrb[133].mxu1 }
 0xa7f   :  { %9470 = vmatpush3.bf16.msra.mxu1 %v10646_v15  ;;  %v6621_v10 = vpop.f32.mrb[134].mxu1 }
 0xa80   :  { %v9338_v59 = vpop.f32.mrb[135].mxu1  ;;  %9471 = vmatprep.subr.bf16.mxu1 %v10658_v28 }
 0xa83   :  { %9472 = vmatpush3.bf16.msra.mxu1 %v10647_v12 }
 0xa84   :  { %9473 = vmatprep.subr.bf16.mxu1 %v10658_v28 }
 0xa87   :  { %9474 = vmatpush3.bf16.msra.mxu1 %v10648_v61 }
 0xa88   :  { %9479 = vmatprep.subr.bf16.mxu1 %v10658_v28 }
 0xa8a   :  { %9476 = vmatmul.mubr.bf16.vlgmr.msra.gmra.mrb[160].mxu1 %v7266_v32 }
 0xa8b   :  { %9480 = vmatpush3.bf16.msra.mxu1 %v10649_v14  ;;  %9495 = vmatprep.mubr.msk.bf16.mxu1 %vm10659_vm0, %v10658_v28 }
 0xa8c   :  { %9481 = vmatprep.subr.bf16.mxu1 %v10658_v28 }
 0xa8f   :  { %9482 = vmatpush3.bf16.msra.mxu1 %v10650_v17 }
 0xa90   :  { %9483 = vmatprep.subr.bf16.mxu1 %v10658_v28 }
 0xa93   :  { %9484 = vmatpush3.bf16.msra.mxu1 %v10651_v39 }
 0xa94   :  { %9485 = vmatprep.subr.bf16.mxu1 %v10658_v28 }
 0xa97   :  { %9486 = vmatpush3.bf16.msra.mxu1 %v10652_v5 }
 0xa98   :  { %9487 = vmatprep.subr.bf16.mxu1 %v10658_v28 }
 0xa9b   :  { %9488 = vmatpush3.bf16.msra.mxu1 %v10653_v37 }
 0xa9c   :  { %9489 = vmatprep.subr.bf16.mxu1 %v10658_v28 }
 0xa9d   :  { %v6706_v24 = vpop.f32.mrb[136].mxu1 }
 0xa9e   :  { %v6707_v31 = vadd.f32 %v6706_v24, %v6618_v25  ;;  %v9357_v33 = vpop.f32.mrb[137].mxu1 }
 0xa9f   :  { %v6709_v19 = vpop.f32.mrb[138].mxu1  ;;  %9490 = vmatpush3.bf16.msra.mxu1 %v10654_v26 }
 0xaa0   :  { %v9358_v42 = vpop.f32.mrb[139].mxu1  ;;  %9491 = vmatprep.subr.bf16.mxu1 %v10658_v28 }
 0xaa3   :  { %9492 = vmatpush3.bf16.msra.mxu1 %v10655_v38 }
 0xaa4   :  { %9493 = vmatprep.subr.bf16.mxu1 %v10658_v28 }
 0xaa7   :  { %9494 = vmatpush3.bf16.msra.mxu1 %v10656_v0 }
 0xaaa   :  { %9496 = vmatmul.mubr.bf16.vlgmr.msra.gmra.mrb[164].mxu1 %v6499_v47 }
 0xabd   :  { %v6811_v40 = vpop.f32.mrb[140].mxu1 }
 0xabe   :  { %v6817_v21 = vadd.f32 %v6811_v40, %v6707_v31  ;;  %v9377_v62 = vpop.f32.mrb[141].mxu1 }
 0xabf   :  { %v6814_v48 = vpop.f32.mrb[142].mxu1 }
 0xac0   :  { %v9378_v50 = vpop.f32.mrb[143].mxu1 }
 0xadd   :  { %v6920_v6 = vpop.f32.mrb[144].mxu1 }
 0xade   :  { %v6926_v51 = vadd.f32 %v6920_v6, %v6817_v21  ;;  %v9397_v55 = vpop.f32.mrb[145].mxu1 }
 0xadf   :  { %v6923_v57 = vpop.f32.mrb[146].mxu1 }
 0xae0   :  { %v9398_v23 = vpop.f32.mrb[147].mxu1 }
 0xafd   :  { %v7026_v35 = vpop.f32.mrb[148].mxu1 }
 0xafe   :  { %v7032_v58 = vadd.f32 %v7026_v35, %v6926_v51  ;;  %v9417_v30 = vpop.f32.mrb[149].mxu1 }
 0xaff   :  { %v7029_v1 = vpop.f32.mrb[150].mxu1 }
 0xb00   :  { %v9418_v28 = vpop.f32.mrb[151].mxu1 }
 0xb1d   :  { %v7135_v46 = vpop.f32.mrb[152].mxu1 }
 0xb1e   :  { %v7141_v2 = vadd.f32 %v7135_v46, %v7032_v58  ;;  %v9437_v7 = vpop.f32.mrb[153].mxu1 }
 0xb1f   :  { %v7138_v45 = vpop.f32.mrb[154].mxu1 }
 0xb20   :  { %v9438_v9 = vpop.f32.mrb[155].mxu1 }
 0xb3d   :  { %v7241_v13 = vpop.f32.mrb[156].mxu1 }
 0xb3e   :  { %v7247_v41 = vadd.f32 %v7241_v13, %v7141_v2  ;;  %v9457_v11 = vpop.f32.mrb[157].mxu1 }
 0xb3f   :  { %v7244_v43 = vpop.f32.mrb[158].mxu1 }
 0xb40   :  { %v9458_v16 = vpop.f32.mrb[159].mxu1 }
 0xb5d   :  { %v7350_v44 = vpop.f32.mrb[160].mxu1 }
 0xb5e   :  { %v7356_v20 = vadd.f32 %v7350_v44, %v7247_v41  ;;  %v9477_v27 = vpop.f32.mrb[161].mxu1 }
 0xb5f   :  { %v7353_v53 = vpop.f32.mrb[162].mxu1 }
 0xb60   :  { %v9478_v60 = vpop.f32.mrb[163].mxu1 }
 0xb7d   :  { %v7456_v49 = vpop.f32.mrb[164].mxu1 }
 0xb7e   :  { %v7462_v54 = vadd.f32 %v7456_v49, %v7356_v20  ;;  %v9497_v52 = vpop.f32.mrb[165].mxu1 }
 0xb7f   :  { %v7459_v4 = vpop.f32.mrb[166].mxu1 }
 0xb80   :  { %v7470_v29 = vadd.f32 %v8426_v8, %v7462_v54  ;;  %v9498_v63 = vpop.f32.mrb[167].mxu1 }
 0xb82   :  { %7471 = vst [vmem:[%s12884_s10] sm:$0xff] %v7470_v29 }

</bundles_post_ra>
